<compile_context>
chip_gen: v7x
topology: tpu7x:2x2x1
jax: 0.10.0
libtpu: 0.0.40
codegen_flags: <defaults>
</compile_context>

<pallas_src>
import math

import jax
import jax.numpy as jnp
from jax import lax
from jax.experimental import pallas as pl
from jax.experimental.pallas import tpu as pltpu

KH = KW = 4
STRIDE = 2
PAD = 1

# ConvTranspose2d kernel row/col used by tap dy/dx of output phase ry/rx:
# output row oy = 2*qy + ry pulls from padded-input rows {qy+ry, qy+ry+1}
# with kernel rows _KTAP[ry] = (ky for dy=0, ky for dy=1).  Same along width.
_KTAP = ((3, 1), (2, 0))


def _cdiv(a, b):
    return -(-a // b)


def _round_up(a, b):
    return _cdiv(a, b) * b


def _min_row_tiles():
    """>=2 row tiles on 2-TensorCore chips (parallel grid axes shard across TCs);
    1 tile on single-TC chips (v5e/v6e), where extra grid steps are pure overhead."""
    try:
        kind = jax.devices()[0].device_kind.lower()
    except Exception:
        return 2
    if "lite" in kind or "v5e" in kind or "v6e" in kind:
        return 1
    return 2


def _choose_fold(k0, nc):
    """Smallest window-fold factor F making both K = F*k0 and N = F*nc multiples
    of 128 (full vregs, unmasked stores).  Falls back to 1 (lane-sparse)."""
    for f in (1, 2, 4, 8, 16, 32):
        if (f * k0) % 128 == 0 and (f * nc) % 128 == 0:
            return f
    return 1


def _cup2_kernel(p_ref, w_ref, b_ref, o_ref):
    """One fused MXU matmul per row tile.

    p_ref: (TM, F*8*Cin)        im2col patches, F windows folded along lanes
    w_ref: (F*8*Cin, F*8*Cout)  block-diagonal complex/phase weight kron(I_F, W0)
    b_ref: (1, F*8*Cout)        effective complex biases, tiled per phase & window
    o_ref: (TM, F*8*Cout)
    """
    o_ref[...] = jnp.dot(p_ref[...], w_ref[...],
                         preferred_element_type=jnp.float32) + b_ref[...]


def _tap_block(w_r, w_i, ky, kx):
    """(Cin, Cout, KH, KW) weights -> (2*Cin, 2*Cout) block for one tap:
    rows = [real-channel rows; imag-channel rows], cols = [real out | imag out]."""
    Wr = w_r[:, :, ky, kx]
    Wi = w_i[:, :, ky, kx]
    top = jnp.concatenate([Wr, Wi], axis=1)       # real input channels
    bot = jnp.concatenate([-Wi, Wr], axis=1)      # imag input channels
    return jnp.concatenate([top, bot], axis=0)


def complex_conv_transpose2d(x_r, x_i, w_r, w_i, b_r, b_i, *, use_bf16_mxu=False):
    """x_r, x_i: (N, Cin, H, W) f32; w_*: (Cin, Cout, 4, 4); b_*: (Cout,).
    Returns (out_r, out_i) with shape (N, Cout, 2H, 2W)."""
    N, Cin, H, W = x_r.shape
    Cout = w_r.shape[1]
    K0 = 8 * Cin     # 4 taps x (real, imag) input channels
    NC = 8 * Cout    # 4 phases x (real, imag) output channels

    # ---- activations: NCHW -> NHWC, real/imag along channels, 1-pad, im2col ----
    xr = jnp.transpose(x_r, (0, 2, 3, 1))
    xi = jnp.transpose(x_i, (0, 2, 3, 1))
    x_ri = jnp.concatenate([xr, xi], axis=-1).astype(jnp.float32)   # (N,H,W,2Cin)
    xpad = jnp.pad(x_ri, ((0, 0), (1, 1), (1, 1), (0, 0)))
    cols = [xpad[:, dy:dy + H + 1, dx:dx + W + 1, :]
            for dy in range(2) for dx in range(2)]
    patches = jnp.concatenate(cols, axis=-1)                        # (N,H+1,W+1,K0)

    M0 = (H + 1) * (W + 1)
    M = N * M0                                    # batch folded into the row dim
    patches = patches.reshape(M, K0)

    # ---- weight W0: per tap [[Wr, Wi], [-Wi, Wr]], taps along rows, phases along cols
    phase_cols = []
    for ry in range(2):
        for rx in range(2):
            taps = [_tap_block(w_r, w_i, _KTAP[ry][dy], _KTAP[rx][dx])
                    for dy in range(2) for dx in range(2)]
            phase_cols.append(jnp.concatenate(taps, axis=0))        # (K0, 2Cout)
    w0 = jnp.concatenate(phase_cols, axis=1).astype(jnp.float32)    # (K0, NC)

    # ---- window folding: F windows per kernel row, block-diagonal weight --------
    F = _choose_fold(K0, NC)
    Kf, NCf = F * K0, F * NC
    w_blk = jnp.kron(jnp.eye(F, dtype=jnp.float32), w0) if F > 1 else w0

    # Effective complex biases: real gets (b_r - b_i), imag gets (b_r + b_i);
    # identical for every phase and every folded window.
    b_phase = jnp.concatenate([b_r - b_i, b_r + b_i]).astype(jnp.float32)
    b_blk = jnp.tile(b_phase, 4 * F).reshape(1, NCf)

    # ---- row tiling: few large tiles; 2-way split only where 2 TCs exist --------
    sublane = 16 if use_bf16_mxu else 8           # bf16 packs 16 sublanes / vreg
    Mf = _cdiv(M, F)
    n_tiles = max(_min_row_tiles(), _cdiv(Mf, 1024))
    TMf = _round_up(_cdiv(Mf, n_tiles), sublane)
    Mf_p = TMf * n_tiles

    patches = jnp.pad(patches, ((0, Mf_p * F - M), (0, 0))).reshape(Mf_p, Kf)

    in_dtype = jnp.bfloat16 if use_bf16_mxu else jnp.float32
    itemsize = 2 if use_bf16_mxu else 4
    patches = patches.astype(in_dtype)
    w_blk = w_blk.astype(in_dtype)

    cost = pl.CostEstimate(
        flops=2 * Mf_p * Kf * NCf,
        transcendentals=0,
        bytes_accessed=(Mf_p * Kf * itemsize + Kf * NCf * itemsize
                        + NCf * 4 + Mf_p * NCf * 4))

    out = pl.pallas_call(
        _cup2_kernel,
        out_shape=jax.ShapeDtypeStruct((Mf_p, NCf), jnp.float32),
        grid=(n_tiles,),
        in_specs=[
            pl.BlockSpec((TMf, Kf), lambda m: (m, 0)),
            pl.BlockSpec((Kf, NCf), lambda m: (0, 0)),
            pl.BlockSpec((1, NCf), lambda m: (0, 0)),
        ],
        out_specs=pl.BlockSpec((TMf, NCf), lambda m: (m, 0)),
        compiler_params=pltpu.CompilerParams(
            dimension_semantics=("parallel",)),
        cost_estimate=cost,
    )(patches, w_blk, b_blk)

    # ---- unfold windows, drop padding, pick phase windows, pixel-shuffle --------
    R = out.reshape(Mf_p * F, NC)[:M].reshape(N, H + 1, W + 1, 2, 2, 2, Cout)
    ph = jnp.stack(
        [jnp.stack([R[:, ry:ry + H, rx:rx + W, ry, rx] for rx in range(2)], axis=3)
         for ry in range(2)],
        axis=2)                                   # (N, H, 2, W, 2, 2, Cout)
    y = ph.reshape(N, 2 * H, 2 * W, 2, Cout)
    out_r = jnp.transpose(y[..., 0, :], (0, 3, 1, 2))   # NHWC -> NCHW
    out_i = jnp.transpose(y[..., 1, :], (0, 3, 1, 2))
    return out_r, out_i


def cup2_forward(x_complex, params, *, use_bf16_mxu=False):
    """CUp2.forward: (N, Cin, H, W) complex64 -> (N, Cout, 2H, 2W) complex64."""
    out_r, out_i = complex_conv_transpose2d(
        jnp.real(x_complex).astype(jnp.float32),
        jnp.imag(x_complex).astype(jnp.float32),
        params["w_r"], params["w_i"], params["b_r"], params["b_i"],
        use_bf16_mxu=use_bf16_mxu)
    return lax.complex(out_r, out_i)


# ---------------- pure-JAX reference (for correctness check only) ----------------
def _ref_convT(x, w, b):
    # x: (N, Cin, H, W); w: (Cin, Cout, KH, KW) — PyTorch ConvTranspose2d semantics.
    w_rot = jnp.transpose(w[:, :, ::-1, ::-1], (1, 0, 2, 3))  # (Cout, Cin, KH, KW)
    y = lax.conv_general_dilated(
        x, w_rot, window_strides=(1, 1),
        padding=[(KH - 1 - PAD, KH - 1 - PAD), (KW - 1 - PAD, KW - 1 - PAD)],
        lhs_dilation=(STRIDE, STRIDE),
        dimension_numbers=('NCHW', 'OIHW', 'NCHW'))
    return y + b.reshape(1, -1, 1, 1)


def _ref_cup2(x_complex, params):
    xr = jnp.real(x_complex).astype(jnp.float32)
    xi = jnp.imag(x_complex).astype(jnp.float32)
    out_r = _ref_convT(xr, params["w_r"], params["b_r"]) - _ref_convT(xi, params["w_i"], params["b_i"])
    out_i = _ref_convT(xi, params["w_r"], params["b_r"]) + _ref_convT(xr, params["w_i"], params["b_i"])
    return lax.complex(out_r, out_i)


if __name__ == "__main__":
    N, Cin, Cout, H, W = 2, 4, 6, 16, 16

    key = jax.random.PRNGKey(0)
    k_xr, k_xi, k_wr, k_wi, k_br, k_bi = jax.random.split(key, 6)

    x = lax.complex(
        jax.random.normal(k_xr, (N, Cin, H, W), jnp.float32),
        jax.random.normal(k_xi, (N, Cin, H, W), jnp.float32))

    bound = 1.0 / math.sqrt(Cout * KH * KW)
    params = {
        "w_r": jax.random.uniform(k_wr, (Cin, Cout, KH, KW), jnp.float32, -bound, bound),
        "w_i": jax.random.uniform(k_wi, (Cin, Cout, KH, KW), jnp.float32, -bound, bound),
        "b_r": jax.random.uniform(k_br, (Cout,), jnp.float32, -bound, bound),
        "b_i": jax.random.uniform(k_bi, (Cout,), jnp.float32, -bound, bound),
    }

    out = jax.jit(cup2_forward)(x, params)
    jax.block_until_ready(out)

    ref = _ref_cup2(x, params)
    assert out.shape == (N, Cout, 2 * H, 2 * W), out.shape
    assert out.dtype == jnp.complex64, out.dtype
    assert jnp.allclose(jnp.real(out), jnp.real(ref), atol=1e-4, rtol=1e-4)
    assert jnp.allclose(jnp.imag(out), jnp.imag(ref), atol=1e-4, rtol=1e-4)

    print("KERNEL_OK")
</pallas_src>

<mosaic_0001>
module attributes {stable_mosaic.version = 11 : i64} {
  func.func @_cup2_kernel(%arg0: i32, %arg1: memref<40x256xf32, #tpu.memory_space<vmem>>, %arg2: memref<256x384xf32, #tpu.memory_space<vmem>>, %arg3: memref<1x384xf32, #tpu.memory_space<vmem>>, %arg4: memref<40x384xf32, #tpu.memory_space<vmem>>) attributes {dimension_semantics = [#tpu.dimension_semantics<parallel>], iteration_bounds = array<i64: 2>, scalar_prefetch = 0 : i64, scratch_operands = 0 : i64, tpu.core_type = #tpu.core_type<tc>, window_params = [{transform_indices = @transform_0, window_bounds = array<i64: 40, 256>}, {pipeline_mode = #tpu.pipeline_mode<synchronous>, transform_indices = @transform_1, window_bounds = array<i64: 256, 384>}, {pipeline_mode = #tpu.pipeline_mode<synchronous>, transform_indices = @transform_2, window_bounds = array<i64: 1, 384>}, {transform_indices = @transform_3, window_bounds = array<i64: 40, 384>}]} {
    %c0 = arith.constant 0 : index
    %c0_0 = arith.constant 0 : index
    %0 = vector.load %arg1[%c0, %c0_0] : memref<40x256xf32, #tpu.memory_space<vmem>>, vector<40x256xf32>
    %c0_1 = arith.constant 0 : index
    %c0_2 = arith.constant 0 : index
    %1 = vector.load %arg2[%c0_1, %c0_2] : memref<256x384xf32, #tpu.memory_space<vmem>>, vector<256x384xf32>
    %cst = arith.constant dense<0.000000e+00> : vector<40x384xf32>
    %2 = tpu.matmul %0, %1, %cst {dimension_numbers = #tpu.dot_dimension_numbers<[1], [0], [0], [1], [0, 0, 1, 1], [], []>} : vector<40x256xf32>, vector<256x384xf32>, vector<40x384xf32> -> vector<40x384xf32>
    %c0_3 = arith.constant 0 : index
    %c0_4 = arith.constant 0 : index
    %3 = vector.load %arg3[%c0_3, %c0_4] : memref<1x384xf32, #tpu.memory_space<vmem>>, vector<1x384xf32>
    %4 = vector.broadcast %3 : vector<1x384xf32> to vector<40x384xf32>
    %5 = arith.addf %2, %4 : vector<40x384xf32>
    %c0_5 = arith.constant 0 : index
    %c0_6 = arith.constant 0 : index
    %6 = vector.load %arg4[%c0_5, %c0_6] : memref<40x384xf32, #tpu.memory_space<vmem>>, vector<40x384xf32>
    tpu.vector_store %arg4[%c0_5, %c0_6], %5 {strides = array<i32>} : memref<40x384xf32, #tpu.memory_space<vmem>>, vector<40x384xf32>,
    return
  }
  func.func @transform_0(%arg0: i32) -> (i32, i32) {
    %c0_i32 = arith.constant 0 : i32
    %c0_i32_0 = arith.constant 0 : i32
    return %arg0, %c0_i32 : i32, i32
  }
  func.func @transform_1(%arg0: i32) -> (i32, i32) {
    %c0_i32 = arith.constant 0 : i32
    %c0_i32_0 = arith.constant 0 : i32
    %c0_i32_1 = arith.constant 0 : i32
    return %c0_i32, %c0_i32_0 : i32, i32
  }
  func.func @transform_2(%arg0: i32) -> (i32, i32) {
    %c0_i32 = arith.constant 0 : i32
    %c0_i32_0 = arith.constant 0 : i32
    %c0_i32_1 = arith.constant 0 : i32
    return %c0_i32, %c0_i32_0 : i32, i32
  }
  func.func @transform_3(%arg0: i32) -> (i32, i32) {
    %c0_i32 = arith.constant 0 : i32
    %c0_i32_0 = arith.constant 0 : i32
    return %arg0, %c0_i32 : i32, i32
  }
}

</mosaic_0001>

<bundles_post_ra>
// kernel: tile.8
= control target key start
LH: loop header
LB: loop body
LE: loop exit
PB: predicated region body
PF: predicated region fallthrough
CT: control target
= control target key end

     0   :  { %s40_s0 = inlined_call_operand.vmem [shape: f32[12], index: 0, kind: input, shape index: {}]   ;;  %s41_s1 = inlined_call_operand.vmem [shape: f32[32,12], index: 1, kind: output, shape index: {}]  }
   0x1   :  { %v4_v0 = vld [vmem:[%s40_s0] ss:$0 sm:$0xff] }
   0x2   :  { %5 = vst [vmem:[%s41_s1] sm:$0xff] %v4_v0  ;;  %12 = vst [vmem:[%s41_s1 + $0x8] sm:$0xff] %v4_v0 }
   0x3   :  { %13 = vst [vmem:[%s41_s1 + $0x10] sm:$0xff] %v4_v0  ;;  %14 = vst [vmem:[%s41_s1 + $0x18] sm:$0xff] %v4_v0 }

// kernel: neg.31
= control target key start
LH: loop header
LB: loop body
LE: loop exit
PB: predicated region body
PF: predicated region fallthrough
CT: control target
= control target key end

     0   :  { %s24_s0 = inlined_call_operand.vmem [shape: f32[4,6], index: 0, kind: input, shape index: {}]   ;;  %s25_s1 = inlined_call_operand.vmem [shape: f32[4,6], index: 1, kind: output, shape index: {}]  }
   0x1   :  { %v2_v0 = vld [vmem:[%s24_s0] sm:$0xf] }
   0x2   :  { %v5_v1 = vxor.u32 2147483648, %v2_v0 }
   0x4   :  { %7 = vst [vmem:[%s25_s1] sm:$0xf] %v5_v1 }

// kernel: tile.9
= control target key start
LH: loop header
LB: loop body
LE: loop exit
PB: predicated region body
PF: predicated region fallthrough
CT: control target
= control target key end

     0   :  { %vm9_vm0 = vcmask 31744   ;;  %vm13_vm1 = vcmask 64512   ;;  %s310_s14 = smov 124   ;;  %s311_s15 = smov 116   ;;  %vm3_vm2 = vcmask 97280   ;;  %vm16_vm3 = vcmask 1048544   ;;  %s466_s0 = inlined_call_operand.vmem [shape: f32[32,12], index: 0, kind: input, shape index: {}]   ;;  %s467_s1 = inlined_call_operand.vmem [shape: f32[1,384], index: 1, kind: output, shape index: {}]  }
   0x1   :  { %v244_v0 = vld [vmem:[%s466_s0 + $0x15] sm:$0x1]   ;;  %v248_v3 = vld [vmem:[%s466_s0 + $0x1f] sm:$0x1]   ;;  %v246_v4 = vld [vmem:[%s466_s0 + $0xa] sm:$0x1]  }
   0x2   :  { %v245_v1 = vld [vmem:[%s466_s0 + $0x15] sm:$0x1]   ;;  %34 = vrot.lane.b32.xlu1 %v248_v3, %s311_s15  ;;  %v247_v5 = vld [vmem:[%s466_s0 + $0xa] sm:$0x1]   ;;  %v249_v7 = vld [vmem:[%s466_s0 + $0x14] sm:$0x1]  }
   0x3   :  { %v10_v2 = vsel %vm9_vm0, %v245_v1, %v244_v0  ;;  %v24_v6 = vsel %vm13_vm1, %v247_v5, %v246_v4  ;;  %s312_s20 = smov 120   ;;  %s313_s21 = smov 112   ;;  %v250_v8 = vld [vmem:[%s466_s0 + $0x9] sm:$0x1]   ;;  %v251_v9 = vld [vmem:[%s466_s0 + $0x1e] sm:$0x1]  }
   0x4   :  { %11 = vrot.lane.b32.xlu0 %v10_v2, %s310_s14  ;;  %s314_s26 = smov 108   ;;  %s315_s27 = smov 104   ;;  %v252_v10 = vld [vmem:[%s466_s0 + $0x13] sm:$0x1]   ;;  %v253_v11 = vld [vmem:[%s466_s0 + $0x8] sm:$0x1]  }
   0x5   :  { %s316_s3 = smov 100   ;;  %s317_s4 = smov 96   ;;  %v254_v12 = vld [vmem:[%s466_s0 + $0x1d] sm:$0x1]   ;;  %v255_v13 = vld [vmem:[%s466_s0 + $0x12] sm:$0x1]  }
   0x6   :  { %41 = vrot.lane.b32.xlu1 %v249_v7, %s313_s21  ;;  %v2_v14 = vld [vmem:[%s466_s0] sm:$0x1]   ;;  %s318_s11 = smov 92   ;;  %s319_s12 = smov 88   ;;  %v256_v15 = vld [vmem:[%s466_s0 + $0x7] sm:$0x1]  }
   0x7   :  { %4 = vst.msk [vmem:[#allocation0] sm:$0x1] %vm3_vm2, %v2_v14   ;;  %v257_v16 = vld [vmem:[%s466_s0 + $0x1c] sm:$0x1]   ;;  %s320_s17 = smov 84   ;;  %s321_s18 = smov 80  }
   0x8   :  { %25 = vrot.lane.b32.xlu0 %v24_v6, %s312_s20  ;;  %v258_v17 = vld [vmem:[%s466_s0 + $0x11] sm:$0x1]   ;;  %v259_v18 = vld [vmem:[%s466_s0 + $0x6] sm:$0x1]   ;;  %s322_s23 = smov 76   ;;  %s323_s24 = smov 72  }
   0x9   :  { %v260_v19 = vld [vmem:[%s466_s0 + $0x1b] sm:$0x1]   ;;  %v261_v20 = vld [vmem:[%s466_s0 + $0x10] sm:$0x1]   ;;  %s324_s29 = smov 68   ;;  %s325_s30 = smov 64  }
   0xa   :  { %54 = vrot.lane.b32.xlu1 %v251_v9, %s315_s27  ;;  %v262_v21 = vld [vmem:[%s466_s0 + $0x5] sm:$0x1]   ;;  %v263_v22 = vld [vmem:[%s466_s0 + $0x1a] sm:$0x1]   ;;  %s326_s6 = smov 60   ;;  %s327_s7 = smov 56  }
   0xb   :  { %v264_v23 = vld [vmem:[%s466_s0 + $0xf] sm:$0x1]   ;;  %v265_v24 = vld [vmem:[%s466_s0 + $0x4] sm:$0x1]   ;;  %s329_s13 = smov 48   ;;  %s331_s19 = smov 40  }
   0xc   :  { %48 = vrot.lane.b32.xlu0 %v250_v8, %s314_s26  ;;  %v266_v25 = vld [vmem:[%s466_s0 + $0x19] sm:$0x1]   ;;  %v267_v26 = vld [vmem:[%s466_s0 + $0xe] sm:$0x1]   ;;  %v268_v27 = vld [vmem:[%s466_s0 + $0x3] sm:$0x1]  }
   0xd   :  { %v269_v28 = vld [vmem:[%s466_s0 + $0x18] sm:$0x1]   ;;  %s333_s25 = smov 32   ;;  %v270_v29 = vld [vmem:[%s466_s0 + $0xd] sm:$0x1]   ;;  %s335_s2 = smov 24  }
   0xe   :  { %68 = vrot.lane.b32.xlu1 %v253_v11, %s317_s4  ;;  %v271_v30 = vld [vmem:[%s466_s0 + $0x2] sm:$0x1]   ;;  %v272_v31 = vld [vmem:[%s466_s0 + $0x17] sm:$0x1]   ;;  %v273_v32 = vld [vmem:[%s466_s0 + $0xc] sm:$0x1]  }
   0xf   :  { %s337_s8 = smov 16   ;;  %v274_v33 = vld [vmem:[%s466_s0 + $0x1] sm:$0x1]   ;;  %v275_v34 = vld [vmem:[%s466_s0 + $0x16] sm:$0x1]   ;;  %s339_s14 = smov 8  }
  0x10   :  { %61 = vrot.lane.b32.xlu0 %v252_v10, %s316_s3  ;;  %v276_v35 = vld [vmem:[%s466_s0 + $0xb] sm:$0x1]   ;;  %s340_s0 = smov 4   ;;  %vm36_vm4 = vcmask 1048480   ;;  %vm30_vm5 = vcmask 1048512   ;;  %vm43_vm6 = vcmask 1015680  }
  0x11   :  { %vm50_vm7 = vcmask 982880   ;;  %vm56_vm8 = vcmask 950080   ;;  %vm63_vm9 = vcmask 917280   ;;  %vm70_vm10 = vcmask 884480  }
  0x12   :  { %81 = vrot.lane.b32.xlu1 %v255_v13, %s319_s12  ;;  %s328_s12 = smov 52   ;;  %vm76_vm11 = vcmask 851680   ;;  %vm83_vm12 = vcmask 818880   ;;  %vm90_vm13 = vcmask 786080   ;;  %vm96_vm14 = vcmask 753280  }
  0x13   :  { %vm103_vm15 = vcmask 720480   ;;  %vm123_vm2 = vcmask 622080  }
  0x14   :  { %74 = vrot.lane.b32.xlu0 %v254_v12, %s318_s11 }
  0x16   :  { %94 = vrot.lane.b32.xlu1 %v257_v16, %s321_s18  ;;  %s330_s18 = smov 44  }
  0x18   :  { %88 = vrot.lane.b32.xlu0 %v256_v15, %s320_s17 }
  0x1a   :  { %108 = vrot.lane.b32.xlu1 %v259_v18, %s323_s24  ;;  %s332_s24 = smov 36  }
  0x1c   :  { %101 = vrot.lane.b32.xlu0 %v258_v17, %s322_s23 }
  0x1e   :  { %121 = vrot.lane.b32.xlu1 %v261_v20, %s325_s30  ;;  %s334_s30 = smov 28  }
  0x20   :  { %114 = vrot.lane.b32.xlu0 %v260_v19, %s324_s29 }
  0x22   :  { %134 = vrot.lane.b32.xlu1 %v263_v22, %s327_s7  ;;  %s336_s7 = smov 20  }
  0x24   :  { %128 = vrot.lane.b32.xlu0 %v262_v21, %s326_s6 }
  0x26   :  { %148 = vrot.lane.b32.xlu1 %v265_v24, %s329_s13  ;;  %s338_s13 = smov 12  }
  0x28   :  { %141 = vrot.lane.b32.xlu0 %v264_v23, %s328_s12 }
  0x2a   :  { %161 = vrot.lane.b32.xlu1 %v267_v26, %s331_s19 }
  0x2c   :  { %154 = vrot.lane.b32.xlu0 %v266_v25, %s330_s18 }
  0x2e   :  { %174 = vrot.lane.b32.xlu1 %v269_v28, %s333_s25 }
  0x30   :  { %168 = vrot.lane.b32.xlu0 %v268_v27, %s332_s24 }
  0x32   :  { %188 = vrot.lane.b32.xlu1 %v271_v30, %s335_s2 }
  0x34   :  { %181 = vrot.lane.b32.xlu0 %v270_v29, %s334_s30 }
  0x36   :  { %201 = vrot.lane.b32.xlu1 %v273_v32, %s337_s8 }
  0x38   :  { %194 = vrot.lane.b32.xlu0 %v272_v31, %s336_s7 }
  0x3a   :  { %214 = vrot.lane.b32.xlu1 %v275_v34, %s339_s14 }
  0x3c   :  { %208 = vrot.lane.b32.xlu0 %v274_v33, %s338_s13 }
  0x40   :  { %221 = vrot.lane.b32.xlu0 %v276_v35, %s340_s0 }
  0x74   :  { %v35_v37 = vpop.permute.xlu1 %34  }
  0x76   :  { %v12_v36 = vpop.permute.xlu0 %11  }
  0x77   :  { %15 = vst.msk [vmem:[#allocation0 + $0x10] sm:$0x1] %vm13_vm1, %v12_v36   ;;  %vm116_vm1 = vcmask 654880  }
  0x78   :  { %18 = vst.msk [vmem:[#allocation0 + $0x8] sm:$0x1] %vm16_vm3, %v12_v36   ;;  %v42_v39 = vpop.permute.xlu1 %41   ;;  %vm130_vm3 = vcmask 589280  }
  0x79   :  { %38 = vst.msk [vmem:[#allocation0 + $0x10] sm:$0x1] %vm36_vm4, %v35_v37   ;;  %vm136_vm4 = vcmask 556480  }
  0x7a   :  { %v26_v38 = vpop.permute.xlu0 %25  }
  0x7b   :  { %29 = vst.msk [vmem:[#allocation0 + $0x8] sm:$0x1] %vm9_vm0, %v26_v38   ;;  %vm110_vm0 = vcmask 687680  }
  0x7c   :  { %31 = vst.msk [vmem:[#allocation0] sm:$0x1] %vm30_vm5, %v26_v38   ;;  %v55_v41 = vpop.permute.xlu1 %54   ;;  %vm143_vm5 = vcmask 523680  }
  0x7d   :  { %45 = vst.msk [vmem:[#allocation0 + $0x8] sm:$0x1] %vm43_vm6, %v42_v39   ;;  %vm150_vm6 = vcmask 490880  }
  0x7e   :  { %v49_v40 = vpop.permute.xlu0 %48   ;;  %58 = vst.msk [vmem:[#allocation0 + $0x10] sm:$0x1] %vm56_vm8, %v55_v41   ;;  %vm163_vm8 = vcmask 425280  }
  0x7f   :  { %51 = vst.msk [vmem:[#allocation0] sm:$0x1] %vm50_vm7, %v49_v40   ;;  %vm156_vm7 = vcmask 458080  }
  0x80   :  { %v69_v43 = vpop.permute.xlu1 %68  }
  0x81   :  { %71 = vst.msk [vmem:[#allocation0] sm:$0x1] %vm70_vm10, %v69_v43   ;;  %vm176_vm10 = vcmask 359680  }
  0x82   :  { %v62_v42 = vpop.permute.xlu0 %61  }
  0x83   :  { %65 = vst.msk [vmem:[#allocation0 + $0x8] sm:$0x1] %vm63_vm9, %v62_v42   ;;  %vm170_vm9 = vcmask 392480  }
  0x84   :  { %v82_v45 = vpop.permute.xlu1 %81  }
  0x85   :  { %85 = vst.msk [vmem:[#allocation0 + $0x8] sm:$0x1] %vm83_vm12, %v82_v45   ;;  %vm190_vm12 = vcmask 294080  }
  0x86   :  { %v75_v44 = vpop.permute.xlu0 %74  }
  0x87   :  { %78 = vst.msk [vmem:[#allocation0 + $0x10] sm:$0x1] %vm76_vm11, %v75_v44   ;;  %vm183_vm11 = vcmask 326880  }
  0x88   :  { %v95_v47 = vpop.permute.xlu1 %94  }
  0x89   :  { %98 = vst.msk [vmem:[#allocation0 + $0x10] sm:$0x1] %vm96_vm14, %v95_v47   ;;  %vm203_vm14 = vcmask 228480  }
  0x8a   :  { %v89_v46 = vpop.permute.xlu0 %88  }
  0x8b   :  { %91 = vst.msk [vmem:[#allocation0] sm:$0x1] %vm90_vm13, %v89_v46   ;;  %vm196_vm13 = vcmask 261280  }
  0x8c   :  { %v109_v49 = vpop.permute.xlu1 %108  }
  0x8d   :  { %111 = vst.msk [vmem:[#allocation0] sm:$0x1] %vm110_vm0, %v109_v49   ;;  %vm216_vm0 = vcmask 162880  }
  0x8e   :  { %v102_v48 = vpop.permute.xlu0 %101  }
  0x8f   :  { %105 = vst.msk [vmem:[#allocation0 + $0x8] sm:$0x1] %vm103_vm15, %v102_v48   ;;  %vm210_vm15 = vcmask 195680  }
  0x90   :  { %v122_v51 = vpop.permute.xlu1 %121  }
  0x91   :  { %125 = vst.msk [vmem:[#allocation0 + $0x8] sm:$0x1] %vm123_vm2, %v122_v51  }
  0x92   :  { %v115_v50 = vpop.permute.xlu0 %114  }
  0x93   :  { %118 = vst.msk [vmem:[#allocation0 + $0x10] sm:$0x1] %vm116_vm1, %v115_v50   ;;  %vm223_vm1 = vcmask 130080  }
  0x94   :  { %v135_v53 = vpop.permute.xlu1 %134  }
  0x95   :  { %138 = vst.msk [vmem:[#allocation0 + $0x10] sm:$0x1] %vm136_vm4, %v135_v53  }
  0x96   :  { %v129_v52 = vpop.permute.xlu0 %128  }
  0x97   :  { %131 = vst.msk [vmem:[#allocation0] sm:$0x1] %vm130_vm3, %v129_v52  }
  0x98   :  { %v149_v55 = vpop.permute.xlu1 %148  }
  0x99   :  { %151 = vst.msk [vmem:[#allocation0] sm:$0x1] %vm150_vm6, %v149_v55  }
  0x9a   :  { %v142_v54 = vpop.permute.xlu0 %141  }
  0x9b   :  { %145 = vst.msk [vmem:[#allocation0 + $0x8] sm:$0x1] %vm143_vm5, %v142_v54  }
  0x9c   :  { %v162_v57 = vpop.permute.xlu1 %161  }
  0x9d   :  { %165 = vst.msk [vmem:[#allocation0 + $0x8] sm:$0x1] %vm163_vm8, %v162_v57  }
  0x9e   :  { %v155_v56 = vpop.permute.xlu0 %154  }
  0x9f   :  { %158 = vst.msk [vmem:[#allocation0 + $0x10] sm:$0x1] %vm156_vm7, %v155_v56  }
  0xa0   :  { %v175_v59 = vpop.permute.xlu1 %174  }
  0xa1   :  { %178 = vst.msk [vmem:[#allocation0 + $0x10] sm:$0x1] %vm176_vm10, %v175_v59  }
  0xa2   :  { %v169_v58 = vpop.permute.xlu0 %168  }
  0xa3   :  { %171 = vst.msk [vmem:[#allocation0] sm:$0x1] %vm170_vm9, %v169_v58  }
  0xa4   :  { %v189_v61 = vpop.permute.xlu1 %188  }
  0xa5   :  { %191 = vst.msk [vmem:[#allocation0] sm:$0x1] %vm190_vm12, %v189_v61  }
  0xa6   :  { %v182_v60 = vpop.permute.xlu0 %181  }
  0xa7   :  { %185 = vst.msk [vmem:[#allocation0 + $0x8] sm:$0x1] %vm183_vm11, %v182_v60  }
  0xa8   :  { %v202_v63 = vpop.permute.xlu1 %201  }
  0xa9   :  { %205 = vst.msk [vmem:[#allocation0 + $0x8] sm:$0x1] %vm203_vm14, %v202_v63  }
  0xaa   :  { %v195_v62 = vpop.permute.xlu0 %194  }
  0xab   :  { %198 = vst.msk [vmem:[#allocation0 + $0x10] sm:$0x1] %vm196_vm13, %v195_v62  }
  0xac   :  { %v215_v1 = vpop.permute.xlu1 %214  }
  0xad   :  { %218 = vst.msk [vmem:[#allocation0 + $0x10] sm:$0x1] %vm216_vm0, %v215_v1  }
  0xae   :  { %v209_v0 = vpop.permute.xlu0 %208  }
  0xaf   :  { %211 = vst.msk [vmem:[#allocation0] sm:$0x1] %vm210_vm15, %v209_v0  }
  0xb2   :  { %v222_v2 = vpop.permute.xlu0 %221  }
  0xb3   :  { %225 = vst.msk [vmem:[#allocation0 + $0x8] sm:$0x1] %vm223_vm1, %v222_v2  }
  0xb4   :  { %v238_v4 = vld [vmem:[#allocation0 + $0x10] sm:$0x1] }
  0xb5   :  { %278 = vst [vmem:[%s467_s1 + $0x2] sm:$0x1] %v238_v4 }
  0xb6   :  { %v229_v3 = vld [vmem:[#allocation0] sm:$0x1] }
  0xb7   :  { %231 = vst [vmem:[%s467_s1] sm:$0x1] %v229_v3 }
  0xba   :  { %v233_v5 = vld [vmem:[#allocation0 + $0x8] sm:$0x1] }
  0xbb   :  { %277 = vst [vmem:[%s467_s1 + $0x1] sm:$0x1] %v233_v5 }

// kernel: custom-call.1
= control target key start
LH: loop header
LB: loop body
LE: loop exit
PB: predicated region body
PF: predicated region fallthrough
CT: control target
= control target key end

     0   :  { %s841_s0 = inlined_call_operand.vmem [shape: c64[2,4,16,16], index: 0, kind: input, shape index: {}]   ;;  %s842_s1 = inlined_call_operand.vmem [shape: f32[2,4,16,16], index: 1, kind: output, shape index: {}]  }
   0x1   :  { %v320_v0 = vld [vmem:[%s841_s0 + $0x200] sm:$0xff]  ;;  %v321_v1 = vld [vmem:[%s841_s0 + $0x208] sm:$0xff]  ;;  %v323_v2 = vld [vmem:[%s841_s0 + $0x210] sm:$0xff] }
   0x2   :  { %4 = vst [vmem:[%s842_s1] sm:$0xff] %v320_v0  ;;  %322 = vst [vmem:[%s842_s1 + $0x8] sm:$0xff] %v321_v1  ;;  %v325_v3 = vld [vmem:[%s841_s0 + $0x218] sm:$0xff]  ;;  %v327_v4 = vld [vmem:[%s841_s0 + $0x220] sm:$0xff] }
   0x3   :  { %324 = vst [vmem:[%s842_s1 + $0x10] sm:$0xff] %v323_v2  ;;  %v329_v5 = vld [vmem:[%s841_s0 + $0x228] sm:$0xff]  ;;  %326 = vst [vmem:[%s842_s1 + $0x18] sm:$0xff] %v325_v3  ;;  %v331_v6 = vld [vmem:[%s841_s0 + $0x230] sm:$0xff] }
   0x4   :  { %328 = vst [vmem:[%s842_s1 + $0x20] sm:$0xff] %v327_v4  ;;  %330 = vst [vmem:[%s842_s1 + $0x28] sm:$0xff] %v329_v5  ;;  %v333_v7 = vld [vmem:[%s841_s0 + $0x238] sm:$0xff]  ;;  %v335_v8 = vld [vmem:[%s841_s0 + $0x240] sm:$0xff] }
   0x5   :  { %332 = vst [vmem:[%s842_s1 + $0x30] sm:$0xff] %v331_v6  ;;  %334 = vst [vmem:[%s842_s1 + $0x38] sm:$0xff] %v333_v7  ;;  %v337_v9 = vld [vmem:[%s841_s0 + $0x248] sm:$0xff]  ;;  %v339_v10 = vld [vmem:[%s841_s0 + $0x250] sm:$0xff] }
   0x6   :  { %336 = vst [vmem:[%s842_s1 + $0x40] sm:$0xff] %v335_v8  ;;  %v341_v11 = vld [vmem:[%s841_s0 + $0x258] sm:$0xff]  ;;  %338 = vst [vmem:[%s842_s1 + $0x48] sm:$0xff] %v337_v9  ;;  %v343_v12 = vld [vmem:[%s841_s0 + $0x260] sm:$0xff] }
   0x7   :  { %340 = vst [vmem:[%s842_s1 + $0x50] sm:$0xff] %v339_v10  ;;  %342 = vst [vmem:[%s842_s1 + $0x58] sm:$0xff] %v341_v11  ;;  %v345_v13 = vld [vmem:[%s841_s0 + $0x268] sm:$0xff]  ;;  %v347_v14 = vld [vmem:[%s841_s0 + $0x270] sm:$0xff] }
   0x8   :  { %344 = vst [vmem:[%s842_s1 + $0x60] sm:$0xff] %v343_v12  ;;  %346 = vst [vmem:[%s842_s1 + $0x68] sm:$0xff] %v345_v13  ;;  %v349_v15 = vld [vmem:[%s841_s0 + $0x278] sm:$0xff]  ;;  %v351_v16 = vld [vmem:[%s841_s0 + $0x280] sm:$0xff] }
   0x9   :  { %348 = vst [vmem:[%s842_s1 + $0x70] sm:$0xff] %v347_v14  ;;  %v353_v17 = vld [vmem:[%s841_s0 + $0x288] sm:$0xff]  ;;  %350 = vst [vmem:[%s842_s1 + $0x78] sm:$0xff] %v349_v15  ;;  %v355_v18 = vld [vmem:[%s841_s0 + $0x290] sm:$0xff] }
   0xa   :  { %352 = vst [vmem:[%s842_s1 + $0x80] sm:$0xff] %v351_v16  ;;  %354 = vst [vmem:[%s842_s1 + $0x88] sm:$0xff] %v353_v17  ;;  %v357_v19 = vld [vmem:[%s841_s0 + $0x298] sm:$0xff]  ;;  %v359_v20 = vld [vmem:[%s841_s0 + $0x2a0] sm:$0xff] }
   0xb   :  { %356 = vst [vmem:[%s842_s1 + $0x90] sm:$0xff] %v355_v18  ;;  %358 = vst [vmem:[%s842_s1 + $0x98] sm:$0xff] %v357_v19  ;;  %v361_v21 = vld [vmem:[%s841_s0 + $0x2a8] sm:$0xff]  ;;  %v363_v22 = vld [vmem:[%s841_s0 + $0x2b0] sm:$0xff] }
   0xc   :  { %360 = vst [vmem:[%s842_s1 + $0xa0] sm:$0xff] %v359_v20  ;;  %v365_v23 = vld [vmem:[%s841_s0 + $0x2b8] sm:$0xff]  ;;  %362 = vst [vmem:[%s842_s1 + $0xa8] sm:$0xff] %v361_v21  ;;  %v367_v24 = vld [vmem:[%s841_s0 + $0x2c0] sm:$0xff] }
   0xd   :  { %364 = vst [vmem:[%s842_s1 + $0xb0] sm:$0xff] %v363_v22  ;;  %366 = vst [vmem:[%s842_s1 + $0xb8] sm:$0xff] %v365_v23  ;;  %v369_v25 = vld [vmem:[%s841_s0 + $0x2c8] sm:$0xff]  ;;  %v371_v26 = vld [vmem:[%s841_s0 + $0x2d0] sm:$0xff] }
   0xe   :  { %368 = vst [vmem:[%s842_s1 + $0xc0] sm:$0xff] %v367_v24  ;;  %370 = vst [vmem:[%s842_s1 + $0xc8] sm:$0xff] %v369_v25  ;;  %v373_v27 = vld [vmem:[%s841_s0 + $0x2d8] sm:$0xff]  ;;  %v375_v28 = vld [vmem:[%s841_s0 + $0x2e0] sm:$0xff] }
   0xf   :  { %372 = vst [vmem:[%s842_s1 + $0xd0] sm:$0xff] %v371_v26  ;;  %v377_v29 = vld [vmem:[%s841_s0 + $0x2e8] sm:$0xff]  ;;  %374 = vst [vmem:[%s842_s1 + $0xd8] sm:$0xff] %v373_v27  ;;  %v379_v30 = vld [vmem:[%s841_s0 + $0x2f0] sm:$0xff] }
  0x10   :  { %376 = vst [vmem:[%s842_s1 + $0xe0] sm:$0xff] %v375_v28  ;;  %378 = vst [vmem:[%s842_s1 + $0xe8] sm:$0xff] %v377_v29  ;;  %v381_v31 = vld [vmem:[%s841_s0 + $0x2f8] sm:$0xff]  ;;  %v383_v32 = vld [vmem:[%s841_s0 + $0x300] sm:$0xff] }
  0x11   :  { %380 = vst [vmem:[%s842_s1 + $0xf0] sm:$0xff] %v379_v30  ;;  %382 = vst [vmem:[%s842_s1 + $0xf8] sm:$0xff] %v381_v31  ;;  %v385_v33 = vld [vmem:[%s841_s0 + $0x308] sm:$0xff]  ;;  %v387_v34 = vld [vmem:[%s841_s0 + $0x310] sm:$0xff] }
  0x12   :  { %384 = vst [vmem:[%s842_s1 + $0x100] sm:$0xff] %v383_v32  ;;  %v389_v35 = vld [vmem:[%s841_s0 + $0x318] sm:$0xff]  ;;  %386 = vst [vmem:[%s842_s1 + $0x108] sm:$0xff] %v385_v33  ;;  %v391_v36 = vld [vmem:[%s841_s0 + $0x320] sm:$0xff] }
  0x13   :  { %388 = vst [vmem:[%s842_s1 + $0x110] sm:$0xff] %v387_v34  ;;  %390 = vst [vmem:[%s842_s1 + $0x118] sm:$0xff] %v389_v35  ;;  %v393_v37 = vld [vmem:[%s841_s0 + $0x328] sm:$0xff]  ;;  %v395_v38 = vld [vmem:[%s841_s0 + $0x330] sm:$0xff] }
  0x14   :  { %392 = vst [vmem:[%s842_s1 + $0x120] sm:$0xff] %v391_v36  ;;  %394 = vst [vmem:[%s842_s1 + $0x128] sm:$0xff] %v393_v37  ;;  %v397_v39 = vld [vmem:[%s841_s0 + $0x338] sm:$0xff]  ;;  %v399_v40 = vld [vmem:[%s841_s0 + $0x340] sm:$0xff] }
  0x15   :  { %396 = vst [vmem:[%s842_s1 + $0x130] sm:$0xff] %v395_v38  ;;  %v401_v41 = vld [vmem:[%s841_s0 + $0x348] sm:$0xff]  ;;  %398 = vst [vmem:[%s842_s1 + $0x138] sm:$0xff] %v397_v39  ;;  %v403_v42 = vld [vmem:[%s841_s0 + $0x350] sm:$0xff] }
  0x16   :  { %400 = vst [vmem:[%s842_s1 + $0x140] sm:$0xff] %v399_v40  ;;  %402 = vst [vmem:[%s842_s1 + $0x148] sm:$0xff] %v401_v41  ;;  %v405_v43 = vld [vmem:[%s841_s0 + $0x358] sm:$0xff]  ;;  %v407_v44 = vld [vmem:[%s841_s0 + $0x360] sm:$0xff] }
  0x17   :  { %404 = vst [vmem:[%s842_s1 + $0x150] sm:$0xff] %v403_v42  ;;  %406 = vst [vmem:[%s842_s1 + $0x158] sm:$0xff] %v405_v43  ;;  %v409_v45 = vld [vmem:[%s841_s0 + $0x368] sm:$0xff]  ;;  %v411_v46 = vld [vmem:[%s841_s0 + $0x370] sm:$0xff] }
  0x18   :  { %408 = vst [vmem:[%s842_s1 + $0x160] sm:$0xff] %v407_v44  ;;  %v413_v47 = vld [vmem:[%s841_s0 + $0x378] sm:$0xff]  ;;  %410 = vst [vmem:[%s842_s1 + $0x168] sm:$0xff] %v409_v45  ;;  %v415_v48 = vld [vmem:[%s841_s0 + $0x380] sm:$0xff] }
  0x19   :  { %412 = vst [vmem:[%s842_s1 + $0x170] sm:$0xff] %v411_v46  ;;  %414 = vst [vmem:[%s842_s1 + $0x178] sm:$0xff] %v413_v47  ;;  %v417_v49 = vld [vmem:[%s841_s0 + $0x388] sm:$0xff]  ;;  %v419_v50 = vld [vmem:[%s841_s0 + $0x390] sm:$0xff] }
  0x1a   :  { %416 = vst [vmem:[%s842_s1 + $0x180] sm:$0xff] %v415_v48  ;;  %418 = vst [vmem:[%s842_s1 + $0x188] sm:$0xff] %v417_v49  ;;  %v421_v51 = vld [vmem:[%s841_s0 + $0x398] sm:$0xff]  ;;  %v423_v52 = vld [vmem:[%s841_s0 + $0x3a0] sm:$0xff] }
  0x1b   :  { %420 = vst [vmem:[%s842_s1 + $0x190] sm:$0xff] %v419_v50  ;;  %v425_v53 = vld [vmem:[%s841_s0 + $0x3a8] sm:$0xff]  ;;  %422 = vst [vmem:[%s842_s1 + $0x198] sm:$0xff] %v421_v51  ;;  %v427_v54 = vld [vmem:[%s841_s0 + $0x3b0] sm:$0xff] }
  0x1c   :  { %424 = vst [vmem:[%s842_s1 + $0x1a0] sm:$0xff] %v423_v52  ;;  %426 = vst [vmem:[%s842_s1 + $0x1a8] sm:$0xff] %v425_v53  ;;  %v429_v55 = vld [vmem:[%s841_s0 + $0x3b8] sm:$0xff]  ;;  %v431_v56 = vld [vmem:[%s841_s0 + $0x3c0] sm:$0xff] }
  0x1d   :  { %428 = vst [vmem:[%s842_s1 + $0x1b0] sm:$0xff] %v427_v54  ;;  %430 = vst [vmem:[%s842_s1 + $0x1b8] sm:$0xff] %v429_v55  ;;  %v433_v57 = vld [vmem:[%s841_s0 + $0x3c8] sm:$0xff]  ;;  %v435_v58 = vld [vmem:[%s841_s0 + $0x3d0] sm:$0xff] }
  0x1e   :  { %432 = vst [vmem:[%s842_s1 + $0x1c0] sm:$0xff] %v431_v56  ;;  %v437_v59 = vld [vmem:[%s841_s0 + $0x3d8] sm:$0xff]  ;;  %434 = vst [vmem:[%s842_s1 + $0x1c8] sm:$0xff] %v433_v57  ;;  %v439_v60 = vld [vmem:[%s841_s0 + $0x3e0] sm:$0xff] }
  0x1f   :  { %436 = vst [vmem:[%s842_s1 + $0x1d0] sm:$0xff] %v435_v58  ;;  %438 = vst [vmem:[%s842_s1 + $0x1d8] sm:$0xff] %v437_v59  ;;  %v441_v61 = vld [vmem:[%s841_s0 + $0x3e8] sm:$0xff]  ;;  %v443_v62 = vld [vmem:[%s841_s0 + $0x3f0] sm:$0xff] }
  0x20   :  { %440 = vst [vmem:[%s842_s1 + $0x1e0] sm:$0xff] %v439_v60  ;;  %442 = vst [vmem:[%s842_s1 + $0x1e8] sm:$0xff] %v441_v61  ;;  %v445_v63 = vld [vmem:[%s841_s0 + $0x3f8] sm:$0xff] }
  0x21   :  { %444 = vst [vmem:[%s842_s1 + $0x1f0] sm:$0xff] %v443_v62  ;;  %446 = vst [vmem:[%s842_s1 + $0x1f8] sm:$0xff] %v445_v63 }

// kernel: custom-call
= control target key start
LH: loop header
LB: loop body
LE: loop exit
PB: predicated region body
PF: predicated region fallthrough
CT: control target
= control target key end

     0   :  { %s776_s0 = inlined_call_operand.vmem [shape: c64[2,4,16,16], index: 0, kind: input, shape index: {}]   ;;  %s777_s1 = inlined_call_operand.vmem [shape: f32[2,4,16,16], index: 1, kind: output, shape index: {}]  }
   0x1   :  { %v2_v0 = vld [vmem:[%s776_s0] sm:$0xff]  ;;  %v256_v1 = vld [vmem:[%s776_s0 + $0x8] sm:$0xff]  ;;  %v258_v2 = vld [vmem:[%s776_s0 + $0x10] sm:$0xff] }
   0x2   :  { %3 = vst [vmem:[%s777_s1] sm:$0xff] %v2_v0  ;;  %257 = vst [vmem:[%s777_s1 + $0x8] sm:$0xff] %v256_v1  ;;  %v260_v3 = vld [vmem:[%s776_s0 + $0x18] sm:$0xff]  ;;  %v262_v4 = vld [vmem:[%s776_s0 + $0x20] sm:$0xff] }
   0x3   :  { %259 = vst [vmem:[%s777_s1 + $0x10] sm:$0xff] %v258_v2  ;;  %v264_v5 = vld [vmem:[%s776_s0 + $0x28] sm:$0xff]  ;;  %261 = vst [vmem:[%s777_s1 + $0x18] sm:$0xff] %v260_v3  ;;  %v266_v6 = vld [vmem:[%s776_s0 + $0x30] sm:$0xff] }
   0x4   :  { %263 = vst [vmem:[%s777_s1 + $0x20] sm:$0xff] %v262_v4  ;;  %265 = vst [vmem:[%s777_s1 + $0x28] sm:$0xff] %v264_v5  ;;  %v268_v7 = vld [vmem:[%s776_s0 + $0x38] sm:$0xff]  ;;  %v270_v8 = vld [vmem:[%s776_s0 + $0x40] sm:$0xff] }
   0x5   :  { %267 = vst [vmem:[%s777_s1 + $0x30] sm:$0xff] %v266_v6  ;;  %269 = vst [vmem:[%s777_s1 + $0x38] sm:$0xff] %v268_v7  ;;  %v272_v9 = vld [vmem:[%s776_s0 + $0x48] sm:$0xff]  ;;  %v274_v10 = vld [vmem:[%s776_s0 + $0x50] sm:$0xff] }
   0x6   :  { %271 = vst [vmem:[%s777_s1 + $0x40] sm:$0xff] %v270_v8  ;;  %v276_v11 = vld [vmem:[%s776_s0 + $0x58] sm:$0xff]  ;;  %273 = vst [vmem:[%s777_s1 + $0x48] sm:$0xff] %v272_v9  ;;  %v278_v12 = vld [vmem:[%s776_s0 + $0x60] sm:$0xff] }
   0x7   :  { %275 = vst [vmem:[%s777_s1 + $0x50] sm:$0xff] %v274_v10  ;;  %277 = vst [vmem:[%s777_s1 + $0x58] sm:$0xff] %v276_v11  ;;  %v280_v13 = vld [vmem:[%s776_s0 + $0x68] sm:$0xff]  ;;  %v282_v14 = vld [vmem:[%s776_s0 + $0x70] sm:$0xff] }
   0x8   :  { %279 = vst [vmem:[%s777_s1 + $0x60] sm:$0xff] %v278_v12  ;;  %281 = vst [vmem:[%s777_s1 + $0x68] sm:$0xff] %v280_v13  ;;  %v284_v15 = vld [vmem:[%s776_s0 + $0x78] sm:$0xff]  ;;  %v286_v16 = vld [vmem:[%s776_s0 + $0x80] sm:$0xff] }
   0x9   :  { %283 = vst [vmem:[%s777_s1 + $0x70] sm:$0xff] %v282_v14  ;;  %v288_v17 = vld [vmem:[%s776_s0 + $0x88] sm:$0xff]  ;;  %285 = vst [vmem:[%s777_s1 + $0x78] sm:$0xff] %v284_v15  ;;  %v290_v18 = vld [vmem:[%s776_s0 + $0x90] sm:$0xff] }
   0xa   :  { %287 = vst [vmem:[%s777_s1 + $0x80] sm:$0xff] %v286_v16  ;;  %289 = vst [vmem:[%s777_s1 + $0x88] sm:$0xff] %v288_v17  ;;  %v292_v19 = vld [vmem:[%s776_s0 + $0x98] sm:$0xff]  ;;  %v294_v20 = vld [vmem:[%s776_s0 + $0xa0] sm:$0xff] }
   0xb   :  { %291 = vst [vmem:[%s777_s1 + $0x90] sm:$0xff] %v290_v18  ;;  %293 = vst [vmem:[%s777_s1 + $0x98] sm:$0xff] %v292_v19  ;;  %v296_v21 = vld [vmem:[%s776_s0 + $0xa8] sm:$0xff]  ;;  %v298_v22 = vld [vmem:[%s776_s0 + $0xb0] sm:$0xff] }
   0xc   :  { %295 = vst [vmem:[%s777_s1 + $0xa0] sm:$0xff] %v294_v20  ;;  %v300_v23 = vld [vmem:[%s776_s0 + $0xb8] sm:$0xff]  ;;  %297 = vst [vmem:[%s777_s1 + $0xa8] sm:$0xff] %v296_v21  ;;  %v302_v24 = vld [vmem:[%s776_s0 + $0xc0] sm:$0xff] }
   0xd   :  { %299 = vst [vmem:[%s777_s1 + $0xb0] sm:$0xff] %v298_v22  ;;  %301 = vst [vmem:[%s777_s1 + $0xb8] sm:$0xff] %v300_v23  ;;  %v304_v25 = vld [vmem:[%s776_s0 + $0xc8] sm:$0xff]  ;;  %v306_v26 = vld [vmem:[%s776_s0 + $0xd0] sm:$0xff] }
   0xe   :  { %303 = vst [vmem:[%s777_s1 + $0xc0] sm:$0xff] %v302_v24  ;;  %305 = vst [vmem:[%s777_s1 + $0xc8] sm:$0xff] %v304_v25  ;;  %v308_v27 = vld [vmem:[%s776_s0 + $0xd8] sm:$0xff]  ;;  %v310_v28 = vld [vmem:[%s776_s0 + $0xe0] sm:$0xff] }
   0xf   :  { %307 = vst [vmem:[%s777_s1 + $0xd0] sm:$0xff] %v306_v26  ;;  %v312_v29 = vld [vmem:[%s776_s0 + $0xe8] sm:$0xff]  ;;  %309 = vst [vmem:[%s777_s1 + $0xd8] sm:$0xff] %v308_v27  ;;  %v314_v30 = vld [vmem:[%s776_s0 + $0xf0] sm:$0xff] }
  0x10   :  { %311 = vst [vmem:[%s777_s1 + $0xe0] sm:$0xff] %v310_v28  ;;  %313 = vst [vmem:[%s777_s1 + $0xe8] sm:$0xff] %v312_v29  ;;  %v316_v31 = vld [vmem:[%s776_s0 + $0xf8] sm:$0xff]  ;;  %v318_v32 = vld [vmem:[%s776_s0 + $0x100] sm:$0xff] }
  0x11   :  { %315 = vst [vmem:[%s777_s1 + $0xf0] sm:$0xff] %v314_v30  ;;  %317 = vst [vmem:[%s777_s1 + $0xf8] sm:$0xff] %v316_v31  ;;  %v320_v33 = vld [vmem:[%s776_s0 + $0x108] sm:$0xff]  ;;  %v322_v34 = vld [vmem:[%s776_s0 + $0x110] sm:$0xff] }
  0x12   :  { %319 = vst [vmem:[%s777_s1 + $0x100] sm:$0xff] %v318_v32  ;;  %v324_v35 = vld [vmem:[%s776_s0 + $0x118] sm:$0xff]  ;;  %321 = vst [vmem:[%s777_s1 + $0x108] sm:$0xff] %v320_v33  ;;  %v326_v36 = vld [vmem:[%s776_s0 + $0x120] sm:$0xff] }
  0x13   :  { %323 = vst [vmem:[%s777_s1 + $0x110] sm:$0xff] %v322_v34  ;;  %325 = vst [vmem:[%s777_s1 + $0x118] sm:$0xff] %v324_v35  ;;  %v328_v37 = vld [vmem:[%s776_s0 + $0x128] sm:$0xff]  ;;  %v330_v38 = vld [vmem:[%s776_s0 + $0x130] sm:$0xff] }
  0x14   :  { %327 = vst [vmem:[%s777_s1 + $0x120] sm:$0xff] %v326_v36  ;;  %329 = vst [vmem:[%s777_s1 + $0x128] sm:$0xff] %v328_v37  ;;  %v332_v39 = vld [vmem:[%s776_s0 + $0x138] sm:$0xff]  ;;  %v334_v40 = vld [vmem:[%s776_s0 + $0x140] sm:$0xff] }
  0x15   :  { %331 = vst [vmem:[%s777_s1 + $0x130] sm:$0xff] %v330_v38  ;;  %v336_v41 = vld [vmem:[%s776_s0 + $0x148] sm:$0xff]  ;;  %333 = vst [vmem:[%s777_s1 + $0x138] sm:$0xff] %v332_v39  ;;  %v338_v42 = vld [vmem:[%s776_s0 + $0x150] sm:$0xff] }
  0x16   :  { %335 = vst [vmem:[%s777_s1 + $0x140] sm:$0xff] %v334_v40  ;;  %337 = vst [vmem:[%s777_s1 + $0x148] sm:$0xff] %v336_v41  ;;  %v340_v43 = vld [vmem:[%s776_s0 + $0x158] sm:$0xff]  ;;  %v342_v44 = vld [vmem:[%s776_s0 + $0x160] sm:$0xff] }
  0x17   :  { %339 = vst [vmem:[%s777_s1 + $0x150] sm:$0xff] %v338_v42  ;;  %341 = vst [vmem:[%s777_s1 + $0x158] sm:$0xff] %v340_v43  ;;  %v344_v45 = vld [vmem:[%s776_s0 + $0x168] sm:$0xff]  ;;  %v346_v46 = vld [vmem:[%s776_s0 + $0x170] sm:$0xff] }
  0x18   :  { %343 = vst [vmem:[%s777_s1 + $0x160] sm:$0xff] %v342_v44  ;;  %v348_v47 = vld [vmem:[%s776_s0 + $0x178] sm:$0xff]  ;;  %345 = vst [vmem:[%s777_s1 + $0x168] sm:$0xff] %v344_v45  ;;  %v350_v48 = vld [vmem:[%s776_s0 + $0x180] sm:$0xff] }
  0x19   :  { %347 = vst [vmem:[%s777_s1 + $0x170] sm:$0xff] %v346_v46  ;;  %349 = vst [vmem:[%s777_s1 + $0x178] sm:$0xff] %v348_v47  ;;  %v352_v49 = vld [vmem:[%s776_s0 + $0x188] sm:$0xff]  ;;  %v354_v50 = vld [vmem:[%s776_s0 + $0x190] sm:$0xff] }
  0x1a   :  { %351 = vst [vmem:[%s777_s1 + $0x180] sm:$0xff] %v350_v48  ;;  %353 = vst [vmem:[%s777_s1 + $0x188] sm:$0xff] %v352_v49  ;;  %v356_v51 = vld [vmem:[%s776_s0 + $0x198] sm:$0xff]  ;;  %v358_v52 = vld [vmem:[%s776_s0 + $0x1a0] sm:$0xff] }
  0x1b   :  { %355 = vst [vmem:[%s777_s1 + $0x190] sm:$0xff] %v354_v50  ;;  %v360_v53 = vld [vmem:[%s776_s0 + $0x1a8] sm:$0xff]  ;;  %357 = vst [vmem:[%s777_s1 + $0x198] sm:$0xff] %v356_v51  ;;  %v362_v54 = vld [vmem:[%s776_s0 + $0x1b0] sm:$0xff] }
  0x1c   :  { %359 = vst [vmem:[%s777_s1 + $0x1a0] sm:$0xff] %v358_v52  ;;  %361 = vst [vmem:[%s777_s1 + $0x1a8] sm:$0xff] %v360_v53  ;;  %v364_v55 = vld [vmem:[%s776_s0 + $0x1b8] sm:$0xff]  ;;  %v366_v56 = vld [vmem:[%s776_s0 + $0x1c0] sm:$0xff] }
  0x1d   :  { %363 = vst [vmem:[%s777_s1 + $0x1b0] sm:$0xff] %v362_v54  ;;  %365 = vst [vmem:[%s777_s1 + $0x1b8] sm:$0xff] %v364_v55  ;;  %v368_v57 = vld [vmem:[%s776_s0 + $0x1c8] sm:$0xff]  ;;  %v370_v58 = vld [vmem:[%s776_s0 + $0x1d0] sm:$0xff] }
  0x1e   :  { %367 = vst [vmem:[%s777_s1 + $0x1c0] sm:$0xff] %v366_v56  ;;  %v372_v59 = vld [vmem:[%s776_s0 + $0x1d8] sm:$0xff]  ;;  %369 = vst [vmem:[%s777_s1 + $0x1c8] sm:$0xff] %v368_v57  ;;  %v374_v60 = vld [vmem:[%s776_s0 + $0x1e0] sm:$0xff] }
  0x1f   :  { %371 = vst [vmem:[%s777_s1 + $0x1d0] sm:$0xff] %v370_v58  ;;  %373 = vst [vmem:[%s777_s1 + $0x1d8] sm:$0xff] %v372_v59  ;;  %v376_v61 = vld [vmem:[%s776_s0 + $0x1e8] sm:$0xff]  ;;  %v378_v62 = vld [vmem:[%s776_s0 + $0x1f0] sm:$0xff] }
  0x20   :  { %375 = vst [vmem:[%s777_s1 + $0x1e0] sm:$0xff] %v374_v60  ;;  %377 = vst [vmem:[%s777_s1 + $0x1e8] sm:$0xff] %v376_v61  ;;  %v380_v63 = vld [vmem:[%s776_s0 + $0x1f8] sm:$0xff] }
  0x21   :  { %379 = vst [vmem:[%s777_s1 + $0x1f0] sm:$0xff] %v378_v62  ;;  %381 = vst [vmem:[%s777_s1 + $0x1f8] sm:$0xff] %v380_v63 }

// kernel: cup2_forward.1
= control target key start
LH: loop header
LB: loop body
LE: loop exit
PB: predicated region body
PF: predicated region fallthrough
CT: control target
= control target key end

     0   :  { %s751_s12 = smov 0   ;;  %s1100_s0 = inlined_call_operand.vmem [shape: f32[80,256], index: 0, kind: input, shape index: {}]   ;;  %s1101_s1 = inlined_call_operand.vmem [shape: f32[256,384], index: 1, kind: input, shape index: {}]   ;;  %s1102_s2 = inlined_call_operand.vmem [shape: f32[1,384], index: 2, kind: input, shape index: {}]   ;;  %s1103_s3 = inlined_call_operand.vmem [shape: f32[80,384], index: 3, kind: output, shape index: {}]  }
   0x1 LB: > { %s560_s13 = sadd.s32 4294967295, %s729_s12   ;;  %p564_p0 = scmp.ge.s32.totalorder %s729_s12, 1  ;;  %s729_s12 = sphi %s751_s12, %s13_s12  }
   0x2   : > { %p139_p1 = scmp.lt.s32.totalorder %s729_s12, 3 }
   0x4   : > { %p140_p2 = pnand %p564_p0, %p139_p1 }
   0x5   : > { %v190_v0 = vld [vmem:[%s1101_s1 + $0x8] sm:$0xff] (!%p140_p2)  ;;  %v193_v1 = vld [vmem:[%s1101_s1 + $0x20] sm:$0xff] (!%p140_p2)  ;;  %v192_v4 = vld [vmem:[%s1101_s1 + $0x18] sm:$0xff] (!%p140_p2)  ;;  %s842_s18 = smul.u32 (!%p140_p2), 5, %s560_s13 }
   0x6   : > { %143 = sbr.rel (%p140_p2) target bundleno = 304 (0x130), region = 32  ;;  %v189_v2 = vld [vmem:[%s1101_s1] sm:$0xff] (!%p140_p2)  ;;  %v618_v3 = vpack.c.bf16 (!%p140_p2), %v193_v1, %v190_v0  ;;  %v196_v5 = vld [vmem:[%s1101_s1 + $0x38] sm:$0xff] (!%p140_p2)  ;;  %v199_v6 = vld [vmem:[%s1101_s1 + $0x50] sm:$0xff] (!%p140_p2) }
   0x7   : > { %v620_v7 = vpack.c.bf16 (!%p140_p2), %v192_v4, %v189_v2  ;;  %v622_v8 = vpack.c.bf16 (!%p140_p2), %v199_v6, %v196_v5  ;;  %v195_v9 = vld [vmem:[%s1101_s1 + $0x30] sm:$0xff] (!%p140_p2)  ;;  %v198_v10 = vld [vmem:[%s1101_s1 + $0x48] sm:$0xff] (!%p140_p2)  ;;  %v205_v12 = vld [vmem:[%s1101_s1 + $0x80] sm:$0xff] (!%p140_p2)  ;;  %p166_p3 = scmp.lt.s32.totalorder (!%p140_p2), %s842_s18, 9 }
   0x8   : > { %v202_v11 = vld [vmem:[%s1101_s1 + $0x68] sm:$0xff] (!%p140_p2)  ;;  %619 = vmatprep.subr.bf16.mxu0 (!%p140_p2), %v618_v3  ;;  %v624_v13 = vpack.c.bf16 (!%p140_p2), %v198_v10, %v195_v9  ;;  %v201_v15 = vld [vmem:[%s1101_s1 + $0x60] sm:$0xff] (!%p140_p2)  ;;  %v204_v16 = vld [vmem:[%s1101_s1 + $0x78] sm:$0xff] (!%p140_p2) }
   0x9   : > { %621 = vmatpush1.bf16.msra.mxu0 (!%p140_p2), %v620_v7  ;;  %v626_v14 = vpack.c.bf16 (!%p140_p2), %v205_v12, %v202_v11  ;;  %v208_v17 = vld [vmem:[%s1101_s1 + $0x98] sm:$0xff] (!%p140_p2)  ;;  %v211_v18 = vld [vmem:[%s1101_s1 + $0xb0] sm:$0xff] (!%p140_p2)  ;;  %v628_v19 = vpack.c.bf16 (!%p140_p2), %v204_v16, %v201_v15  ;;  %v210_v22 = vld [vmem:[%s1101_s1 + $0xa8] sm:$0xff] (!%p140_p2) }
   0xa   : > { %623 = vmatprep.subr.bf16.mxu0 (!%p140_p2), %v622_v8  ;;  %v630_v20 = vpack.c.bf16 (!%p140_p2), %v211_v18, %v208_v17  ;;  %v207_v21 = vld [vmem:[%s1101_s1 + $0x90] sm:$0xff] (!%p140_p2)  ;;  %v214_v23 = vld [vmem:[%s1101_s1 + $0xc8] sm:$0xff] (!%p140_p2)  ;;  %v217_v24 = vld [vmem:[%s1101_s1 + $0xe0] sm:$0xff] (!%p140_p2) }
   0xb   : > { %v239_v25 = vld [vmem:[%s1101_s1 + $0x190] sm:$0xff] (!%p140_p2)  ;;  %v242_v26 = vld [vmem:[%s1101_s1 + $0x1a8] sm:$0xff] (!%p140_p2)  ;;  %v632_v29 = vpack.c.bf16 (!%p140_p2), %v210_v22, %v207_v21  ;;  %v213_v30 = vld [vmem:[%s1101_s1 + $0xc0] sm:$0xff] (!%p140_p2)  ;;  %v634_v34 = vpack.c.bf16 (!%p140_p2), %v217_v24, %v214_v23 }
   0xc   : > { %v191_v27 = vld [vmem:[%s1101_s1 + $0x10] sm:$0xff] (!%p140_p2)  ;;  %v194_v28 = vld [vmem:[%s1101_s1 + $0x28] sm:$0xff] (!%p140_p2)  ;;  %v216_v31 = vld [vmem:[%s1101_s1 + $0xd8] sm:$0xff] (!%p140_p2)  ;;  %v682_v32 = vpack.c.bf16 (!%p140_p2), %v242_v26, %v239_v25 }
   0xd   : > { %625 = vmatpush1.bf16.msra.mxu0 %v624_v13  ;;  %v684_v33 = vpack.c.bf16 %v194_v28, %v191_v27  ;;  %v220_v35 = vld [vmem:[%s1101_s1 + $0xf8] sm:$0xff]  ;;  %v245_v36 = vld [vmem:[%s1101_s1 + $0x1c0] sm:$0xff]  ;;  %v223_v38 = vld [vmem:[%s1101_s1 + $0x110] sm:$0xff]  ;;  %v636_v43 = vpack.c.bf16 %v216_v31, %v213_v30  ;;  %s1105_s18 = smov (!%p166_p3, %s842_s18), 9 }
   0xe   : > { %627 = vmatprep.subr.bf16.mxu0 %v626_v14  ;;  %v248_v37 = vld [vmem:[%s1101_s1 + $0x1d8] sm:$0xff]  ;;  %683 = vmatprep.subr.bf16.mxu1 %v682_v32  ;;  %v197_v40 = vld [vmem:[%s1101_s1 + $0x40] sm:$0xff]  ;;  %v251_v44 = vld [vmem:[%s1101_s1 + $0x1f0] sm:$0xff]  ;;  %v638_v47 = vpack.c.bf16 %v223_v38, %v220_v35  ;;  %s570_s23 = sshll.u32 %s1105_s18, 4  ;;  %s714_s14 = smul.u32 24, %s1105_s18 }
   0xf   : > { %v686_v39 = vpack.c.bf16 %v248_v37, %v245_v36  ;;  %v200_v41 = vld [vmem:[%s1101_s1 + $0x58] sm:$0xff]  ;;  %685 = vmatpush3.bf16.msra.mxu1 %v684_v33  ;;  %v254_v45 = vld [vmem:[%s1101_s1 + $0x208] sm:$0xff]  ;;  %v203_v46 = vld [vmem:[%s1101_s1 + $0x70] sm:$0xff]  ;;  %s950_s8 = scalar_lea.vmem %s1100_s0, %s570_s23 }
  0x10   : > { %v688_v42 = vpack.c.bf16 %v200_v41, %v197_v40  ;;  %v219_v48 = vld [vmem:[%s1101_s1 + $0xf0] sm:$0xff]  ;;  %v222_v49 = vld [vmem:[%s1101_s1 + $0x108] sm:$0xff]  ;;  %v690_v50 = vpack.c.bf16 %v254_v45, %v251_v44  ;;  %v229_v53 = vld [vmem:[%s1101_s1 + $0x140] sm:$0xff]  ;;  %s1080_s17 = scalar_lea.vmem %s1103_s3, %s714_s14 }
  0x11   : > { %629 = vmatpush1.bf16.msra.mxu0 %v628_v19  ;;  %687 = vmatprep.subr.bf16.mxu1 %v686_v39  ;;  %v206_v51 = vld [vmem:[%s1101_s1 + $0x88] sm:$0xff]  ;;  %v257_v54 = vld [vmem:[%s1101_s1 + $0x220] sm:$0xff]  ;;  %v260_v56 = vld [vmem:[%s1101_s1 + $0x238] sm:$0xff]  ;;  %v640_v57 = vpack.c.bf16 %v222_v49, %v219_v48 }
  0x12   : > { %631 = vmatprep.subr.bf16.mxu0 %v630_v20  ;;  %v226_v52 = vld [vmem:[%s1101_s1 + $0x128] sm:$0xff]  ;;  %v692_v55 = vpack.c.bf16 %v206_v51, %v203_v46  ;;  %v225_v58 = vld [vmem:[%s1101_s1 + $0x120] sm:$0xff]  ;;  %v694_v59 = vpack.c.bf16 %v260_v56, %v257_v54  ;;  %v212_v61 = vld [vmem:[%s1101_s1 + $0xb8] sm:$0xff] }
  0x13   : > { %689 = vmatpush3.bf16.msra.mxu1 %v688_v42  ;;  %v209_v60 = vld [vmem:[%s1101_s1 + $0xa0] sm:$0xff]  ;;  %v642_v62 = vpack.c.bf16 %v229_v53, %v226_v52  ;;  %v228_v63 = vld [vmem:[%s1101_s1 + $0x138] sm:$0xff]  ;;  %v263_v0 = vld [vmem:[%s1101_s1 + $0x250] sm:$0xff] }
  0x14   : > { %691 = vmatprep.subr.bf16.mxu1 %v690_v50  ;;  %v266_v1 = vld [vmem:[%s1101_s1 + $0x268] sm:$0xff]  ;;  %v232_v2 = vld [vmem:[%s1101_s1 + $0x158] sm:$0xff]  ;;  %v235_v3 = vld [vmem:[%s1101_s1 + $0x170] sm:$0xff]  ;;  %v696_v4 = vpack.c.bf16 %v212_v61, %v209_v60  ;;  %v644_v5 = vpack.c.bf16 %v228_v63, %v225_v58 }
  0x15   : > { %633 = vmatpush1.bf16.msra.mxu0 %v632_v29  ;;  %v231_v6 = vld [vmem:[%s1101_s1 + $0x150] sm:$0xff]  ;;  %v698_v7 = vpack.c.bf16 %v266_v1, %v263_v0  ;;  %v218_v9 = vld [vmem:[%s1101_s1 + $0xe8] sm:$0xff]  ;;  %v646_v10 = vpack.c.bf16 %v235_v3, %v232_v2  ;;  %v269_v12 = vld [vmem:[%s1101_s1 + $0x280] sm:$0xff] }
  0x16   : > { %635 = vmatprep.subr.bf16.mxu0 %v634_v34  ;;  %v215_v8 = vld [vmem:[%s1101_s1 + $0xd0] sm:$0xff]  ;;  %v234_v11 = vld [vmem:[%s1101_s1 + $0x168] sm:$0xff]  ;;  %v272_v13 = vld [vmem:[%s1101_s1 + $0x298] sm:$0xff] }
  0x17   : > { %693 = vmatpush3.bf16.msra.mxu1 %v692_v55  ;;  %v238_v14 = vld [vmem:[%s1101_s1 + $0x188] sm:$0xff]  ;;  %v241_v15 = vld [vmem:[%s1101_s1 + $0x1a0] sm:$0xff]  ;;  %v700_v16 = vpack.c.bf16 %v218_v9, %v215_v8  ;;  %v648_v17 = vpack.c.bf16 %v234_v11, %v231_v6  ;;  %v702_v19 = vpack.c.bf16 %v272_v13, %v269_v12  ;;  %v224_v21 = vld [vmem:[%s1101_s1 + $0x118] sm:$0xff] }
  0x18   : > { %695 = vmatprep.subr.bf16.mxu1 %v694_v59  ;;  %v237_v18 = vld [vmem:[%s1101_s1 + $0x180] sm:$0xff]  ;;  %v650_v22 = vpack.c.bf16 %v241_v15, %v238_v14  ;;  %v240_v23 = vld [vmem:[%s1101_s1 + $0x198] sm:$0xff]  ;;  %v275_v24 = vld [vmem:[%s1101_s1 + $0x2b0] sm:$0xff] }
  0x19   : > { %637 = vmatpush1.bf16.msra.mxu0 %v636_v43  ;;  %v221_v20 = vld [vmem:[%s1101_s1 + $0x100] sm:$0xff]  ;;  %v278_v25 = vld [vmem:[%s1101_s1 + $0x2c8] sm:$0xff]  ;;  %v244_v26 = vld [vmem:[%s1101_s1 + $0x1b8] sm:$0xff]  ;;  %v652_v30 = vpack.c.bf16 %v240_v23, %v237_v18 }
  0x1a   : > { %639 = vmatprep.subr.bf16.mxu0 %v638_v47  ;;  %v247_v27 = vld [vmem:[%s1101_s1 + $0x1d0] sm:$0xff]  ;;  %v704_v28 = vpack.c.bf16 %v224_v21, %v221_v20  ;;  %v180_v29 = vld [vmem:[%s950_s8 + $0x8] sm:$0xff]  ;;  %v706_v32 = vpack.c.bf16 %v278_v25, %v275_v24  ;;  %v281_v37 = vld [vmem:[%s1101_s1 + $0x2e0] sm:$0xff] }
  0x1b   : > { %697 = vmatpush3.bf16.msra.mxu1 %v696_v4  ;;  %v243_v31 = vld [vmem:[%s1101_s1 + $0x1b0] sm:$0xff]  ;;  %v230_v34 = vld [vmem:[%s1101_s1 + $0x148] sm:$0xff]  ;;  %v654_v35 = vpack.c.bf16 %v247_v27, %v244_v26  ;;  %v284_v38 = vld [vmem:[%s1101_s1 + $0x2f8] sm:$0xff]  ;;  %461 = vmatprep.mubr.f32.mxu1 %v180_v29  ;;  %v287_v26 = vlaneseq }
  0x1c   : > { %699 = vmatprep.subr.bf16.mxu1 %v698_v7  ;;  %v227_v33 = vld [vmem:[%s1101_s1 + $0x130] sm:$0xff]  ;;  %v246_v36 = vld [vmem:[%s1101_s1 + $0x1c8] sm:$0xff]  ;;  %v253_v40 = vld [vmem:[%s1101_s1 + $0x200] sm:$0xff]  ;;  %366 = vmatprep.mubr.f32.mxu0 %v180_v29  ;;  %v710_v43 = vpack.c.bf16 %v284_v38, %v281_v37 }
  0x1d   : > { %641 = vmatpush1.bf16.msra.mxu0 %v640_v57  ;;  %v250_v39 = vld [vmem:[%s1101_s1 + $0x1e8] sm:$0xff]  ;;  %v708_v41 = vpack.c.bf16 %v230_v34, %v227_v33  ;;  %v656_v42 = vpack.c.bf16 %v246_v36, %v243_v31  ;;  %v233_v44 = vld [vmem:[%s1101_s1 + $0x160] sm:$0xff]  ;;  %v236_v45 = vld [vmem:[%s1101_s1 + $0x178] sm:$0xff]  ;;  %v288_v27 = vshrl.u32 %v287_v26, 7 }
  0x1e   : > { %643 = vmatprep.subr.bf16.mxu0 %v642_v62  ;;  %v658_v46 = vpack.c.bf16 %v253_v40, %v250_v39  ;;  %v249_v47 = vld [vmem:[%s1101_s1 + $0x1e0] sm:$0xff]  ;;  %v252_v48 = vld [vmem:[%s1101_s1 + $0x1f8] sm:$0xff]  ;;  %v259_v50 = vld [vmem:[%s1101_s1 + $0x230] sm:$0xff]  ;;  %v712_v51 = vpack.c.bf16 %v236_v45, %v233_v44 }
  0x1f   : > { %701 = vmatpush3.bf16.msra.mxu1 %v700_v16  ;;  %v256_v49 = vld [vmem:[%s1101_s1 + $0x218] sm:$0xff]  ;;  %v660_v52 = vpack.c.bf16 %v252_v48, %v249_v47  ;;  %v255_v54 = vld [vmem:[%s1101_s1 + $0x210] sm:$0xff]  ;;  %v258_v55 = vld [vmem:[%s1101_s1 + $0x228] sm:$0xff]  ;;  %v289_v45 = vsub.s32 0, %v288_v27  ;;  %v293_v47 = vsub.s32 1, %v288_v27 }
  0x20   : > { %703 = vmatprep.subr.bf16.mxu1 %v702_v19  ;;  %v662_v53 = vpack.c.bf16 %v259_v50, %v256_v49  ;;  %v262_v56 = vld [vmem:[%s1101_s1 + $0x248] sm:$0xff]  ;;  %v265_v57 = vld [vmem:[%s1101_s1 + $0x260] sm:$0xff]  ;;  %v664_v59 = vpack.c.bf16 %v258_v55, %v255_v54  ;;  %v182_v60 = vld [vmem:[%s950_s8 + $0x18] sm:$0xff] }
  0x21   : > { %645 = vmatpush1.bf16.msra.mxu0 %v644_v5  ;;  %v179_v58 = vld [vmem:[%s950_s8] sm:$0xff]  ;;  %v666_v61 = vpack.c.bf16 %v265_v57, %v262_v56  ;;  %v264_v63 = vld [vmem:[%s1101_s1 + $0x258] sm:$0xff]  ;;  %v271_v1 = vld [vmem:[%s1101_s1 + $0x290] sm:$0xff] }
  0x22   : > { %647 = vmatprep.subr.bf16.mxu0 %v646_v10  ;;  %v261_v62 = vld [vmem:[%s1101_s1 + $0x240] sm:$0xff]  ;;  %v268_v0 = vld [vmem:[%s1101_s1 + $0x278] sm:$0xff]  ;;  %v181_v2 = vld [vmem:[%s950_s8 + $0x10] sm:$0xff] }
  0x23   : > { %705 = vmatpush3.bf16.msra.mxu1 %v704_v28  ;;  %v668_v3 = vpack.c.bf16 %v264_v63, %v261_v62  ;;  %v184_v4 = vld [vmem:[%s950_s8 + $0x28] sm:$0xff]  ;;  %v670_v5 = vpack.c.bf16 %v271_v1, %v268_v0  ;;  %v267_v6 = vld [vmem:[%s1101_s1 + $0x270] sm:$0xff]  ;;  %v277_v9 = vld [vmem:[%s1101_s1 + $0x2c0] sm:$0xff]  ;;  %v297_v28 = vsub.s32 2, %v288_v27 }
  0x24   : > { %707 = vmatprep.subr.bf16.mxu1 %v706_v32  ;;  %v270_v7 = vld [vmem:[%s1101_s1 + $0x288] sm:$0xff]  ;;  %v183_v10 = vld [vmem:[%s950_s8 + $0x20] sm:$0xff]  ;;  %v186_v12 = vld [vmem:[%s950_s8 + $0x38] sm:$0xff] }
  0x25   : > { %649 = vmatpush1.bf16.msra.mxu0 %v648_v17  ;;  %v274_v8 = vld [vmem:[%s1101_s1 + $0x2a8] sm:$0xff]  ;;  %v672_v11 = vpack.c.bf16 %v270_v7, %v267_v6  ;;  %v273_v14 = vld [vmem:[%s1101_s1 + $0x2a0] sm:$0xff]  ;;  %v276_v15 = vld [vmem:[%s1101_s1 + $0x2b8] sm:$0xff] }
  0x26   : > { %651 = vmatprep.subr.bf16.mxu0 %v650_v22  ;;  %v674_v13 = vpack.c.bf16 %v277_v9, %v274_v8  ;;  %v280_v16 = vld [vmem:[%s1101_s1 + $0x2d8] sm:$0xff]  ;;  %v283_v17 = vld [vmem:[%s1101_s1 + $0x2f0] sm:$0xff]  ;;  %v676_v19 = vpack.c.bf16 %v276_v15, %v273_v14  ;;  %v188_v20 = vld [vmem:[%s950_s8 + $0x48] sm:$0xff] }
  0x27   : > { %709 = vmatpush3.bf16.msra.mxu1 %v708_v41  ;;  %v185_v18 = vld [vmem:[%s950_s8 + $0x30] sm:$0xff]  ;;  %v678_v21 = vpack.c.bf16 %v283_v17, %v280_v16  ;;  %v282_v23 = vld [vmem:[%s1101_s1 + $0x2e8] sm:$0xff]  ;;  %v187_v24 = vld [vmem:[%s950_s8 + $0x40] sm:$0xff] }
  0x28   : > { %711 = vmatprep.subr.bf16.mxu1 %v710_v43  ;;  %v279_v22 = vld [vmem:[%s1101_s1 + $0x2d0] sm:$0xff]  ;;  %v285_v29 = vld [vmem:[%s1102_s2] sm:$0x7] }
  0x29   : > { %653 = vmatpush1.bf16.msra.mxu0 %v652_v30  ;;  %v680_v25 = vpack.c.bf16 %v282_v23, %v279_v22  ;;  %v298_v31 = vrot.slane %v285_v29, %v297_v28 }
  0x2a   : > { %655 = vmatprep.subr.bf16.mxu0 %v654_v35 }
  0x2b   : > { %713 = vmatpush3.bf16.msra.mxu1 %v712_v51  ;;  %v290_v51 = vrot.slane %v285_v29, %v289_v45 }
  0x2d   : > { %657 = vmatpush1.bf16.msra.mxu0 %v656_v42 }
  0x2e   : > { %659 = vmatprep.subr.bf16.mxu0 %v658_v46  ;;  %462 = vmatmul.mubr.f32.vlgmr.msra.gmra.mrb[0].mxu1 %v179_v58 }
  0x2f   : > { %466 = vmatprep.mubr.f32.mxu1 %v182_v60 }
  0x31   : > { %661 = vmatpush1.bf16.msra.mxu0 %v660_v52 }
  0x32   : > { %663 = vmatprep.subr.bf16.mxu0 %v662_v53  ;;  %467 = vmatmul.mubr.f32.gmra.mrb[2].mxu1 %v181_v2  ;;  %v294_v53 = vrot.slane %v285_v29, %v293_v47 }
  0x33   : > { %471 = vmatprep.mubr.f32.mxu1 %v184_v4 }
  0x35   : > { %665 = vmatpush1.bf16.msra.mxu0 %v664_v59 }
  0x36   : > { %667 = vmatprep.subr.bf16.mxu0 %v666_v61  ;;  %472 = vmatmul.mubr.f32.gmra.mrb[4].mxu1 %v183_v10 }
  0x37   : > { %476 = vmatprep.mubr.f32.mxu1 %v186_v12 }
  0x39   : > { %669 = vmatpush1.bf16.msra.mxu0 %v668_v3 }
  0x3a   : > { %671 = vmatprep.subr.bf16.mxu0 %v670_v5  ;;  %477 = vmatmul.mubr.f32.gmra.mrb[6].mxu1 %v185_v18 }
  0x3b   : > { %481 = vmatprep.mubr.f32.mxu1 %v188_v20 }
  0x3d   : > { %673 = vmatpush1.bf16.msra.mxu0 %v672_v11 }
  0x3e   : > { %675 = vmatprep.subr.bf16.mxu0 %v674_v13  ;;  %482 = vmatmul.mubr.f32.gmra.mrb[8].mxu1 %v187_v24 }
  0x41   : > { %677 = vmatpush1.bf16.msra.mxu0 %v676_v19 }
  0x42   : > { %679 = vmatprep.subr.bf16.mxu0 %v678_v21 }
  0x45   : > { %681 = vmatpush1.bf16.msra.mxu0 %v680_v25 }
  0x48   : > { %367 = vmatmul.mubr.f32.vlgmr.msra.gmra.mrb[0].mxu0 %v179_v58 }
  0x49   : > { %372 = vmatprep.mubr.f32.mxu0 %v182_v60 }
  0x4c   : > { %373 = vmatmul.mubr.f32.gmra.mrb[2].mxu0 %v181_v2 }
  0x4d   : > { %378 = vmatprep.mubr.f32.mxu0 %v184_v4 }
  0x50   : > { %379 = vmatmul.mubr.f32.gmra.mrb[4].mxu0 %v183_v10 }
  0x51   : > { %384 = vmatprep.mubr.f32.mxu0 %v186_v12 }
  0x54   : > { %385 = vmatmul.mubr.f32.gmra.mrb[6].mxu0 %v185_v18 }
  0x55   : > { %390 = vmatprep.mubr.f32.mxu0 %v188_v20 }
  0x58   : > { %391 = vmatmul.mubr.f32.gmra.mrb[8].mxu0 %v187_v24 }
 0x101   : > { %v603_v30 = vpop.f32.mrb[0].mxu1 }
 0x102   : > { %v604_v32 = vpop.f32.mrb[1].mxu1 }
 0x103   : > { %v605_v33 = vadd.f32 %v604_v32, %v603_v30 }
 0x105   : > { %v464_v34 = vadd.f32 %v605_v33, %v298_v31  ;;  %v606_v35 = vpop.f32.mrb[2].mxu1 }
 0x106   : > { %v607_v36 = vpop.f32.mrb[3].mxu1 }
 0x107   : > { %489 = vst [vmem:[%s1080_s17 + $0x10] sm:$0xff] %v464_v34  ;;  %v608_v37 = vadd.f32 %v607_v36, %v606_v35 }
 0x109   : > { %v469_v38 = vadd.f32 %v608_v37, %v298_v31  ;;  %v609_v39 = vpop.f32.mrb[4].mxu1 }
 0x10a   : > { %v610_v40 = vpop.f32.mrb[5].mxu1 }
 0x10b   : > { %492 = vst [vmem:[%s1080_s17 + $0x28] sm:$0xff] %v469_v38  ;;  %v611_v41 = vadd.f32 %v610_v40, %v609_v39 }
 0x10d   : > { %v474_v42 = vadd.f32 %v611_v41, %v298_v31  ;;  %v612_v43 = vpop.f32.mrb[6].mxu1 }
 0x10e   : > { %v613_v44 = vpop.f32.mrb[7].mxu1 }
 0x10f   : > { %495 = vst [vmem:[%s1080_s17 + $0x40] sm:$0xff] %v474_v42  ;;  %v614_v46 = vadd.f32 %v613_v44, %v612_v43 }
 0x111   : > { %v479_v48 = vadd.f32 %v614_v46, %v298_v31  ;;  %v615_v49 = vpop.f32.mrb[8].mxu1 }
 0x112   : > { %v616_v50 = vpop.f32.mrb[9].mxu1 }
 0x113   : > { %498 = vst [vmem:[%s1080_s17 + $0x58] sm:$0xff] %v479_v48  ;;  %v617_v52 = vadd.f32 %v616_v50, %v615_v49 }
 0x115   : > { %v484_v54 = vadd.f32 %v617_v52, %v298_v31 }
 0x117   : > { %501 = vst [vmem:[%s1080_s17 + $0x70] sm:$0xff] %v484_v54 }
 0x11b   : > { %v368_v55 = vpop.f32.mrb[0].mxu0 }
 0x11c   : > { %v369_v56 = vadd.f32 %v368_v55, %v290_v51  ;;  %v370_v57 = vpop.f32.mrb[1].mxu0 }
 0x11d   : > { %v371_v58 = vadd.f32 %v370_v57, %v294_v53 }
 0x11e   : > { %487 = vst [vmem:[%s1080_s17] sm:$0xff] %v369_v56 }
 0x11f   : > { %488 = vst [vmem:[%s1080_s17 + $0x8] sm:$0xff] %v371_v58  ;;  %v374_v59 = vpop.f32.mrb[2].mxu0 }
 0x120   : > { %v375_v60 = vadd.f32 %v374_v59, %v290_v51  ;;  %v376_v61 = vpop.f32.mrb[3].mxu0 }
 0x121   : > { %v377_v62 = vadd.f32 %v376_v61, %v294_v53 }
 0x122   : > { %490 = vst [vmem:[%s1080_s17 + $0x18] sm:$0xff] %v375_v60 }
 0x123   : > { %491 = vst [vmem:[%s1080_s17 + $0x20] sm:$0xff] %v377_v62  ;;  %v380_v63 = vpop.f32.mrb[4].mxu0 }
 0x124   : > { %v381_v0 = vadd.f32 %v380_v63, %v290_v51  ;;  %v382_v1 = vpop.f32.mrb[5].mxu0 }
 0x125   : > { %v383_v2 = vadd.f32 %v382_v1, %v294_v53 }
 0x126   : > { %493 = vst [vmem:[%s1080_s17 + $0x30] sm:$0xff] %v381_v0 }
 0x127   : > { %494 = vst [vmem:[%s1080_s17 + $0x38] sm:$0xff] %v383_v2  ;;  %v386_v3 = vpop.f32.mrb[6].mxu0 }
 0x128   : > { %v387_v4 = vadd.f32 %v386_v3, %v290_v51  ;;  %v388_v5 = vpop.f32.mrb[7].mxu0 }
 0x129   : > { %v389_v6 = vadd.f32 %v388_v5, %v294_v53 }
 0x12a   : > { %496 = vst [vmem:[%s1080_s17 + $0x48] sm:$0xff] %v387_v4 }
 0x12b   : > { %497 = vst [vmem:[%s1080_s17 + $0x50] sm:$0xff] %v389_v6  ;;  %v392_v7 = vpop.f32.mrb[8].mxu0 }
 0x12c   : > { %v393_v8 = vadd.f32 %v392_v7, %v290_v51  ;;  %v394_v9 = vpop.f32.mrb[9].mxu0 }
 0x12d   : > { %v395_v10 = vadd.f32 %v394_v9, %v294_v53 }
 0x12e   : > { %499 = vst [vmem:[%s1080_s17 + $0x60] sm:$0xff] %v393_v8 }
 0x12f   : > { %500 = vst [vmem:[%s1080_s17 + $0x68] sm:$0xff] %v395_v10 }
 0x130 PF: > { %s13_s12 = sadd.s32 1, %s729_s12  }
 0x131   : > { %p10_p4 = scmp.ge.s32.totalorder %s13_s12, 4  }
 0x133   :  { %12 = sbr.rel (!%p10_p4) target bundleno = 1 (0x1), region = 62 }

// kernel: custom-call.2
= control target key start
LH: loop header
LB: loop body
LE: loop exit
PB: predicated region body
PF: predicated region fallthrough
CT: control target
= control target key end

     0   :  { %s6412_s0 = inlined_call_operand.vmem [shape: f32[2,6,32,32], index: 0, kind: input, shape index: {}]   ;;  %s6413_s2 = inlined_call_operand.vmem [shape: c64[2,6,32,32], index: 2, kind: output, shape index: {}]   ;;  %s6414_s1 = inlined_call_operand.vmem [shape: f32[2,6,32,32], index: 1, kind: input, shape index: {}]  }
   0x1   :  { %v5_v0 = vld [vmem:[%s6412_s0] sm:$0xff]  ;;  %v2304_v1 = vld [vmem:[%s6412_s0 + $0x8] sm:$0xff]  ;;  %v2306_v2 = vld [vmem:[%s6412_s0 + $0x10] sm:$0xff] }
   0x2   :  { %6 = vst [vmem:[%s6413_s2] sm:$0xff] %v5_v0  ;;  %2305 = vst [vmem:[%s6413_s2 + $0x8] sm:$0xff] %v2304_v1  ;;  %v2308_v3 = vld [vmem:[%s6412_s0 + $0x18] sm:$0xff]  ;;  %v2310_v4 = vld [vmem:[%s6412_s0 + $0x20] sm:$0xff] }
   0x3   :  { %2307 = vst [vmem:[%s6413_s2 + $0x10] sm:$0xff] %v2306_v2  ;;  %v2312_v5 = vld [vmem:[%s6412_s0 + $0x28] sm:$0xff]  ;;  %2309 = vst [vmem:[%s6413_s2 + $0x18] sm:$0xff] %v2308_v3  ;;  %v2314_v6 = vld [vmem:[%s6412_s0 + $0x30] sm:$0xff] }
   0x4   :  { %2311 = vst [vmem:[%s6413_s2 + $0x20] sm:$0xff] %v2310_v4  ;;  %2313 = vst [vmem:[%s6413_s2 + $0x28] sm:$0xff] %v2312_v5  ;;  %v2316_v7 = vld [vmem:[%s6412_s0 + $0x38] sm:$0xff]  ;;  %v2318_v8 = vld [vmem:[%s6412_s0 + $0x40] sm:$0xff] }
   0x5   :  { %2315 = vst [vmem:[%s6413_s2 + $0x30] sm:$0xff] %v2314_v6  ;;  %2317 = vst [vmem:[%s6413_s2 + $0x38] sm:$0xff] %v2316_v7  ;;  %v2320_v9 = vld [vmem:[%s6412_s0 + $0x48] sm:$0xff]  ;;  %v2322_v10 = vld [vmem:[%s6412_s0 + $0x50] sm:$0xff] }
   0x6   :  { %2319 = vst [vmem:[%s6413_s2 + $0x40] sm:$0xff] %v2318_v8  ;;  %v2324_v11 = vld [vmem:[%s6412_s0 + $0x58] sm:$0xff]  ;;  %2321 = vst [vmem:[%s6413_s2 + $0x48] sm:$0xff] %v2320_v9  ;;  %v2326_v12 = vld [vmem:[%s6412_s0 + $0x60] sm:$0xff] }
   0x7   :  { %2323 = vst [vmem:[%s6413_s2 + $0x50] sm:$0xff] %v2322_v10  ;;  %2325 = vst [vmem:[%s6413_s2 + $0x58] sm:$0xff] %v2324_v11  ;;  %v2328_v13 = vld [vmem:[%s6412_s0 + $0x68] sm:$0xff]  ;;  %v2330_v14 = vld [vmem:[%s6412_s0 + $0x70] sm:$0xff] }
   0x8   :  { %2327 = vst [vmem:[%s6413_s2 + $0x60] sm:$0xff] %v2326_v12  ;;  %2329 = vst [vmem:[%s6413_s2 + $0x68] sm:$0xff] %v2328_v13  ;;  %v2332_v15 = vld [vmem:[%s6412_s0 + $0x78] sm:$0xff]  ;;  %v2334_v16 = vld [vmem:[%s6412_s0 + $0x80] sm:$0xff] }
   0x9   :  { %2331 = vst [vmem:[%s6413_s2 + $0x70] sm:$0xff] %v2330_v14  ;;  %v2336_v17 = vld [vmem:[%s6412_s0 + $0x88] sm:$0xff]  ;;  %2333 = vst [vmem:[%s6413_s2 + $0x78] sm:$0xff] %v2332_v15  ;;  %v2338_v18 = vld [vmem:[%s6412_s0 + $0x90] sm:$0xff] }
   0xa   :  { %2335 = vst [vmem:[%s6413_s2 + $0x80] sm:$0xff] %v2334_v16  ;;  %2337 = vst [vmem:[%s6413_s2 + $0x88] sm:$0xff] %v2336_v17  ;;  %v2340_v19 = vld [vmem:[%s6412_s0 + $0x98] sm:$0xff]  ;;  %v2342_v20 = vld [vmem:[%s6412_s0 + $0xa0] sm:$0xff] }
   0xb   :  { %2339 = vst [vmem:[%s6413_s2 + $0x90] sm:$0xff] %v2338_v18  ;;  %2341 = vst [vmem:[%s6413_s2 + $0x98] sm:$0xff] %v2340_v19  ;;  %v2344_v21 = vld [vmem:[%s6412_s0 + $0xa8] sm:$0xff]  ;;  %v2346_v22 = vld [vmem:[%s6412_s0 + $0xb0] sm:$0xff] }
   0xc   :  { %2343 = vst [vmem:[%s6413_s2 + $0xa0] sm:$0xff] %v2342_v20  ;;  %v2348_v23 = vld [vmem:[%s6412_s0 + $0xb8] sm:$0xff]  ;;  %2345 = vst [vmem:[%s6413_s2 + $0xa8] sm:$0xff] %v2344_v21  ;;  %v2350_v24 = vld [vmem:[%s6412_s0 + $0xc0] sm:$0xff] }
   0xd   :  { %2347 = vst [vmem:[%s6413_s2 + $0xb0] sm:$0xff] %v2346_v22  ;;  %2349 = vst [vmem:[%s6413_s2 + $0xb8] sm:$0xff] %v2348_v23  ;;  %v2352_v25 = vld [vmem:[%s6412_s0 + $0xc8] sm:$0xff]  ;;  %v2354_v26 = vld [vmem:[%s6412_s0 + $0xd0] sm:$0xff] }
   0xe   :  { %2351 = vst [vmem:[%s6413_s2 + $0xc0] sm:$0xff] %v2350_v24  ;;  %2353 = vst [vmem:[%s6413_s2 + $0xc8] sm:$0xff] %v2352_v25  ;;  %v2356_v27 = vld [vmem:[%s6412_s0 + $0xd8] sm:$0xff]  ;;  %v2358_v28 = vld [vmem:[%s6412_s0 + $0xe0] sm:$0xff] }
   0xf   :  { %2355 = vst [vmem:[%s6413_s2 + $0xd0] sm:$0xff] %v2354_v26  ;;  %v2360_v29 = vld [vmem:[%s6412_s0 + $0xe8] sm:$0xff]  ;;  %2357 = vst [vmem:[%s6413_s2 + $0xd8] sm:$0xff] %v2356_v27  ;;  %v2362_v30 = vld [vmem:[%s6412_s0 + $0xf0] sm:$0xff] }
  0x10   :  { %2359 = vst [vmem:[%s6413_s2 + $0xe0] sm:$0xff] %v2358_v28  ;;  %2361 = vst [vmem:[%s6413_s2 + $0xe8] sm:$0xff] %v2360_v29  ;;  %v2364_v31 = vld [vmem:[%s6412_s0 + $0xf8] sm:$0xff]  ;;  %v2366_v32 = vld [vmem:[%s6412_s0 + $0x100] sm:$0xff] }
  0x11   :  { %2363 = vst [vmem:[%s6413_s2 + $0xf0] sm:$0xff] %v2362_v30  ;;  %2365 = vst [vmem:[%s6413_s2 + $0xf8] sm:$0xff] %v2364_v31  ;;  %v2368_v33 = vld [vmem:[%s6412_s0 + $0x108] sm:$0xff]  ;;  %v2370_v34 = vld [vmem:[%s6412_s0 + $0x110] sm:$0xff] }
  0x12   :  { %2367 = vst [vmem:[%s6413_s2 + $0x100] sm:$0xff] %v2366_v32  ;;  %v2372_v35 = vld [vmem:[%s6412_s0 + $0x118] sm:$0xff]  ;;  %2369 = vst [vmem:[%s6413_s2 + $0x108] sm:$0xff] %v2368_v33  ;;  %v2374_v36 = vld [vmem:[%s6412_s0 + $0x120] sm:$0xff] }
  0x13   :  { %2371 = vst [vmem:[%s6413_s2 + $0x110] sm:$0xff] %v2370_v34  ;;  %2373 = vst [vmem:[%s6413_s2 + $0x118] sm:$0xff] %v2372_v35  ;;  %v2376_v37 = vld [vmem:[%s6412_s0 + $0x128] sm:$0xff]  ;;  %v2378_v38 = vld [vmem:[%s6412_s0 + $0x130] sm:$0xff] }
  0x14   :  { %2375 = vst [vmem:[%s6413_s2 + $0x120] sm:$0xff] %v2374_v36  ;;  %2377 = vst [vmem:[%s6413_s2 + $0x128] sm:$0xff] %v2376_v37  ;;  %v2380_v39 = vld [vmem:[%s6412_s0 + $0x138] sm:$0xff]  ;;  %v2382_v40 = vld [vmem:[%s6412_s0 + $0x140] sm:$0xff] }
  0x15   :  { %2379 = vst [vmem:[%s6413_s2 + $0x130] sm:$0xff] %v2378_v38  ;;  %v2384_v41 = vld [vmem:[%s6412_s0 + $0x148] sm:$0xff]  ;;  %2381 = vst [vmem:[%s6413_s2 + $0x138] sm:$0xff] %v2380_v39  ;;  %v2386_v42 = vld [vmem:[%s6412_s0 + $0x150] sm:$0xff] }
  0x16   :  { %2383 = vst [vmem:[%s6413_s2 + $0x140] sm:$0xff] %v2382_v40  ;;  %2385 = vst [vmem:[%s6413_s2 + $0x148] sm:$0xff] %v2384_v41  ;;  %v2388_v43 = vld [vmem:[%s6412_s0 + $0x158] sm:$0xff]  ;;  %v2390_v44 = vld [vmem:[%s6412_s0 + $0x160] sm:$0xff] }
  0x17   :  { %2387 = vst [vmem:[%s6413_s2 + $0x150] sm:$0xff] %v2386_v42  ;;  %2389 = vst [vmem:[%s6413_s2 + $0x158] sm:$0xff] %v2388_v43  ;;  %v2392_v45 = vld [vmem:[%s6412_s0 + $0x168] sm:$0xff]  ;;  %v2394_v46 = vld [vmem:[%s6412_s0 + $0x170] sm:$0xff] }
  0x18   :  { %2391 = vst [vmem:[%s6413_s2 + $0x160] sm:$0xff] %v2390_v44  ;;  %v2396_v47 = vld [vmem:[%s6412_s0 + $0x178] sm:$0xff]  ;;  %2393 = vst [vmem:[%s6413_s2 + $0x168] sm:$0xff] %v2392_v45  ;;  %v2398_v48 = vld [vmem:[%s6412_s0 + $0x180] sm:$0xff] }
  0x19   :  { %2395 = vst [vmem:[%s6413_s2 + $0x170] sm:$0xff] %v2394_v46  ;;  %2397 = vst [vmem:[%s6413_s2 + $0x178] sm:$0xff] %v2396_v47  ;;  %v2400_v49 = vld [vmem:[%s6412_s0 + $0x188] sm:$0xff]  ;;  %v2402_v50 = vld [vmem:[%s6412_s0 + $0x190] sm:$0xff] }
  0x1a   :  { %2399 = vst [vmem:[%s6413_s2 + $0x180] sm:$0xff] %v2398_v48  ;;  %2401 = vst [vmem:[%s6413_s2 + $0x188] sm:$0xff] %v2400_v49  ;;  %v2404_v51 = vld [vmem:[%s6412_s0 + $0x198] sm:$0xff]  ;;  %v2406_v52 = vld [vmem:[%s6412_s0 + $0x1a0] sm:$0xff] }
  0x1b   :  { %2403 = vst [vmem:[%s6413_s2 + $0x190] sm:$0xff] %v2402_v50  ;;  %v2408_v53 = vld [vmem:[%s6412_s0 + $0x1a8] sm:$0xff]  ;;  %2405 = vst [vmem:[%s6413_s2 + $0x198] sm:$0xff] %v2404_v51  ;;  %v2410_v54 = vld [vmem:[%s6412_s0 + $0x1b0] sm:$0xff] }
  0x1c   :  { %2407 = vst [vmem:[%s6413_s2 + $0x1a0] sm:$0xff] %v2406_v52  ;;  %2409 = vst [vmem:[%s6413_s2 + $0x1a8] sm:$0xff] %v2408_v53  ;;  %v2412_v55 = vld [vmem:[%s6412_s0 + $0x1b8] sm:$0xff]  ;;  %v2414_v56 = vld [vmem:[%s6412_s0 + $0x1c0] sm:$0xff] }
  0x1d   :  { %2411 = vst [vmem:[%s6413_s2 + $0x1b0] sm:$0xff] %v2410_v54  ;;  %2413 = vst [vmem:[%s6413_s2 + $0x1b8] sm:$0xff] %v2412_v55  ;;  %v2416_v57 = vld [vmem:[%s6412_s0 + $0x1c8] sm:$0xff]  ;;  %v2418_v58 = vld [vmem:[%s6412_s0 + $0x1d0] sm:$0xff] }
  0x1e   :  { %2415 = vst [vmem:[%s6413_s2 + $0x1c0] sm:$0xff] %v2414_v56  ;;  %v2420_v59 = vld [vmem:[%s6412_s0 + $0x1d8] sm:$0xff]  ;;  %2417 = vst [vmem:[%s6413_s2 + $0x1c8] sm:$0xff] %v2416_v57  ;;  %v2422_v60 = vld [vmem:[%s6412_s0 + $0x1e0] sm:$0xff] }
  0x1f   :  { %2419 = vst [vmem:[%s6413_s2 + $0x1d0] sm:$0xff] %v2418_v58  ;;  %2421 = vst [vmem:[%s6413_s2 + $0x1d8] sm:$0xff] %v2420_v59  ;;  %v2424_v61 = vld [vmem:[%s6412_s0 + $0x1e8] sm:$0xff]  ;;  %v2426_v62 = vld [vmem:[%s6412_s0 + $0x1f0] sm:$0xff] }
  0x20   :  { %2423 = vst [vmem:[%s6413_s2 + $0x1e0] sm:$0xff] %v2422_v60  ;;  %2425 = vst [vmem:[%s6413_s2 + $0x1e8] sm:$0xff] %v2424_v61  ;;  %v2428_v63 = vld [vmem:[%s6412_s0 + $0x1f8] sm:$0xff]  ;;  %v2430_v0 = vld [vmem:[%s6412_s0 + $0x200] sm:$0xff] }
  0x21   :  { %2427 = vst [vmem:[%s6413_s2 + $0x1f0] sm:$0xff] %v2426_v62  ;;  %v2432_v1 = vld [vmem:[%s6412_s0 + $0x208] sm:$0xff]  ;;  %2429 = vst [vmem:[%s6413_s2 + $0x1f8] sm:$0xff] %v2428_v63  ;;  %v2434_v2 = vld [vmem:[%s6412_s0 + $0x210] sm:$0xff] }
  0x22   :  { %2431 = vst [vmem:[%s6413_s2 + $0x200] sm:$0xff] %v2430_v0  ;;  %2433 = vst [vmem:[%s6413_s2 + $0x208] sm:$0xff] %v2432_v1  ;;  %v2436_v3 = vld [vmem:[%s6412_s0 + $0x218] sm:$0xff]  ;;  %v2438_v4 = vld [vmem:[%s6412_s0 + $0x220] sm:$0xff] }
  0x23   :  { %2435 = vst [vmem:[%s6413_s2 + $0x210] sm:$0xff] %v2434_v2  ;;  %2437 = vst [vmem:[%s6413_s2 + $0x218] sm:$0xff] %v2436_v3  ;;  %v2440_v5 = vld [vmem:[%s6412_s0 + $0x228] sm:$0xff]  ;;  %v2442_v6 = vld [vmem:[%s6412_s0 + $0x230] sm:$0xff] }
  0x24   :  { %2439 = vst [vmem:[%s6413_s2 + $0x220] sm:$0xff] %v2438_v4  ;;  %v2444_v7 = vld [vmem:[%s6412_s0 + $0x238] sm:$0xff]  ;;  %2441 = vst [vmem:[%s6413_s2 + $0x228] sm:$0xff] %v2440_v5  ;;  %v2446_v8 = vld [vmem:[%s6412_s0 + $0x240] sm:$0xff] }
  0x25   :  { %2443 = vst [vmem:[%s6413_s2 + $0x230] sm:$0xff] %v2442_v6  ;;  %2445 = vst [vmem:[%s6413_s2 + $0x238] sm:$0xff] %v2444_v7  ;;  %v2448_v9 = vld [vmem:[%s6412_s0 + $0x248] sm:$0xff]  ;;  %v2450_v10 = vld [vmem:[%s6412_s0 + $0x250] sm:$0xff] }
  0x26   :  { %2447 = vst [vmem:[%s6413_s2 + $0x240] sm:$0xff] %v2446_v8  ;;  %2449 = vst [vmem:[%s6413_s2 + $0x248] sm:$0xff] %v2448_v9  ;;  %v2452_v11 = vld [vmem:[%s6412_s0 + $0x258] sm:$0xff]  ;;  %v2454_v12 = vld [vmem:[%s6412_s0 + $0x260] sm:$0xff] }
  0x27   :  { %2451 = vst [vmem:[%s6413_s2 + $0x250] sm:$0xff] %v2450_v10  ;;  %v2456_v13 = vld [vmem:[%s6412_s0 + $0x268] sm:$0xff]  ;;  %2453 = vst [vmem:[%s6413_s2 + $0x258] sm:$0xff] %v2452_v11  ;;  %v2458_v14 = vld [vmem:[%s6412_s0 + $0x270] sm:$0xff] }
  0x28   :  { %2455 = vst [vmem:[%s6413_s2 + $0x260] sm:$0xff] %v2454_v12  ;;  %2457 = vst [vmem:[%s6413_s2 + $0x268] sm:$0xff] %v2456_v13  ;;  %v2460_v15 = vld [vmem:[%s6412_s0 + $0x278] sm:$0xff]  ;;  %v2462_v16 = vld [vmem:[%s6412_s0 + $0x280] sm:$0xff] }
  0x29   :  { %2459 = vst [vmem:[%s6413_s2 + $0x270] sm:$0xff] %v2458_v14  ;;  %2461 = vst [vmem:[%s6413_s2 + $0x278] sm:$0xff] %v2460_v15  ;;  %v2464_v17 = vld [vmem:[%s6412_s0 + $0x288] sm:$0xff]  ;;  %v2466_v18 = vld [vmem:[%s6412_s0 + $0x290] sm:$0xff] }
  0x2a   :  { %2463 = vst [vmem:[%s6413_s2 + $0x280] sm:$0xff] %v2462_v16  ;;  %v2468_v19 = vld [vmem:[%s6412_s0 + $0x298] sm:$0xff]  ;;  %2465 = vst [vmem:[%s6413_s2 + $0x288] sm:$0xff] %v2464_v17  ;;  %v2470_v20 = vld [vmem:[%s6412_s0 + $0x2a0] sm:$0xff] }
  0x2b   :  { %2467 = vst [vmem:[%s6413_s2 + $0x290] sm:$0xff] %v2466_v18  ;;  %2469 = vst [vmem:[%s6413_s2 + $0x298] sm:$0xff] %v2468_v19  ;;  %v2472_v21 = vld [vmem:[%s6412_s0 + $0x2a8] sm:$0xff]  ;;  %v2474_v22 = vld [vmem:[%s6412_s0 + $0x2b0] sm:$0xff] }
  0x2c   :  { %2471 = vst [vmem:[%s6413_s2 + $0x2a0] sm:$0xff] %v2470_v20  ;;  %2473 = vst [vmem:[%s6413_s2 + $0x2a8] sm:$0xff] %v2472_v21  ;;  %v2476_v23 = vld [vmem:[%s6412_s0 + $0x2b8] sm:$0xff]  ;;  %v2478_v24 = vld [vmem:[%s6412_s0 + $0x2c0] sm:$0xff] }
  0x2d   :  { %2475 = vst [vmem:[%s6413_s2 + $0x2b0] sm:$0xff] %v2474_v22  ;;  %v2480_v25 = vld [vmem:[%s6412_s0 + $0x2c8] sm:$0xff]  ;;  %2477 = vst [vmem:[%s6413_s2 + $0x2b8] sm:$0xff] %v2476_v23  ;;  %v2482_v26 = vld [vmem:[%s6412_s0 + $0x2d0] sm:$0xff] }
  0x2e   :  { %2479 = vst [vmem:[%s6413_s2 + $0x2c0] sm:$0xff] %v2478_v24  ;;  %2481 = vst [vmem:[%s6413_s2 + $0x2c8] sm:$0xff] %v2480_v25  ;;  %v2484_v27 = vld [vmem:[%s6412_s0 + $0x2d8] sm:$0xff]  ;;  %v2486_v28 = vld [vmem:[%s6412_s0 + $0x2e0] sm:$0xff] }
  0x2f   :  { %2483 = vst [vmem:[%s6413_s2 + $0x2d0] sm:$0xff] %v2482_v26  ;;  %2485 = vst [vmem:[%s6413_s2 + $0x2d8] sm:$0xff] %v2484_v27  ;;  %v2488_v29 = vld [vmem:[%s6412_s0 + $0x2e8] sm:$0xff]  ;;  %v2490_v30 = vld [vmem:[%s6412_s0 + $0x2f0] sm:$0xff] }
  0x30   :  { %2487 = vst [vmem:[%s6413_s2 + $0x2e0] sm:$0xff] %v2486_v28  ;;  %v2492_v31 = vld [vmem:[%s6412_s0 + $0x2f8] sm:$0xff]  ;;  %2489 = vst [vmem:[%s6413_s2 + $0x2e8] sm:$0xff] %v2488_v29  ;;  %v2494_v32 = vld [vmem:[%s6412_s0 + $0x300] sm:$0xff] }
  0x31   :  { %2491 = vst [vmem:[%s6413_s2 + $0x2f0] sm:$0xff] %v2490_v30  ;;  %2493 = vst [vmem:[%s6413_s2 + $0x2f8] sm:$0xff] %v2492_v31  ;;  %v2496_v33 = vld [vmem:[%s6412_s0 + $0x308] sm:$0xff]  ;;  %v2498_v34 = vld [vmem:[%s6412_s0 + $0x310] sm:$0xff] }
  0x32   :  { %2495 = vst [vmem:[%s6413_s2 + $0x300] sm:$0xff] %v2494_v32  ;;  %2497 = vst [vmem:[%s6413_s2 + $0x308] sm:$0xff] %v2496_v33  ;;  %v2500_v35 = vld [vmem:[%s6412_s0 + $0x318] sm:$0xff]  ;;  %v2502_v36 = vld [vmem:[%s6412_s0 + $0x320] sm:$0xff] }
  0x33   :  { %2499 = vst [vmem:[%s6413_s2 + $0x310] sm:$0xff] %v2498_v34  ;;  %v2504_v37 = vld [vmem:[%s6412_s0 + $0x328] sm:$0xff]  ;;  %2501 = vst [vmem:[%s6413_s2 + $0x318] sm:$0xff] %v2500_v35  ;;  %v2506_v38 = vld [vmem:[%s6412_s0 + $0x330] sm:$0xff] }
  0x34   :  { %2503 = vst [vmem:[%s6413_s2 + $0x320] sm:$0xff] %v2502_v36  ;;  %2505 = vst [vmem:[%s6413_s2 + $0x328] sm:$0xff] %v2504_v37  ;;  %v2508_v39 = vld [vmem:[%s6412_s0 + $0x338] sm:$0xff]  ;;  %v2510_v40 = vld [vmem:[%s6412_s0 + $0x340] sm:$0xff] }
  0x35   :  { %2507 = vst [vmem:[%s6413_s2 + $0x330] sm:$0xff] %v2506_v38  ;;  %2509 = vst [vmem:[%s6413_s2 + $0x338] sm:$0xff] %v2508_v39  ;;  %v2512_v41 = vld [vmem:[%s6412_s0 + $0x348] sm:$0xff]  ;;  %v2514_v42 = vld [vmem:[%s6412_s0 + $0x350] sm:$0xff] }
  0x36   :  { %2511 = vst [vmem:[%s6413_s2 + $0x340] sm:$0xff] %v2510_v40  ;;  %v2516_v43 = vld [vmem:[%s6412_s0 + $0x358] sm:$0xff]  ;;  %2513 = vst [vmem:[%s6413_s2 + $0x348] sm:$0xff] %v2512_v41  ;;  %v2518_v44 = vld [vmem:[%s6412_s0 + $0x360] sm:$0xff] }
  0x37   :  { %2515 = vst [vmem:[%s6413_s2 + $0x350] sm:$0xff] %v2514_v42  ;;  %2517 = vst [vmem:[%s6413_s2 + $0x358] sm:$0xff] %v2516_v43  ;;  %v2520_v45 = vld [vmem:[%s6412_s0 + $0x368] sm:$0xff]  ;;  %v2522_v46 = vld [vmem:[%s6412_s0 + $0x370] sm:$0xff] }
  0x38   :  { %2519 = vst [vmem:[%s6413_s2 + $0x360] sm:$0xff] %v2518_v44  ;;  %2521 = vst [vmem:[%s6413_s2 + $0x368] sm:$0xff] %v2520_v45  ;;  %v2524_v47 = vld [vmem:[%s6412_s0 + $0x378] sm:$0xff]  ;;  %v2526_v48 = vld [vmem:[%s6412_s0 + $0x380] sm:$0xff] }
  0x39   :  { %2523 = vst [vmem:[%s6413_s2 + $0x370] sm:$0xff] %v2522_v46  ;;  %v2528_v49 = vld [vmem:[%s6412_s0 + $0x388] sm:$0xff]  ;;  %2525 = vst [vmem:[%s6413_s2 + $0x378] sm:$0xff] %v2524_v47  ;;  %v2530_v50 = vld [vmem:[%s6412_s0 + $0x390] sm:$0xff] }
  0x3a   :  { %2527 = vst [vmem:[%s6413_s2 + $0x380] sm:$0xff] %v2526_v48  ;;  %2529 = vst [vmem:[%s6413_s2 + $0x388] sm:$0xff] %v2528_v49  ;;  %v2532_v51 = vld [vmem:[%s6412_s0 + $0x398] sm:$0xff]  ;;  %v2534_v52 = vld [vmem:[%s6412_s0 + $0x3a0] sm:$0xff] }
  0x3b   :  { %2531 = vst [vmem:[%s6413_s2 + $0x390] sm:$0xff] %v2530_v50  ;;  %2533 = vst [vmem:[%s6413_s2 + $0x398] sm:$0xff] %v2532_v51  ;;  %v2536_v53 = vld [vmem:[%s6412_s0 + $0x3a8] sm:$0xff]  ;;  %v2538_v54 = vld [vmem:[%s6412_s0 + $0x3b0] sm:$0xff] }
  0x3c   :  { %2535 = vst [vmem:[%s6413_s2 + $0x3a0] sm:$0xff] %v2534_v52  ;;  %v2540_v55 = vld [vmem:[%s6412_s0 + $0x3b8] sm:$0xff]  ;;  %2537 = vst [vmem:[%s6413_s2 + $0x3a8] sm:$0xff] %v2536_v53  ;;  %v2542_v56 = vld [vmem:[%s6412_s0 + $0x3c0] sm:$0xff] }
  0x3d   :  { %2539 = vst [vmem:[%s6413_s2 + $0x3b0] sm:$0xff] %v2538_v54  ;;  %2541 = vst [vmem:[%s6413_s2 + $0x3b8] sm:$0xff] %v2540_v55  ;;  %v2544_v57 = vld [vmem:[%s6412_s0 + $0x3c8] sm:$0xff]  ;;  %v2546_v58 = vld [vmem:[%s6412_s0 + $0x3d0] sm:$0xff] }
  0x3e   :  { %2543 = vst [vmem:[%s6413_s2 + $0x3c0] sm:$0xff] %v2542_v56  ;;  %2545 = vst [vmem:[%s6413_s2 + $0x3c8] sm:$0xff] %v2544_v57  ;;  %v2548_v59 = vld [vmem:[%s6412_s0 + $0x3d8] sm:$0xff]  ;;  %v2550_v60 = vld [vmem:[%s6412_s0 + $0x3e0] sm:$0xff] }
  0x3f   :  { %2547 = vst [vmem:[%s6413_s2 + $0x3d0] sm:$0xff] %v2546_v58  ;;  %v2552_v61 = vld [vmem:[%s6412_s0 + $0x3e8] sm:$0xff]  ;;  %2549 = vst [vmem:[%s6413_s2 + $0x3d8] sm:$0xff] %v2548_v59  ;;  %v2554_v62 = vld [vmem:[%s6412_s0 + $0x3f0] sm:$0xff] }
  0x40   :  { %2551 = vst [vmem:[%s6413_s2 + $0x3e0] sm:$0xff] %v2550_v60  ;;  %2553 = vst [vmem:[%s6413_s2 + $0x3e8] sm:$0xff] %v2552_v61  ;;  %v2556_v63 = vld [vmem:[%s6412_s0 + $0x3f8] sm:$0xff]  ;;  %v2558_v0 = vld [vmem:[%s6412_s0 + $0x400] sm:$0xff] }
  0x41   :  { %2555 = vst [vmem:[%s6413_s2 + $0x3f0] sm:$0xff] %v2554_v62  ;;  %2557 = vst [vmem:[%s6413_s2 + $0x3f8] sm:$0xff] %v2556_v63  ;;  %v2560_v1 = vld [vmem:[%s6412_s0 + $0x408] sm:$0xff]  ;;  %v2562_v2 = vld [vmem:[%s6412_s0 + $0x410] sm:$0xff] }
  0x42   :  { %2559 = vst [vmem:[%s6413_s2 + $0x400] sm:$0xff] %v2558_v0  ;;  %v2564_v3 = vld [vmem:[%s6412_s0 + $0x418] sm:$0xff]  ;;  %2561 = vst [vmem:[%s6413_s2 + $0x408] sm:$0xff] %v2560_v1  ;;  %v2566_v4 = vld [vmem:[%s6412_s0 + $0x420] sm:$0xff] }
  0x43   :  { %2563 = vst [vmem:[%s6413_s2 + $0x410] sm:$0xff] %v2562_v2  ;;  %2565 = vst [vmem:[%s6413_s2 + $0x418] sm:$0xff] %v2564_v3  ;;  %v2568_v5 = vld [vmem:[%s6412_s0 + $0x428] sm:$0xff]  ;;  %v2570_v6 = vld [vmem:[%s6412_s0 + $0x430] sm:$0xff] }
  0x44   :  { %2567 = vst [vmem:[%s6413_s2 + $0x420] sm:$0xff] %v2566_v4  ;;  %2569 = vst [vmem:[%s6413_s2 + $0x428] sm:$0xff] %v2568_v5  ;;  %v2572_v7 = vld [vmem:[%s6412_s0 + $0x438] sm:$0xff]  ;;  %v2574_v8 = vld [vmem:[%s6412_s0 + $0x440] sm:$0xff] }
  0x45   :  { %2571 = vst [vmem:[%s6413_s2 + $0x430] sm:$0xff] %v2570_v6  ;;  %v2576_v9 = vld [vmem:[%s6412_s0 + $0x448] sm:$0xff]  ;;  %2573 = vst [vmem:[%s6413_s2 + $0x438] sm:$0xff] %v2572_v7  ;;  %v2578_v10 = vld [vmem:[%s6412_s0 + $0x450] sm:$0xff] }
  0x46   :  { %2575 = vst [vmem:[%s6413_s2 + $0x440] sm:$0xff] %v2574_v8  ;;  %2577 = vst [vmem:[%s6413_s2 + $0x448] sm:$0xff] %v2576_v9  ;;  %v2580_v11 = vld [vmem:[%s6412_s0 + $0x458] sm:$0xff]  ;;  %v2582_v12 = vld [vmem:[%s6412_s0 + $0x460] sm:$0xff] }
  0x47   :  { %2579 = vst [vmem:[%s6413_s2 + $0x450] sm:$0xff] %v2578_v10  ;;  %2581 = vst [vmem:[%s6413_s2 + $0x458] sm:$0xff] %v2580_v11  ;;  %v2584_v13 = vld [vmem:[%s6412_s0 + $0x468] sm:$0xff]  ;;  %v2586_v14 = vld [vmem:[%s6412_s0 + $0x470] sm:$0xff] }
  0x48   :  { %2583 = vst [vmem:[%s6413_s2 + $0x460] sm:$0xff] %v2582_v12  ;;  %v2588_v15 = vld [vmem:[%s6412_s0 + $0x478] sm:$0xff]  ;;  %2585 = vst [vmem:[%s6413_s2 + $0x468] sm:$0xff] %v2584_v13  ;;  %v2590_v16 = vld [vmem:[%s6412_s0 + $0x480] sm:$0xff] }
  0x49   :  { %2587 = vst [vmem:[%s6413_s2 + $0x470] sm:$0xff] %v2586_v14  ;;  %2589 = vst [vmem:[%s6413_s2 + $0x478] sm:$0xff] %v2588_v15  ;;  %v2592_v17 = vld [vmem:[%s6412_s0 + $0x488] sm:$0xff]  ;;  %v2594_v18 = vld [vmem:[%s6412_s0 + $0x490] sm:$0xff] }
  0x4a   :  { %2591 = vst [vmem:[%s6413_s2 + $0x480] sm:$0xff] %v2590_v16  ;;  %2593 = vst [vmem:[%s6413_s2 + $0x488] sm:$0xff] %v2592_v17  ;;  %v2596_v19 = vld [vmem:[%s6412_s0 + $0x498] sm:$0xff]  ;;  %v2598_v20 = vld [vmem:[%s6412_s0 + $0x4a0] sm:$0xff] }
  0x4b   :  { %2595 = vst [vmem:[%s6413_s2 + $0x490] sm:$0xff] %v2594_v18  ;;  %v2600_v21 = vld [vmem:[%s6412_s0 + $0x4a8] sm:$0xff]  ;;  %2597 = vst [vmem:[%s6413_s2 + $0x498] sm:$0xff] %v2596_v19  ;;  %v2602_v22 = vld [vmem:[%s6412_s0 + $0x4b0] sm:$0xff] }
  0x4c   :  { %2599 = vst [vmem:[%s6413_s2 + $0x4a0] sm:$0xff] %v2598_v20  ;;  %2601 = vst [vmem:[%s6413_s2 + $0x4a8] sm:$0xff] %v2600_v21  ;;  %v2604_v23 = vld [vmem:[%s6412_s0 + $0x4b8] sm:$0xff]  ;;  %v2606_v24 = vld [vmem:[%s6412_s0 + $0x4c0] sm:$0xff] }
  0x4d   :  { %2603 = vst [vmem:[%s6413_s2 + $0x4b0] sm:$0xff] %v2602_v22  ;;  %2605 = vst [vmem:[%s6413_s2 + $0x4b8] sm:$0xff] %v2604_v23  ;;  %v2608_v25 = vld [vmem:[%s6412_s0 + $0x4c8] sm:$0xff]  ;;  %v2610_v26 = vld [vmem:[%s6412_s0 + $0x4d0] sm:$0xff] }
  0x4e   :  { %2607 = vst [vmem:[%s6413_s2 + $0x4c0] sm:$0xff] %v2606_v24  ;;  %v2612_v27 = vld [vmem:[%s6412_s0 + $0x4d8] sm:$0xff]  ;;  %2609 = vst [vmem:[%s6413_s2 + $0x4c8] sm:$0xff] %v2608_v25  ;;  %v2614_v28 = vld [vmem:[%s6412_s0 + $0x4e0] sm:$0xff] }
  0x4f   :  { %2611 = vst [vmem:[%s6413_s2 + $0x4d0] sm:$0xff] %v2610_v26  ;;  %2613 = vst [vmem:[%s6413_s2 + $0x4d8] sm:$0xff] %v2612_v27  ;;  %v2616_v29 = vld [vmem:[%s6412_s0 + $0x4e8] sm:$0xff]  ;;  %v2618_v30 = vld [vmem:[%s6412_s0 + $0x4f0] sm:$0xff] }
  0x50   :  { %2615 = vst [vmem:[%s6413_s2 + $0x4e0] sm:$0xff] %v2614_v28  ;;  %2617 = vst [vmem:[%s6413_s2 + $0x4e8] sm:$0xff] %v2616_v29  ;;  %v2620_v31 = vld [vmem:[%s6412_s0 + $0x4f8] sm:$0xff]  ;;  %v2622_v32 = vld [vmem:[%s6412_s0 + $0x500] sm:$0xff] }
  0x51   :  { %2619 = vst [vmem:[%s6413_s2 + $0x4f0] sm:$0xff] %v2618_v30  ;;  %v2624_v33 = vld [vmem:[%s6412_s0 + $0x508] sm:$0xff]  ;;  %2621 = vst [vmem:[%s6413_s2 + $0x4f8] sm:$0xff] %v2620_v31  ;;  %v2626_v34 = vld [vmem:[%s6412_s0 + $0x510] sm:$0xff] }
  0x52   :  { %2623 = vst [vmem:[%s6413_s2 + $0x500] sm:$0xff] %v2622_v32  ;;  %2625 = vst [vmem:[%s6413_s2 + $0x508] sm:$0xff] %v2624_v33  ;;  %v2628_v35 = vld [vmem:[%s6412_s0 + $0x518] sm:$0xff]  ;;  %v2630_v36 = vld [vmem:[%s6412_s0 + $0x520] sm:$0xff] }
  0x53   :  { %2627 = vst [vmem:[%s6413_s2 + $0x510] sm:$0xff] %v2626_v34  ;;  %2629 = vst [vmem:[%s6413_s2 + $0x518] sm:$0xff] %v2628_v35  ;;  %v2632_v37 = vld [vmem:[%s6412_s0 + $0x528] sm:$0xff]  ;;  %v2634_v38 = vld [vmem:[%s6412_s0 + $0x530] sm:$0xff] }
  0x54   :  { %2631 = vst [vmem:[%s6413_s2 + $0x520] sm:$0xff] %v2630_v36  ;;  %v2636_v39 = vld [vmem:[%s6412_s0 + $0x538] sm:$0xff]  ;;  %2633 = vst [vmem:[%s6413_s2 + $0x528] sm:$0xff] %v2632_v37  ;;  %v2638_v40 = vld [vmem:[%s6412_s0 + $0x540] sm:$0xff] }
  0x55   :  { %2635 = vst [vmem:[%s6413_s2 + $0x530] sm:$0xff] %v2634_v38  ;;  %2637 = vst [vmem:[%s6413_s2 + $0x538] sm:$0xff] %v2636_v39  ;;  %v2640_v41 = vld [vmem:[%s6412_s0 + $0x548] sm:$0xff]  ;;  %v2642_v42 = vld [vmem:[%s6412_s0 + $0x550] sm:$0xff] }
  0x56   :  { %2639 = vst [vmem:[%s6413_s2 + $0x540] sm:$0xff] %v2638_v40  ;;  %2641 = vst [vmem:[%s6413_s2 + $0x548] sm:$0xff] %v2640_v41  ;;  %v2644_v43 = vld [vmem:[%s6412_s0 + $0x558] sm:$0xff]  ;;  %v2646_v44 = vld [vmem:[%s6412_s0 + $0x560] sm:$0xff] }
  0x57   :  { %2643 = vst [vmem:[%s6413_s2 + $0x550] sm:$0xff] %v2642_v42  ;;  %v2648_v45 = vld [vmem:[%s6412_s0 + $0x568] sm:$0xff]  ;;  %2645 = vst [vmem:[%s6413_s2 + $0x558] sm:$0xff] %v2644_v43  ;;  %v2650_v46 = vld [vmem:[%s6412_s0 + $0x570] sm:$0xff] }
  0x58   :  { %2647 = vst [vmem:[%s6413_s2 + $0x560] sm:$0xff] %v2646_v44  ;;  %2649 = vst [vmem:[%s6413_s2 + $0x568] sm:$0xff] %v2648_v45  ;;  %v2652_v47 = vld [vmem:[%s6412_s0 + $0x578] sm:$0xff]  ;;  %v2654_v48 = vld [vmem:[%s6412_s0 + $0x580] sm:$0xff] }
  0x59   :  { %2651 = vst [vmem:[%s6413_s2 + $0x570] sm:$0xff] %v2650_v46  ;;  %2653 = vst [vmem:[%s6413_s2 + $0x578] sm:$0xff] %v2652_v47  ;;  %v2656_v49 = vld [vmem:[%s6412_s0 + $0x588] sm:$0xff]  ;;  %v2658_v50 = vld [vmem:[%s6412_s0 + $0x590] sm:$0xff] }
  0x5a   :  { %2655 = vst [vmem:[%s6413_s2 + $0x580] sm:$0xff] %v2654_v48  ;;  %v2660_v51 = vld [vmem:[%s6412_s0 + $0x598] sm:$0xff]  ;;  %2657 = vst [vmem:[%s6413_s2 + $0x588] sm:$0xff] %v2656_v49  ;;  %v2662_v52 = vld [vmem:[%s6412_s0 + $0x5a0] sm:$0xff] }
  0x5b   :  { %2659 = vst [vmem:[%s6413_s2 + $0x590] sm:$0xff] %v2658_v50  ;;  %2661 = vst [vmem:[%s6413_s2 + $0x598] sm:$0xff] %v2660_v51  ;;  %v2664_v53 = vld [vmem:[%s6412_s0 + $0x5a8] sm:$0xff]  ;;  %v2666_v54 = vld [vmem:[%s6412_s0 + $0x5b0] sm:$0xff] }
  0x5c   :  { %2663 = vst [vmem:[%s6413_s2 + $0x5a0] sm:$0xff] %v2662_v52  ;;  %2665 = vst [vmem:[%s6413_s2 + $0x5a8] sm:$0xff] %v2664_v53  ;;  %v2668_v55 = vld [vmem:[%s6412_s0 + $0x5b8] sm:$0xff]  ;;  %v2670_v56 = vld [vmem:[%s6412_s0 + $0x5c0] sm:$0xff] }
  0x5d   :  { %2667 = vst [vmem:[%s6413_s2 + $0x5b0] sm:$0xff] %v2666_v54  ;;  %v2672_v57 = vld [vmem:[%s6412_s0 + $0x5c8] sm:$0xff]  ;;  %2669 = vst [vmem:[%s6413_s2 + $0x5b8] sm:$0xff] %v2668_v55  ;;  %v2674_v58 = vld [vmem:[%s6412_s0 + $0x5d0] sm:$0xff] }
  0x5e   :  { %2671 = vst [vmem:[%s6413_s2 + $0x5c0] sm:$0xff] %v2670_v56  ;;  %2673 = vst [vmem:[%s6413_s2 + $0x5c8] sm:$0xff] %v2672_v57  ;;  %v2676_v59 = vld [vmem:[%s6412_s0 + $0x5d8] sm:$0xff]  ;;  %v2678_v60 = vld [vmem:[%s6412_s0 + $0x5e0] sm:$0xff] }
  0x5f   :  { %2675 = vst [vmem:[%s6413_s2 + $0x5d0] sm:$0xff] %v2674_v58  ;;  %2677 = vst [vmem:[%s6413_s2 + $0x5d8] sm:$0xff] %v2676_v59  ;;  %v2680_v61 = vld [vmem:[%s6412_s0 + $0x5e8] sm:$0xff]  ;;  %v2682_v62 = vld [vmem:[%s6412_s0 + $0x5f0] sm:$0xff] }
  0x60   :  { %2679 = vst [vmem:[%s6413_s2 + $0x5e0] sm:$0xff] %v2678_v60  ;;  %v2684_v63 = vld [vmem:[%s6412_s0 + $0x5f8] sm:$0xff]  ;;  %2681 = vst [vmem:[%s6413_s2 + $0x5e8] sm:$0xff] %v2680_v61  ;;  %v2686_v0 = vld [vmem:[%s6412_s0 + $0x600] sm:$0xff] }
  0x61   :  { %2683 = vst [vmem:[%s6413_s2 + $0x5f0] sm:$0xff] %v2682_v62  ;;  %2685 = vst [vmem:[%s6413_s2 + $0x5f8] sm:$0xff] %v2684_v63  ;;  %v2688_v1 = vld [vmem:[%s6412_s0 + $0x608] sm:$0xff]  ;;  %v2690_v2 = vld [vmem:[%s6412_s0 + $0x610] sm:$0xff] }
  0x62   :  { %2687 = vst [vmem:[%s6413_s2 + $0x600] sm:$0xff] %v2686_v0  ;;  %2689 = vst [vmem:[%s6413_s2 + $0x608] sm:$0xff] %v2688_v1  ;;  %v2692_v3 = vld [vmem:[%s6412_s0 + $0x618] sm:$0xff]  ;;  %v2694_v4 = vld [vmem:[%s6412_s0 + $0x620] sm:$0xff] }
  0x63   :  { %2691 = vst [vmem:[%s6413_s2 + $0x610] sm:$0xff] %v2690_v2  ;;  %v2696_v5 = vld [vmem:[%s6412_s0 + $0x628] sm:$0xff]  ;;  %2693 = vst [vmem:[%s6413_s2 + $0x618] sm:$0xff] %v2692_v3  ;;  %v2698_v6 = vld [vmem:[%s6412_s0 + $0x630] sm:$0xff] }
  0x64   :  { %2695 = vst [vmem:[%s6413_s2 + $0x620] sm:$0xff] %v2694_v4  ;;  %2697 = vst [vmem:[%s6413_s2 + $0x628] sm:$0xff] %v2696_v5  ;;  %v2700_v7 = vld [vmem:[%s6412_s0 + $0x638] sm:$0xff]  ;;  %v2702_v8 = vld [vmem:[%s6412_s0 + $0x640] sm:$0xff] }
  0x65   :  { %2699 = vst [vmem:[%s6413_s2 + $0x630] sm:$0xff] %v2698_v6  ;;  %2701 = vst [vmem:[%s6413_s2 + $0x638] sm:$0xff] %v2700_v7  ;;  %v2704_v9 = vld [vmem:[%s6412_s0 + $0x648] sm:$0xff]  ;;  %v2706_v10 = vld [vmem:[%s6412_s0 + $0x650] sm:$0xff] }
  0x66   :  { %2703 = vst [vmem:[%s6413_s2 + $0x640] sm:$0xff] %v2702_v8  ;;  %v2708_v11 = vld [vmem:[%s6412_s0 + $0x658] sm:$0xff]  ;;  %2705 = vst [vmem:[%s6413_s2 + $0x648] sm:$0xff] %v2704_v9  ;;  %v2710_v12 = vld [vmem:[%s6412_s0 + $0x660] sm:$0xff] }
  0x67   :  { %2707 = vst [vmem:[%s6413_s2 + $0x650] sm:$0xff] %v2706_v10  ;;  %2709 = vst [vmem:[%s6413_s2 + $0x658] sm:$0xff] %v2708_v11  ;;  %v2712_v13 = vld [vmem:[%s6412_s0 + $0x668] sm:$0xff]  ;;  %v2714_v14 = vld [vmem:[%s6412_s0 + $0x670] sm:$0xff] }
  0x68   :  { %2711 = vst [vmem:[%s6413_s2 + $0x660] sm:$0xff] %v2710_v12  ;;  %2713 = vst [vmem:[%s6413_s2 + $0x668] sm:$0xff] %v2712_v13  ;;  %v2716_v15 = vld [vmem:[%s6412_s0 + $0x678] sm:$0xff]  ;;  %v2718_v16 = vld [vmem:[%s6412_s0 + $0x680] sm:$0xff] }
  0x69   :  { %2715 = vst [vmem:[%s6413_s2 + $0x670] sm:$0xff] %v2714_v14  ;;  %v2720_v17 = vld [vmem:[%s6412_s0 + $0x688] sm:$0xff]  ;;  %2717 = vst [vmem:[%s6413_s2 + $0x678] sm:$0xff] %v2716_v15  ;;  %v2722_v18 = vld [vmem:[%s6412_s0 + $0x690] sm:$0xff] }
  0x6a   :  { %2719 = vst [vmem:[%s6413_s2 + $0x680] sm:$0xff] %v2718_v16  ;;  %2721 = vst [vmem:[%s6413_s2 + $0x688] sm:$0xff] %v2720_v17  ;;  %v2724_v19 = vld [vmem:[%s6412_s0 + $0x698] sm:$0xff]  ;;  %v2726_v20 = vld [vmem:[%s6412_s0 + $0x6a0] sm:$0xff] }
  0x6b   :  { %2723 = vst [vmem:[%s6413_s2 + $0x690] sm:$0xff] %v2722_v18  ;;  %2725 = vst [vmem:[%s6413_s2 + $0x698] sm:$0xff] %v2724_v19  ;;  %v2728_v21 = vld [vmem:[%s6412_s0 + $0x6a8] sm:$0xff]  ;;  %v2730_v22 = vld [vmem:[%s6412_s0 + $0x6b0] sm:$0xff] }
  0x6c   :  { %2727 = vst [vmem:[%s6413_s2 + $0x6a0] sm:$0xff] %v2726_v20  ;;  %v2732_v23 = vld [vmem:[%s6412_s0 + $0x6b8] sm:$0xff]  ;;  %2729 = vst [vmem:[%s6413_s2 + $0x6a8] sm:$0xff] %v2728_v21  ;;  %v2734_v24 = vld [vmem:[%s6412_s0 + $0x6c0] sm:$0xff] }
  0x6d   :  { %2731 = vst [vmem:[%s6413_s2 + $0x6b0] sm:$0xff] %v2730_v22  ;;  %2733 = vst [vmem:[%s6413_s2 + $0x6b8] sm:$0xff] %v2732_v23  ;;  %v2736_v25 = vld [vmem:[%s6412_s0 + $0x6c8] sm:$0xff]  ;;  %v2738_v26 = vld [vmem:[%s6412_s0 + $0x6d0] sm:$0xff] }
  0x6e   :  { %2735 = vst [vmem:[%s6413_s2 + $0x6c0] sm:$0xff] %v2734_v24  ;;  %2737 = vst [vmem:[%s6413_s2 + $0x6c8] sm:$0xff] %v2736_v25  ;;  %v2740_v27 = vld [vmem:[%s6412_s0 + $0x6d8] sm:$0xff]  ;;  %v2742_v28 = vld [vmem:[%s6412_s0 + $0x6e0] sm:$0xff] }
  0x6f   :  { %2739 = vst [vmem:[%s6413_s2 + $0x6d0] sm:$0xff] %v2738_v26  ;;  %v2744_v29 = vld [vmem:[%s6412_s0 + $0x6e8] sm:$0xff]  ;;  %2741 = vst [vmem:[%s6413_s2 + $0x6d8] sm:$0xff] %v2740_v27  ;;  %v2746_v30 = vld [vmem:[%s6412_s0 + $0x6f0] sm:$0xff] }
  0x70   :  { %2743 = vst [vmem:[%s6413_s2 + $0x6e0] sm:$0xff] %v2742_v28  ;;  %2745 = vst [vmem:[%s6413_s2 + $0x6e8] sm:$0xff] %v2744_v29  ;;  %v2748_v31 = vld [vmem:[%s6412_s0 + $0x6f8] sm:$0xff]  ;;  %v2750_v32 = vld [vmem:[%s6412_s0 + $0x700] sm:$0xff] }
  0x71   :  { %2747 = vst [vmem:[%s6413_s2 + $0x6f0] sm:$0xff] %v2746_v30  ;;  %2749 = vst [vmem:[%s6413_s2 + $0x6f8] sm:$0xff] %v2748_v31  ;;  %v2752_v33 = vld [vmem:[%s6412_s0 + $0x708] sm:$0xff]  ;;  %v2754_v34 = vld [vmem:[%s6412_s0 + $0x710] sm:$0xff] }
  0x72   :  { %2751 = vst [vmem:[%s6413_s2 + $0x700] sm:$0xff] %v2750_v32  ;;  %v2756_v35 = vld [vmem:[%s6412_s0 + $0x718] sm:$0xff]  ;;  %2753 = vst [vmem:[%s6413_s2 + $0x708] sm:$0xff] %v2752_v33  ;;  %v2758_v36 = vld [vmem:[%s6412_s0 + $0x720] sm:$0xff] }
  0x73   :  { %2755 = vst [vmem:[%s6413_s2 + $0x710] sm:$0xff] %v2754_v34  ;;  %2757 = vst [vmem:[%s6413_s2 + $0x718] sm:$0xff] %v2756_v35  ;;  %v2760_v37 = vld [vmem:[%s6412_s0 + $0x728] sm:$0xff]  ;;  %v2762_v38 = vld [vmem:[%s6412_s0 + $0x730] sm:$0xff] }
  0x74   :  { %2759 = vst [vmem:[%s6413_s2 + $0x720] sm:$0xff] %v2758_v36  ;;  %2761 = vst [vmem:[%s6413_s2 + $0x728] sm:$0xff] %v2760_v37  ;;  %v2764_v39 = vld [vmem:[%s6412_s0 + $0x738] sm:$0xff]  ;;  %v2766_v40 = vld [vmem:[%s6412_s0 + $0x740] sm:$0xff] }
  0x75   :  { %2763 = vst [vmem:[%s6413_s2 + $0x730] sm:$0xff] %v2762_v38  ;;  %v2768_v41 = vld [vmem:[%s6412_s0 + $0x748] sm:$0xff]  ;;  %2765 = vst [vmem:[%s6413_s2 + $0x738] sm:$0xff] %v2764_v39  ;;  %v2770_v42 = vld [vmem:[%s6412_s0 + $0x750] sm:$0xff] }
  0x76   :  { %2767 = vst [vmem:[%s6413_s2 + $0x740] sm:$0xff] %v2766_v40  ;;  %2769 = vst [vmem:[%s6413_s2 + $0x748] sm:$0xff] %v2768_v41  ;;  %v2772_v43 = vld [vmem:[%s6412_s0 + $0x758] sm:$0xff]  ;;  %v2774_v44 = vld [vmem:[%s6412_s0 + $0x760] sm:$0xff] }
  0x77   :  { %2771 = vst [vmem:[%s6413_s2 + $0x750] sm:$0xff] %v2770_v42  ;;  %2773 = vst [vmem:[%s6413_s2 + $0x758] sm:$0xff] %v2772_v43  ;;  %v2776_v45 = vld [vmem:[%s6412_s0 + $0x768] sm:$0xff]  ;;  %v2778_v46 = vld [vmem:[%s6412_s0 + $0x770] sm:$0xff] }
  0x78   :  { %2775 = vst [vmem:[%s6413_s2 + $0x760] sm:$0xff] %v2774_v44  ;;  %v2780_v47 = vld [vmem:[%s6412_s0 + $0x778] sm:$0xff]  ;;  %2777 = vst [vmem:[%s6413_s2 + $0x768] sm:$0xff] %v2776_v45  ;;  %v2782_v48 = vld [vmem:[%s6412_s0 + $0x780] sm:$0xff] }
  0x79   :  { %2779 = vst [vmem:[%s6413_s2 + $0x770] sm:$0xff] %v2778_v46  ;;  %2781 = vst [vmem:[%s6413_s2 + $0x778] sm:$0xff] %v2780_v47  ;;  %v2784_v49 = vld [vmem:[%s6412_s0 + $0x788] sm:$0xff]  ;;  %v2786_v50 = vld [vmem:[%s6412_s0 + $0x790] sm:$0xff] }
  0x7a   :  { %2783 = vst [vmem:[%s6413_s2 + $0x780] sm:$0xff] %v2782_v48  ;;  %2785 = vst [vmem:[%s6413_s2 + $0x788] sm:$0xff] %v2784_v49  ;;  %v2788_v51 = vld [vmem:[%s6412_s0 + $0x798] sm:$0xff]  ;;  %v2790_v52 = vld [vmem:[%s6412_s0 + $0x7a0] sm:$0xff] }
  0x7b   :  { %2787 = vst [vmem:[%s6413_s2 + $0x790] sm:$0xff] %v2786_v50  ;;  %v2792_v53 = vld [vmem:[%s6412_s0 + $0x7a8] sm:$0xff]  ;;  %2789 = vst [vmem:[%s6413_s2 + $0x798] sm:$0xff] %v2788_v51  ;;  %v2794_v54 = vld [vmem:[%s6412_s0 + $0x7b0] sm:$0xff] }
  0x7c   :  { %2791 = vst [vmem:[%s6413_s2 + $0x7a0] sm:$0xff] %v2790_v52  ;;  %2793 = vst [vmem:[%s6413_s2 + $0x7a8] sm:$0xff] %v2792_v53  ;;  %v2796_v55 = vld [vmem:[%s6412_s0 + $0x7b8] sm:$0xff]  ;;  %v2798_v56 = vld [vmem:[%s6412_s0 + $0x7c0] sm:$0xff] }
  0x7d   :  { %2795 = vst [vmem:[%s6413_s2 + $0x7b0] sm:$0xff] %v2794_v54  ;;  %2797 = vst [vmem:[%s6413_s2 + $0x7b8] sm:$0xff] %v2796_v55  ;;  %v2800_v57 = vld [vmem:[%s6412_s0 + $0x7c8] sm:$0xff]  ;;  %v2802_v58 = vld [vmem:[%s6412_s0 + $0x7d0] sm:$0xff] }
  0x7e   :  { %2799 = vst [vmem:[%s6413_s2 + $0x7c0] sm:$0xff] %v2798_v56  ;;  %v2804_v59 = vld [vmem:[%s6412_s0 + $0x7d8] sm:$0xff]  ;;  %2801 = vst [vmem:[%s6413_s2 + $0x7c8] sm:$0xff] %v2800_v57  ;;  %v2806_v60 = vld [vmem:[%s6412_s0 + $0x7e0] sm:$0xff] }
  0x7f   :  { %2803 = vst [vmem:[%s6413_s2 + $0x7d0] sm:$0xff] %v2802_v58  ;;  %2805 = vst [vmem:[%s6413_s2 + $0x7d8] sm:$0xff] %v2804_v59  ;;  %v2808_v61 = vld [vmem:[%s6412_s0 + $0x7e8] sm:$0xff]  ;;  %v2810_v62 = vld [vmem:[%s6412_s0 + $0x7f0] sm:$0xff] }
  0x80   :  { %2807 = vst [vmem:[%s6413_s2 + $0x7e0] sm:$0xff] %v2806_v60  ;;  %2809 = vst [vmem:[%s6413_s2 + $0x7e8] sm:$0xff] %v2808_v61  ;;  %v2812_v63 = vld [vmem:[%s6412_s0 + $0x7f8] sm:$0xff]  ;;  %v1027_v0 = vld [vmem:[%s6414_s1] sm:$0xff] }
  0x81   :  { %2811 = vst [vmem:[%s6413_s2 + $0x7f0] sm:$0xff] %v2810_v62  ;;  %v2815_v1 = vld [vmem:[%s6414_s1 + $0x8] sm:$0xff]  ;;  %2813 = vst [vmem:[%s6413_s2 + $0x7f8] sm:$0xff] %v2812_v63  ;;  %v2817_v2 = vld [vmem:[%s6414_s1 + $0x10] sm:$0xff] }
  0x82   :  { %2814 = vst [vmem:[%s6413_s2 + $0x800] sm:$0xff] %v1027_v0  ;;  %2816 = vst [vmem:[%s6413_s2 + $0x808] sm:$0xff] %v2815_v1  ;;  %v2819_v3 = vld [vmem:[%s6414_s1 + $0x18] sm:$0xff]  ;;  %v2821_v4 = vld [vmem:[%s6414_s1 + $0x20] sm:$0xff] }
  0x83   :  { %2818 = vst [vmem:[%s6413_s2 + $0x810] sm:$0xff] %v2817_v2  ;;  %2820 = vst [vmem:[%s6413_s2 + $0x818] sm:$0xff] %v2819_v3  ;;  %v2823_v5 = vld [vmem:[%s6414_s1 + $0x28] sm:$0xff]  ;;  %v2825_v6 = vld [vmem:[%s6414_s1 + $0x30] sm:$0xff] }
  0x84   :  { %2822 = vst [vmem:[%s6413_s2 + $0x820] sm:$0xff] %v2821_v4  ;;  %v2827_v7 = vld [vmem:[%s6414_s1 + $0x38] sm:$0xff]  ;;  %2824 = vst [vmem:[%s6413_s2 + $0x828] sm:$0xff] %v2823_v5  ;;  %v2829_v8 = vld [vmem:[%s6414_s1 + $0x40] sm:$0xff] }
  0x85   :  { %2826 = vst [vmem:[%s6413_s2 + $0x830] sm:$0xff] %v2825_v6  ;;  %2828 = vst [vmem:[%s6413_s2 + $0x838] sm:$0xff] %v2827_v7  ;;  %v2831_v9 = vld [vmem:[%s6414_s1 + $0x48] sm:$0xff]  ;;  %v2833_v10 = vld [vmem:[%s6414_s1 + $0x50] sm:$0xff] }
  0x86   :  { %2830 = vst [vmem:[%s6413_s2 + $0x840] sm:$0xff] %v2829_v8  ;;  %2832 = vst [vmem:[%s6413_s2 + $0x848] sm:$0xff] %v2831_v9  ;;  %v2835_v11 = vld [vmem:[%s6414_s1 + $0x58] sm:$0xff]  ;;  %v2837_v12 = vld [vmem:[%s6414_s1 + $0x60] sm:$0xff] }
  0x87   :  { %2834 = vst [vmem:[%s6413_s2 + $0x850] sm:$0xff] %v2833_v10  ;;  %v2839_v13 = vld [vmem:[%s6414_s1 + $0x68] sm:$0xff]  ;;  %2836 = vst [vmem:[%s6413_s2 + $0x858] sm:$0xff] %v2835_v11  ;;  %v2841_v14 = vld [vmem:[%s6414_s1 + $0x70] sm:$0xff] }
  0x88   :  { %2838 = vst [vmem:[%s6413_s2 + $0x860] sm:$0xff] %v2837_v12  ;;  %2840 = vst [vmem:[%s6413_s2 + $0x868] sm:$0xff] %v2839_v13  ;;  %v2843_v15 = vld [vmem:[%s6414_s1 + $0x78] sm:$0xff]  ;;  %v2845_v16 = vld [vmem:[%s6414_s1 + $0x80] sm:$0xff] }
  0x89   :  { %2842 = vst [vmem:[%s6413_s2 + $0x870] sm:$0xff] %v2841_v14  ;;  %2844 = vst [vmem:[%s6413_s2 + $0x878] sm:$0xff] %v2843_v15  ;;  %v2847_v17 = vld [vmem:[%s6414_s1 + $0x88] sm:$0xff]  ;;  %v2849_v18 = vld [vmem:[%s6414_s1 + $0x90] sm:$0xff] }
  0x8a   :  { %2846 = vst [vmem:[%s6413_s2 + $0x880] sm:$0xff] %v2845_v16  ;;  %v2851_v19 = vld [vmem:[%s6414_s1 + $0x98] sm:$0xff]  ;;  %2848 = vst [vmem:[%s6413_s2 + $0x888] sm:$0xff] %v2847_v17  ;;  %v2853_v20 = vld [vmem:[%s6414_s1 + $0xa0] sm:$0xff] }
  0x8b   :  { %2850 = vst [vmem:[%s6413_s2 + $0x890] sm:$0xff] %v2849_v18  ;;  %2852 = vst [vmem:[%s6413_s2 + $0x898] sm:$0xff] %v2851_v19  ;;  %v2855_v21 = vld [vmem:[%s6414_s1 + $0xa8] sm:$0xff]  ;;  %v2857_v22 = vld [vmem:[%s6414_s1 + $0xb0] sm:$0xff] }
  0x8c   :  { %2854 = vst [vmem:[%s6413_s2 + $0x8a0] sm:$0xff] %v2853_v20  ;;  %2856 = vst [vmem:[%s6413_s2 + $0x8a8] sm:$0xff] %v2855_v21  ;;  %v2859_v23 = vld [vmem:[%s6414_s1 + $0xb8] sm:$0xff]  ;;  %v2861_v24 = vld [vmem:[%s6414_s1 + $0xc0] sm:$0xff] }
  0x8d   :  { %2858 = vst [vmem:[%s6413_s2 + $0x8b0] sm:$0xff] %v2857_v22  ;;  %v2863_v25 = vld [vmem:[%s6414_s1 + $0xc8] sm:$0xff]  ;;  %2860 = vst [vmem:[%s6413_s2 + $0x8b8] sm:$0xff] %v2859_v23  ;;  %v2865_v26 = vld [vmem:[%s6414_s1 + $0xd0] sm:$0xff] }
  0x8e   :  { %2862 = vst [vmem:[%s6413_s2 + $0x8c0] sm:$0xff] %v2861_v24  ;;  %2864 = vst [vmem:[%s6413_s2 + $0x8c8] sm:$0xff] %v2863_v25  ;;  %v2867_v27 = vld [vmem:[%s6414_s1 + $0xd8] sm:$0xff]  ;;  %v2869_v28 = vld [vmem:[%s6414_s1 + $0xe0] sm:$0xff] }
  0x8f   :  { %2866 = vst [vmem:[%s6413_s2 + $0x8d0] sm:$0xff] %v2865_v26  ;;  %2868 = vst [vmem:[%s6413_s2 + $0x8d8] sm:$0xff] %v2867_v27  ;;  %v2871_v29 = vld [vmem:[%s6414_s1 + $0xe8] sm:$0xff]  ;;  %v2873_v30 = vld [vmem:[%s6414_s1 + $0xf0] sm:$0xff] }
  0x90   :  { %2870 = vst [vmem:[%s6413_s2 + $0x8e0] sm:$0xff] %v2869_v28  ;;  %v2875_v31 = vld [vmem:[%s6414_s1 + $0xf8] sm:$0xff]  ;;  %2872 = vst [vmem:[%s6413_s2 + $0x8e8] sm:$0xff] %v2871_v29  ;;  %v2877_v32 = vld [vmem:[%s6414_s1 + $0x100] sm:$0xff] }
  0x91   :  { %2874 = vst [vmem:[%s6413_s2 + $0x8f0] sm:$0xff] %v2873_v30  ;;  %2876 = vst [vmem:[%s6413_s2 + $0x8f8] sm:$0xff] %v2875_v31  ;;  %v2879_v33 = vld [vmem:[%s6414_s1 + $0x108] sm:$0xff]  ;;  %v2881_v34 = vld [vmem:[%s6414_s1 + $0x110] sm:$0xff] }
  0x92   :  { %2878 = vst [vmem:[%s6413_s2 + $0x900] sm:$0xff] %v2877_v32  ;;  %2880 = vst [vmem:[%s6413_s2 + $0x908] sm:$0xff] %v2879_v33  ;;  %v2883_v35 = vld [vmem:[%s6414_s1 + $0x118] sm:$0xff]  ;;  %v2885_v36 = vld [vmem:[%s6414_s1 + $0x120] sm:$0xff] }
  0x93   :  { %2882 = vst [vmem:[%s6413_s2 + $0x910] sm:$0xff] %v2881_v34  ;;  %v2887_v37 = vld [vmem:[%s6414_s1 + $0x128] sm:$0xff]  ;;  %2884 = vst [vmem:[%s6413_s2 + $0x918] sm:$0xff] %v2883_v35  ;;  %v2889_v38 = vld [vmem:[%s6414_s1 + $0x130] sm:$0xff] }
  0x94   :  { %2886 = vst [vmem:[%s6413_s2 + $0x920] sm:$0xff] %v2885_v36  ;;  %2888 = vst [vmem:[%s6413_s2 + $0x928] sm:$0xff] %v2887_v37  ;;  %v2891_v39 = vld [vmem:[%s6414_s1 + $0x138] sm:$0xff]  ;;  %v2893_v40 = vld [vmem:[%s6414_s1 + $0x140] sm:$0xff] }
  0x95   :  { %2890 = vst [vmem:[%s6413_s2 + $0x930] sm:$0xff] %v2889_v38  ;;  %2892 = vst [vmem:[%s6413_s2 + $0x938] sm:$0xff] %v2891_v39  ;;  %v2895_v41 = vld [vmem:[%s6414_s1 + $0x148] sm:$0xff]  ;;  %v2897_v42 = vld [vmem:[%s6414_s1 + $0x150] sm:$0xff] }
  0x96   :  { %2894 = vst [vmem:[%s6413_s2 + $0x940] sm:$0xff] %v2893_v40  ;;  %v2899_v43 = vld [vmem:[%s6414_s1 + $0x158] sm:$0xff]  ;;  %2896 = vst [vmem:[%s6413_s2 + $0x948] sm:$0xff] %v2895_v41  ;;  %v2901_v44 = vld [vmem:[%s6414_s1 + $0x160] sm:$0xff] }
  0x97   :  { %2898 = vst [vmem:[%s6413_s2 + $0x950] sm:$0xff] %v2897_v42  ;;  %2900 = vst [vmem:[%s6413_s2 + $0x958] sm:$0xff] %v2899_v43  ;;  %v2903_v45 = vld [vmem:[%s6414_s1 + $0x168] sm:$0xff]  ;;  %v2905_v46 = vld [vmem:[%s6414_s1 + $0x170] sm:$0xff] }
  0x98   :  { %2902 = vst [vmem:[%s6413_s2 + $0x960] sm:$0xff] %v2901_v44  ;;  %2904 = vst [vmem:[%s6413_s2 + $0x968] sm:$0xff] %v2903_v45  ;;  %v2907_v47 = vld [vmem:[%s6414_s1 + $0x178] sm:$0xff]  ;;  %v2909_v48 = vld [vmem:[%s6414_s1 + $0x180] sm:$0xff] }
  0x99   :  { %2906 = vst [vmem:[%s6413_s2 + $0x970] sm:$0xff] %v2905_v46  ;;  %v2911_v49 = vld [vmem:[%s6414_s1 + $0x188] sm:$0xff]  ;;  %2908 = vst [vmem:[%s6413_s2 + $0x978] sm:$0xff] %v2907_v47  ;;  %v2913_v50 = vld [vmem:[%s6414_s1 + $0x190] sm:$0xff] }
  0x9a   :  { %2910 = vst [vmem:[%s6413_s2 + $0x980] sm:$0xff] %v2909_v48  ;;  %2912 = vst [vmem:[%s6413_s2 + $0x988] sm:$0xff] %v2911_v49  ;;  %v2915_v51 = vld [vmem:[%s6414_s1 + $0x198] sm:$0xff]  ;;  %v2917_v52 = vld [vmem:[%s6414_s1 + $0x1a0] sm:$0xff] }
  0x9b   :  { %2914 = vst [vmem:[%s6413_s2 + $0x990] sm:$0xff] %v2913_v50  ;;  %2916 = vst [vmem:[%s6413_s2 + $0x998] sm:$0xff] %v2915_v51  ;;  %v2919_v53 = vld [vmem:[%s6414_s1 + $0x1a8] sm:$0xff]  ;;  %v2921_v54 = vld [vmem:[%s6414_s1 + $0x1b0] sm:$0xff] }
  0x9c   :  { %2918 = vst [vmem:[%s6413_s2 + $0x9a0] sm:$0xff] %v2917_v52  ;;  %v2923_v55 = vld [vmem:[%s6414_s1 + $0x1b8] sm:$0xff]  ;;  %2920 = vst [vmem:[%s6413_s2 + $0x9a8] sm:$0xff] %v2919_v53  ;;  %v2925_v56 = vld [vmem:[%s6414_s1 + $0x1c0] sm:$0xff] }
  0x9d   :  { %2922 = vst [vmem:[%s6413_s2 + $0x9b0] sm:$0xff] %v2921_v54  ;;  %2924 = vst [vmem:[%s6413_s2 + $0x9b8] sm:$0xff] %v2923_v55  ;;  %v2927_v57 = vld [vmem:[%s6414_s1 + $0x1c8] sm:$0xff]  ;;  %v2929_v58 = vld [vmem:[%s6414_s1 + $0x1d0] sm:$0xff] }
  0x9e   :  { %2926 = vst [vmem:[%s6413_s2 + $0x9c0] sm:$0xff] %v2925_v56  ;;  %2928 = vst [vmem:[%s6413_s2 + $0x9c8] sm:$0xff] %v2927_v57  ;;  %v2931_v59 = vld [vmem:[%s6414_s1 + $0x1d8] sm:$0xff]  ;;  %v2933_v60 = vld [vmem:[%s6414_s1 + $0x1e0] sm:$0xff] }
  0x9f   :  { %2930 = vst [vmem:[%s6413_s2 + $0x9d0] sm:$0xff] %v2929_v58  ;;  %v2935_v61 = vld [vmem:[%s6414_s1 + $0x1e8] sm:$0xff]  ;;  %2932 = vst [vmem:[%s6413_s2 + $0x9d8] sm:$0xff] %v2931_v59  ;;  %v2937_v62 = vld [vmem:[%s6414_s1 + $0x1f0] sm:$0xff] }
  0xa0   :  { %2934 = vst [vmem:[%s6413_s2 + $0x9e0] sm:$0xff] %v2933_v60  ;;  %2936 = vst [vmem:[%s6413_s2 + $0x9e8] sm:$0xff] %v2935_v61  ;;  %v2939_v63 = vld [vmem:[%s6414_s1 + $0x1f8] sm:$0xff]  ;;  %v2941_v0 = vld [vmem:[%s6414_s1 + $0x200] sm:$0xff] }
  0xa1   :  { %2938 = vst [vmem:[%s6413_s2 + $0x9f0] sm:$0xff] %v2937_v62  ;;  %2940 = vst [vmem:[%s6413_s2 + $0x9f8] sm:$0xff] %v2939_v63  ;;  %v2943_v1 = vld [vmem:[%s6414_s1 + $0x208] sm:$0xff]  ;;  %v2945_v2 = vld [vmem:[%s6414_s1 + $0x210] sm:$0xff] }
  0xa2   :  { %2942 = vst [vmem:[%s6413_s2 + $0xa00] sm:$0xff] %v2941_v0  ;;  %v2947_v3 = vld [vmem:[%s6414_s1 + $0x218] sm:$0xff]  ;;  %2944 = vst [vmem:[%s6413_s2 + $0xa08] sm:$0xff] %v2943_v1  ;;  %v2949_v4 = vld [vmem:[%s6414_s1 + $0x220] sm:$0xff] }
  0xa3   :  { %2946 = vst [vmem:[%s6413_s2 + $0xa10] sm:$0xff] %v2945_v2  ;;  %2948 = vst [vmem:[%s6413_s2 + $0xa18] sm:$0xff] %v2947_v3  ;;  %v2951_v5 = vld [vmem:[%s6414_s1 + $0x228] sm:$0xff]  ;;  %v2953_v6 = vld [vmem:[%s6414_s1 + $0x230] sm:$0xff] }
  0xa4   :  { %2950 = vst [vmem:[%s6413_s2 + $0xa20] sm:$0xff] %v2949_v4  ;;  %2952 = vst [vmem:[%s6413_s2 + $0xa28] sm:$0xff] %v2951_v5  ;;  %v2955_v7 = vld [vmem:[%s6414_s1 + $0x238] sm:$0xff]  ;;  %v2957_v8 = vld [vmem:[%s6414_s1 + $0x240] sm:$0xff] }
  0xa5   :  { %2954 = vst [vmem:[%s6413_s2 + $0xa30] sm:$0xff] %v2953_v6  ;;  %v2959_v9 = vld [vmem:[%s6414_s1 + $0x248] sm:$0xff]  ;;  %2956 = vst [vmem:[%s6413_s2 + $0xa38] sm:$0xff] %v2955_v7  ;;  %v2961_v10 = vld [vmem:[%s6414_s1 + $0x250] sm:$0xff] }
  0xa6   :  { %2958 = vst [vmem:[%s6413_s2 + $0xa40] sm:$0xff] %v2957_v8  ;;  %2960 = vst [vmem:[%s6413_s2 + $0xa48] sm:$0xff] %v2959_v9  ;;  %v2963_v11 = vld [vmem:[%s6414_s1 + $0x258] sm:$0xff]  ;;  %v2965_v12 = vld [vmem:[%s6414_s1 + $0x260] sm:$0xff] }
  0xa7   :  { %2962 = vst [vmem:[%s6413_s2 + $0xa50] sm:$0xff] %v2961_v10  ;;  %2964 = vst [vmem:[%s6413_s2 + $0xa58] sm:$0xff] %v2963_v11  ;;  %v2967_v13 = vld [vmem:[%s6414_s1 + $0x268] sm:$0xff]  ;;  %v2969_v14 = vld [vmem:[%s6414_s1 + $0x270] sm:$0xff] }
  0xa8   :  { %2966 = vst [vmem:[%s6413_s2 + $0xa60] sm:$0xff] %v2965_v12  ;;  %v2971_v15 = vld [vmem:[%s6414_s1 + $0x278] sm:$0xff]  ;;  %2968 = vst [vmem:[%s6413_s2 + $0xa68] sm:$0xff] %v2967_v13  ;;  %v2973_v16 = vld [vmem:[%s6414_s1 + $0x280] sm:$0xff] }
  0xa9   :  { %2970 = vst [vmem:[%s6413_s2 + $0xa70] sm:$0xff] %v2969_v14  ;;  %2972 = vst [vmem:[%s6413_s2 + $0xa78] sm:$0xff] %v2971_v15  ;;  %v2975_v17 = vld [vmem:[%s6414_s1 + $0x288] sm:$0xff]  ;;  %v2977_v18 = vld [vmem:[%s6414_s1 + $0x290] sm:$0xff] }
  0xaa   :  { %2974 = vst [vmem:[%s6413_s2 + $0xa80] sm:$0xff] %v2973_v16  ;;  %2976 = vst [vmem:[%s6413_s2 + $0xa88] sm:$0xff] %v2975_v17  ;;  %v2979_v19 = vld [vmem:[%s6414_s1 + $0x298] sm:$0xff]  ;;  %v2981_v20 = vld [vmem:[%s6414_s1 + $0x2a0] sm:$0xff] }
  0xab   :  { %2978 = vst [vmem:[%s6413_s2 + $0xa90] sm:$0xff] %v2977_v18  ;;  %v2983_v21 = vld [vmem:[%s6414_s1 + $0x2a8] sm:$0xff]  ;;  %2980 = vst [vmem:[%s6413_s2 + $0xa98] sm:$0xff] %v2979_v19  ;;  %v2985_v22 = vld [vmem:[%s6414_s1 + $0x2b0] sm:$0xff] }
  0xac   :  { %2982 = vst [vmem:[%s6413_s2 + $0xaa0] sm:$0xff] %v2981_v20  ;;  %2984 = vst [vmem:[%s6413_s2 + $0xaa8] sm:$0xff] %v2983_v21  ;;  %v2987_v23 = vld [vmem:[%s6414_s1 + $0x2b8] sm:$0xff]  ;;  %v2989_v24 = vld [vmem:[%s6414_s1 + $0x2c0] sm:$0xff] }
  0xad   :  { %2986 = vst [vmem:[%s6413_s2 + $0xab0] sm:$0xff] %v2985_v22  ;;  %2988 = vst [vmem:[%s6413_s2 + $0xab8] sm:$0xff] %v2987_v23  ;;  %v2991_v25 = vld [vmem:[%s6414_s1 + $0x2c8] sm:$0xff]  ;;  %v2993_v26 = vld [vmem:[%s6414_s1 + $0x2d0] sm:$0xff] }
  0xae   :  { %2990 = vst [vmem:[%s6413_s2 + $0xac0] sm:$0xff] %v2989_v24  ;;  %v2995_v27 = vld [vmem:[%s6414_s1 + $0x2d8] sm:$0xff]  ;;  %2992 = vst [vmem:[%s6413_s2 + $0xac8] sm:$0xff] %v2991_v25  ;;  %v2997_v28 = vld [vmem:[%s6414_s1 + $0x2e0] sm:$0xff] }
  0xaf   :  { %2994 = vst [vmem:[%s6413_s2 + $0xad0] sm:$0xff] %v2993_v26  ;;  %2996 = vst [vmem:[%s6413_s2 + $0xad8] sm:$0xff] %v2995_v27  ;;  %v2999_v29 = vld [vmem:[%s6414_s1 + $0x2e8] sm:$0xff]  ;;  %v3001_v30 = vld [vmem:[%s6414_s1 + $0x2f0] sm:$0xff] }
  0xb0   :  { %2998 = vst [vmem:[%s6413_s2 + $0xae0] sm:$0xff] %v2997_v28  ;;  %3000 = vst [vmem:[%s6413_s2 + $0xae8] sm:$0xff] %v2999_v29  ;;  %v3003_v31 = vld [vmem:[%s6414_s1 + $0x2f8] sm:$0xff]  ;;  %v3005_v32 = vld [vmem:[%s6414_s1 + $0x300] sm:$0xff] }
  0xb1   :  { %3002 = vst [vmem:[%s6413_s2 + $0xaf0] sm:$0xff] %v3001_v30  ;;  %v3007_v33 = vld [vmem:[%s6414_s1 + $0x308] sm:$0xff]  ;;  %3004 = vst [vmem:[%s6413_s2 + $0xaf8] sm:$0xff] %v3003_v31  ;;  %v3009_v34 = vld [vmem:[%s6414_s1 + $0x310] sm:$0xff] }
  0xb2   :  { %3006 = vst [vmem:[%s6413_s2 + $0xb00] sm:$0xff] %v3005_v32  ;;  %3008 = vst [vmem:[%s6413_s2 + $0xb08] sm:$0xff] %v3007_v33  ;;  %v3011_v35 = vld [vmem:[%s6414_s1 + $0x318] sm:$0xff]  ;;  %v3013_v36 = vld [vmem:[%s6414_s1 + $0x320] sm:$0xff] }
  0xb3   :  { %3010 = vst [vmem:[%s6413_s2 + $0xb10] sm:$0xff] %v3009_v34  ;;  %3012 = vst [vmem:[%s6413_s2 + $0xb18] sm:$0xff] %v3011_v35  ;;  %v3015_v37 = vld [vmem:[%s6414_s1 + $0x328] sm:$0xff]  ;;  %v3017_v38 = vld [vmem:[%s6414_s1 + $0x330] sm:$0xff] }
  0xb4   :  { %3014 = vst [vmem:[%s6413_s2 + $0xb20] sm:$0xff] %v3013_v36  ;;  %v3019_v39 = vld [vmem:[%s6414_s1 + $0x338] sm:$0xff]  ;;  %3016 = vst [vmem:[%s6413_s2 + $0xb28] sm:$0xff] %v3015_v37  ;;  %v3021_v40 = vld [vmem:[%s6414_s1 + $0x340] sm:$0xff] }
  0xb5   :  { %3018 = vst [vmem:[%s6413_s2 + $0xb30] sm:$0xff] %v3017_v38  ;;  %3020 = vst [vmem:[%s6413_s2 + $0xb38] sm:$0xff] %v3019_v39  ;;  %v3023_v41 = vld [vmem:[%s6414_s1 + $0x348] sm:$0xff]  ;;  %v3025_v42 = vld [vmem:[%s6414_s1 + $0x350] sm:$0xff] }
  0xb6   :  { %3022 = vst [vmem:[%s6413_s2 + $0xb40] sm:$0xff] %v3021_v40  ;;  %3024 = vst [vmem:[%s6413_s2 + $0xb48] sm:$0xff] %v3023_v41  ;;  %v3027_v43 = vld [vmem:[%s6414_s1 + $0x358] sm:$0xff]  ;;  %v3029_v44 = vld [vmem:[%s6414_s1 + $0x360] sm:$0xff] }
  0xb7   :  { %3026 = vst [vmem:[%s6413_s2 + $0xb50] sm:$0xff] %v3025_v42  ;;  %v3031_v45 = vld [vmem:[%s6414_s1 + $0x368] sm:$0xff]  ;;  %3028 = vst [vmem:[%s6413_s2 + $0xb58] sm:$0xff] %v3027_v43  ;;  %v3033_v46 = vld [vmem:[%s6414_s1 + $0x370] sm:$0xff] }
  0xb8   :  { %3030 = vst [vmem:[%s6413_s2 + $0xb60] sm:$0xff] %v3029_v44  ;;  %3032 = vst [vmem:[%s6413_s2 + $0xb68] sm:$0xff] %v3031_v45  ;;  %v3035_v47 = vld [vmem:[%s6414_s1 + $0x378] sm:$0xff]  ;;  %v3037_v48 = vld [vmem:[%s6414_s1 + $0x380] sm:$0xff] }
  0xb9   :  { %3034 = vst [vmem:[%s6413_s2 + $0xb70] sm:$0xff] %v3033_v46  ;;  %3036 = vst [vmem:[%s6413_s2 + $0xb78] sm:$0xff] %v3035_v47  ;;  %v3039_v49 = vld [vmem:[%s6414_s1 + $0x388] sm:$0xff]  ;;  %v3041_v50 = vld [vmem:[%s6414_s1 + $0x390] sm:$0xff] }
  0xba   :  { %3038 = vst [vmem:[%s6413_s2 + $0xb80] sm:$0xff] %v3037_v48  ;;  %v3043_v51 = vld [vmem:[%s6414_s1 + $0x398] sm:$0xff]  ;;  %3040 = vst [vmem:[%s6413_s2 + $0xb88] sm:$0xff] %v3039_v49  ;;  %v3045_v52 = vld [vmem:[%s6414_s1 + $0x3a0] sm:$0xff] }
  0xbb   :  { %3042 = vst [vmem:[%s6413_s2 + $0xb90] sm:$0xff] %v3041_v50  ;;  %3044 = vst [vmem:[%s6413_s2 + $0xb98] sm:$0xff] %v3043_v51  ;;  %v3047_v53 = vld [vmem:[%s6414_s1 + $0x3a8] sm:$0xff]  ;;  %v3049_v54 = vld [vmem:[%s6414_s1 + $0x3b0] sm:$0xff] }
  0xbc   :  { %3046 = vst [vmem:[%s6413_s2 + $0xba0] sm:$0xff] %v3045_v52  ;;  %3048 = vst [vmem:[%s6413_s2 + $0xba8] sm:$0xff] %v3047_v53  ;;  %v3051_v55 = vld [vmem:[%s6414_s1 + $0x3b8] sm:$0xff]  ;;  %v3053_v56 = vld [vmem:[%s6414_s1 + $0x3c0] sm:$0xff] }
  0xbd   :  { %3050 = vst [vmem:[%s6413_s2 + $0xbb0] sm:$0xff] %v3049_v54  ;;  %v3055_v57 = vld [vmem:[%s6414_s1 + $0x3c8] sm:$0xff]  ;;  %3052 = vst [vmem:[%s6413_s2 + $0xbb8] sm:$0xff] %v3051_v55  ;;  %v3057_v58 = vld [vmem:[%s6414_s1 + $0x3d0] sm:$0xff] }
  0xbe   :  { %3054 = vst [vmem:[%s6413_s2 + $0xbc0] sm:$0xff] %v3053_v56  ;;  %3056 = vst [vmem:[%s6413_s2 + $0xbc8] sm:$0xff] %v3055_v57  ;;  %v3059_v59 = vld [vmem:[%s6414_s1 + $0x3d8] sm:$0xff]  ;;  %v3061_v60 = vld [vmem:[%s6414_s1 + $0x3e0] sm:$0xff] }
  0xbf   :  { %3058 = vst [vmem:[%s6413_s2 + $0xbd0] sm:$0xff] %v3057_v58  ;;  %3060 = vst [vmem:[%s6413_s2 + $0xbd8] sm:$0xff] %v3059_v59  ;;  %v3063_v61 = vld [vmem:[%s6414_s1 + $0x3e8] sm:$0xff]  ;;  %v3065_v62 = vld [vmem:[%s6414_s1 + $0x3f0] sm:$0xff] }
  0xc0   :  { %3062 = vst [vmem:[%s6413_s2 + $0xbe0] sm:$0xff] %v3061_v60  ;;  %v3067_v63 = vld [vmem:[%s6414_s1 + $0x3f8] sm:$0xff]  ;;  %3064 = vst [vmem:[%s6413_s2 + $0xbe8] sm:$0xff] %v3063_v61  ;;  %v3069_v0 = vld [vmem:[%s6414_s1 + $0x400] sm:$0xff] }
  0xc1   :  { %3066 = vst [vmem:[%s6413_s2 + $0xbf0] sm:$0xff] %v3065_v62  ;;  %3068 = vst [vmem:[%s6413_s2 + $0xbf8] sm:$0xff] %v3067_v63  ;;  %v3071_v1 = vld [vmem:[%s6414_s1 + $0x408] sm:$0xff]  ;;  %v3073_v2 = vld [vmem:[%s6414_s1 + $0x410] sm:$0xff] }
  0xc2   :  { %3070 = vst [vmem:[%s6413_s2 + $0xc00] sm:$0xff] %v3069_v0  ;;  %3072 = vst [vmem:[%s6413_s2 + $0xc08] sm:$0xff] %v3071_v1  ;;  %v3075_v3 = vld [vmem:[%s6414_s1 + $0x418] sm:$0xff]  ;;  %v3077_v4 = vld [vmem:[%s6414_s1 + $0x420] sm:$0xff] }
  0xc3   :  { %3074 = vst [vmem:[%s6413_s2 + $0xc10] sm:$0xff] %v3073_v2  ;;  %v3079_v5 = vld [vmem:[%s6414_s1 + $0x428] sm:$0xff]  ;;  %3076 = vst [vmem:[%s6413_s2 + $0xc18] sm:$0xff] %v3075_v3  ;;  %v3081_v6 = vld [vmem:[%s6414_s1 + $0x430] sm:$0xff] }
  0xc4   :  { %3078 = vst [vmem:[%s6413_s2 + $0xc20] sm:$0xff] %v3077_v4  ;;  %3080 = vst [vmem:[%s6413_s2 + $0xc28] sm:$0xff] %v3079_v5  ;;  %v3083_v7 = vld [vmem:[%s6414_s1 + $0x438] sm:$0xff]  ;;  %v3085_v8 = vld [vmem:[%s6414_s1 + $0x440] sm:$0xff] }
  0xc5   :  { %3082 = vst [vmem:[%s6413_s2 + $0xc30] sm:$0xff] %v3081_v6  ;;  %3084 = vst [vmem:[%s6413_s2 + $0xc38] sm:$0xff] %v3083_v7  ;;  %v3087_v9 = vld [vmem:[%s6414_s1 + $0x448] sm:$0xff]  ;;  %v3089_v10 = vld [vmem:[%s6414_s1 + $0x450] sm:$0xff] }
  0xc6   :  { %3086 = vst [vmem:[%s6413_s2 + $0xc40] sm:$0xff] %v3085_v8  ;;  %v3091_v11 = vld [vmem:[%s6414_s1 + $0x458] sm:$0xff]  ;;  %3088 = vst [vmem:[%s6413_s2 + $0xc48] sm:$0xff] %v3087_v9  ;;  %v3093_v12 = vld [vmem:[%s6414_s1 + $0x460] sm:$0xff] }
  0xc7   :  { %3090 = vst [vmem:[%s6413_s2 + $0xc50] sm:$0xff] %v3089_v10  ;;  %3092 = vst [vmem:[%s6413_s2 + $0xc58] sm:$0xff] %v3091_v11  ;;  %v3095_v13 = vld [vmem:[%s6414_s1 + $0x468] sm:$0xff]  ;;  %v3097_v14 = vld [vmem:[%s6414_s1 + $0x470] sm:$0xff] }
  0xc8   :  { %3094 = vst [vmem:[%s6413_s2 + $0xc60] sm:$0xff] %v3093_v12  ;;  %3096 = vst [vmem:[%s6413_s2 + $0xc68] sm:$0xff] %v3095_v13  ;;  %v3099_v15 = vld [vmem:[%s6414_s1 + $0x478] sm:$0xff]  ;;  %v3101_v16 = vld [vmem:[%s6414_s1 + $0x480] sm:$0xff] }
  0xc9   :  { %3098 = vst [vmem:[%s6413_s2 + $0xc70] sm:$0xff] %v3097_v14  ;;  %v3103_v17 = vld [vmem:[%s6414_s1 + $0x488] sm:$0xff]  ;;  %3100 = vst [vmem:[%s6413_s2 + $0xc78] sm:$0xff] %v3099_v15  ;;  %v3105_v18 = vld [vmem:[%s6414_s1 + $0x490] sm:$0xff] }
  0xca   :  { %3102 = vst [vmem:[%s6413_s2 + $0xc80] sm:$0xff] %v3101_v16  ;;  %3104 = vst [vmem:[%s6413_s2 + $0xc88] sm:$0xff] %v3103_v17  ;;  %v3107_v19 = vld [vmem:[%s6414_s1 + $0x498] sm:$0xff]  ;;  %v3109_v20 = vld [vmem:[%s6414_s1 + $0x4a0] sm:$0xff] }
  0xcb   :  { %3106 = vst [vmem:[%s6413_s2 + $0xc90] sm:$0xff] %v3105_v18  ;;  %3108 = vst [vmem:[%s6413_s2 + $0xc98] sm:$0xff] %v3107_v19  ;;  %v3111_v21 = vld [vmem:[%s6414_s1 + $0x4a8] sm:$0xff]  ;;  %v3113_v22 = vld [vmem:[%s6414_s1 + $0x4b0] sm:$0xff] }
  0xcc   :  { %3110 = vst [vmem:[%s6413_s2 + $0xca0] sm:$0xff] %v3109_v20  ;;  %v3115_v23 = vld [vmem:[%s6414_s1 + $0x4b8] sm:$0xff]  ;;  %3112 = vst [vmem:[%s6413_s2 + $0xca8] sm:$0xff] %v3111_v21  ;;  %v3117_v24 = vld [vmem:[%s6414_s1 + $0x4c0] sm:$0xff] }
  0xcd   :  { %3114 = vst [vmem:[%s6413_s2 + $0xcb0] sm:$0xff] %v3113_v22  ;;  %3116 = vst [vmem:[%s6413_s2 + $0xcb8] sm:$0xff] %v3115_v23  ;;  %v3119_v25 = vld [vmem:[%s6414_s1 + $0x4c8] sm:$0xff]  ;;  %v3121_v26 = vld [vmem:[%s6414_s1 + $0x4d0] sm:$0xff] }
  0xce   :  { %3118 = vst [vmem:[%s6413_s2 + $0xcc0] sm:$0xff] %v3117_v24  ;;  %3120 = vst [vmem:[%s6413_s2 + $0xcc8] sm:$0xff] %v3119_v25  ;;  %v3123_v27 = vld [vmem:[%s6414_s1 + $0x4d8] sm:$0xff]  ;;  %v3125_v28 = vld [vmem:[%s6414_s1 + $0x4e0] sm:$0xff] }
  0xcf   :  { %3122 = vst [vmem:[%s6413_s2 + $0xcd0] sm:$0xff] %v3121_v26  ;;  %v3127_v29 = vld [vmem:[%s6414_s1 + $0x4e8] sm:$0xff]  ;;  %3124 = vst [vmem:[%s6413_s2 + $0xcd8] sm:$0xff] %v3123_v27  ;;  %v3129_v30 = vld [vmem:[%s6414_s1 + $0x4f0] sm:$0xff] }
  0xd0   :  { %3126 = vst [vmem:[%s6413_s2 + $0xce0] sm:$0xff] %v3125_v28  ;;  %3128 = vst [vmem:[%s6413_s2 + $0xce8] sm:$0xff] %v3127_v29  ;;  %v3131_v31 = vld [vmem:[%s6414_s1 + $0x4f8] sm:$0xff]  ;;  %v3133_v32 = vld [vmem:[%s6414_s1 + $0x500] sm:$0xff] }
  0xd1   :  { %3130 = vst [vmem:[%s6413_s2 + $0xcf0] sm:$0xff] %v3129_v30  ;;  %3132 = vst [vmem:[%s6413_s2 + $0xcf8] sm:$0xff] %v3131_v31  ;;  %v3135_v33 = vld [vmem:[%s6414_s1 + $0x508] sm:$0xff]  ;;  %v3137_v34 = vld [vmem:[%s6414_s1 + $0x510] sm:$0xff] }
  0xd2   :  { %3134 = vst [vmem:[%s6413_s2 + $0xd00] sm:$0xff] %v3133_v32  ;;  %v3139_v35 = vld [vmem:[%s6414_s1 + $0x518] sm:$0xff]  ;;  %3136 = vst [vmem:[%s6413_s2 + $0xd08] sm:$0xff] %v3135_v33  ;;  %v3141_v36 = vld [vmem:[%s6414_s1 + $0x520] sm:$0xff] }
  0xd3   :  { %3138 = vst [vmem:[%s6413_s2 + $0xd10] sm:$0xff] %v3137_v34  ;;  %3140 = vst [vmem:[%s6413_s2 + $0xd18] sm:$0xff] %v3139_v35  ;;  %v3143_v37 = vld [vmem:[%s6414_s1 + $0x528] sm:$0xff]  ;;  %v3145_v38 = vld [vmem:[%s6414_s1 + $0x530] sm:$0xff] }
  0xd4   :  { %3142 = vst [vmem:[%s6413_s2 + $0xd20] sm:$0xff] %v3141_v36  ;;  %3144 = vst [vmem:[%s6413_s2 + $0xd28] sm:$0xff] %v3143_v37  ;;  %v3147_v39 = vld [vmem:[%s6414_s1 + $0x538] sm:$0xff]  ;;  %v3149_v40 = vld [vmem:[%s6414_s1 + $0x540] sm:$0xff] }
  0xd5   :  { %3146 = vst [vmem:[%s6413_s2 + $0xd30] sm:$0xff] %v3145_v38  ;;  %v3151_v41 = vld [vmem:[%s6414_s1 + $0x548] sm:$0xff]  ;;  %3148 = vst [vmem:[%s6413_s2 + $0xd38] sm:$0xff] %v3147_v39  ;;  %v3153_v42 = vld [vmem:[%s6414_s1 + $0x550] sm:$0xff] }
  0xd6   :  { %3150 = vst [vmem:[%s6413_s2 + $0xd40] sm:$0xff] %v3149_v40  ;;  %3152 = vst [vmem:[%s6413_s2 + $0xd48] sm:$0xff] %v3151_v41  ;;  %v3155_v43 = vld [vmem:[%s6414_s1 + $0x558] sm:$0xff]  ;;  %v3157_v44 = vld [vmem:[%s6414_s1 + $0x560] sm:$0xff] }
  0xd7   :  { %3154 = vst [vmem:[%s6413_s2 + $0xd50] sm:$0xff] %v3153_v42  ;;  %3156 = vst [vmem:[%s6413_s2 + $0xd58] sm:$0xff] %v3155_v43  ;;  %v3159_v45 = vld [vmem:[%s6414_s1 + $0x568] sm:$0xff]  ;;  %v3161_v46 = vld [vmem:[%s6414_s1 + $0x570] sm:$0xff] }
  0xd8   :  { %3158 = vst [vmem:[%s6413_s2 + $0xd60] sm:$0xff] %v3157_v44  ;;  %v3163_v47 = vld [vmem:[%s6414_s1 + $0x578] sm:$0xff]  ;;  %3160 = vst [vmem:[%s6413_s2 + $0xd68] sm:$0xff] %v3159_v45  ;;  %v3165_v48 = vld [vmem:[%s6414_s1 + $0x580] sm:$0xff] }
  0xd9   :  { %3162 = vst [vmem:[%s6413_s2 + $0xd70] sm:$0xff] %v3161_v46  ;;  %3164 = vst [vmem:[%s6413_s2 + $0xd78] sm:$0xff] %v3163_v47  ;;  %v3167_v49 = vld [vmem:[%s6414_s1 + $0x588] sm:$0xff]  ;;  %v3169_v50 = vld [vmem:[%s6414_s1 + $0x590] sm:$0xff] }
  0xda   :  { %3166 = vst [vmem:[%s6413_s2 + $0xd80] sm:$0xff] %v3165_v48  ;;  %3168 = vst [vmem:[%s6413_s2 + $0xd88] sm:$0xff] %v3167_v49  ;;  %v3171_v51 = vld [vmem:[%s6414_s1 + $0x598] sm:$0xff]  ;;  %v3173_v52 = vld [vmem:[%s6414_s1 + $0x5a0] sm:$0xff] }
  0xdb   :  { %3170 = vst [vmem:[%s6413_s2 + $0xd90] sm:$0xff] %v3169_v50  ;;  %v3175_v53 = vld [vmem:[%s6414_s1 + $0x5a8] sm:$0xff]  ;;  %3172 = vst [vmem:[%s6413_s2 + $0xd98] sm:$0xff] %v3171_v51  ;;  %v3177_v54 = vld [vmem:[%s6414_s1 + $0x5b0] sm:$0xff] }
  0xdc   :  { %3174 = vst [vmem:[%s6413_s2 + $0xda0] sm:$0xff] %v3173_v52  ;;  %3176 = vst [vmem:[%s6413_s2 + $0xda8] sm:$0xff] %v3175_v53  ;;  %v3179_v55 = vld [vmem:[%s6414_s1 + $0x5b8] sm:$0xff]  ;;  %v3181_v56 = vld [vmem:[%s6414_s1 + $0x5c0] sm:$0xff] }
  0xdd   :  { %3178 = vst [vmem:[%s6413_s2 + $0xdb0] sm:$0xff] %v3177_v54  ;;  %3180 = vst [vmem:[%s6413_s2 + $0xdb8] sm:$0xff] %v3179_v55  ;;  %v3183_v57 = vld [vmem:[%s6414_s1 + $0x5c8] sm:$0xff]  ;;  %v3185_v58 = vld [vmem:[%s6414_s1 + $0x5d0] sm:$0xff] }
  0xde   :  { %3182 = vst [vmem:[%s6413_s2 + $0xdc0] sm:$0xff] %v3181_v56  ;;  %v3187_v59 = vld [vmem:[%s6414_s1 + $0x5d8] sm:$0xff]  ;;  %3184 = vst [vmem:[%s6413_s2 + $0xdc8] sm:$0xff] %v3183_v57  ;;  %v3189_v60 = vld [vmem:[%s6414_s1 + $0x5e0] sm:$0xff] }
  0xdf   :  { %3186 = vst [vmem:[%s6413_s2 + $0xdd0] sm:$0xff] %v3185_v58  ;;  %3188 = vst [vmem:[%s6413_s2 + $0xdd8] sm:$0xff] %v3187_v59  ;;  %v3191_v61 = vld [vmem:[%s6414_s1 + $0x5e8] sm:$0xff]  ;;  %v3193_v62 = vld [vmem:[%s6414_s1 + $0x5f0] sm:$0xff] }
  0xe0   :  { %3190 = vst [vmem:[%s6413_s2 + $0xde0] sm:$0xff] %v3189_v60  ;;  %3192 = vst [vmem:[%s6413_s2 + $0xde8] sm:$0xff] %v3191_v61  ;;  %v3195_v63 = vld [vmem:[%s6414_s1 + $0x5f8] sm:$0xff]  ;;  %v3197_v0 = vld [vmem:[%s6414_s1 + $0x600] sm:$0xff] }
  0xe1   :  { %3194 = vst [vmem:[%s6413_s2 + $0xdf0] sm:$0xff] %v3193_v62  ;;  %v3199_v1 = vld [vmem:[%s6414_s1 + $0x608] sm:$0xff]  ;;  %3196 = vst [vmem:[%s6413_s2 + $0xdf8] sm:$0xff] %v3195_v63  ;;  %v3201_v2 = vld [vmem:[%s6414_s1 + $0x610] sm:$0xff] }
  0xe2   :  { %3198 = vst [vmem:[%s6413_s2 + $0xe00] sm:$0xff] %v3197_v0  ;;  %3200 = vst [vmem:[%s6413_s2 + $0xe08] sm:$0xff] %v3199_v1  ;;  %v3203_v3 = vld [vmem:[%s6414_s1 + $0x618] sm:$0xff]  ;;  %v3205_v4 = vld [vmem:[%s6414_s1 + $0x620] sm:$0xff] }
  0xe3   :  { %3202 = vst [vmem:[%s6413_s2 + $0xe10] sm:$0xff] %v3201_v2  ;;  %3204 = vst [vmem:[%s6413_s2 + $0xe18] sm:$0xff] %v3203_v3  ;;  %v3207_v5 = vld [vmem:[%s6414_s1 + $0x628] sm:$0xff]  ;;  %v3209_v6 = vld [vmem:[%s6414_s1 + $0x630] sm:$0xff] }
  0xe4   :  { %3206 = vst [vmem:[%s6413_s2 + $0xe20] sm:$0xff] %v3205_v4  ;;  %v3211_v7 = vld [vmem:[%s6414_s1 + $0x638] sm:$0xff]  ;;  %3208 = vst [vmem:[%s6413_s2 + $0xe28] sm:$0xff] %v3207_v5  ;;  %v3213_v8 = vld [vmem:[%s6414_s1 + $0x640] sm:$0xff] }
  0xe5   :  { %3210 = vst [vmem:[%s6413_s2 + $0xe30] sm:$0xff] %v3209_v6  ;;  %3212 = vst [vmem:[%s6413_s2 + $0xe38] sm:$0xff] %v3211_v7  ;;  %v3215_v9 = vld [vmem:[%s6414_s1 + $0x648] sm:$0xff]  ;;  %v3217_v10 = vld [vmem:[%s6414_s1 + $0x650] sm:$0xff] }
  0xe6   :  { %3214 = vst [vmem:[%s6413_s2 + $0xe40] sm:$0xff] %v3213_v8  ;;  %3216 = vst [vmem:[%s6413_s2 + $0xe48] sm:$0xff] %v3215_v9  ;;  %v3219_v11 = vld [vmem:[%s6414_s1 + $0x658] sm:$0xff]  ;;  %v3221_v12 = vld [vmem:[%s6414_s1 + $0x660] sm:$0xff] }
  0xe7   :  { %3218 = vst [vmem:[%s6413_s2 + $0xe50] sm:$0xff] %v3217_v10  ;;  %v3223_v13 = vld [vmem:[%s6414_s1 + $0x668] sm:$0xff]  ;;  %3220 = vst [vmem:[%s6413_s2 + $0xe58] sm:$0xff] %v3219_v11  ;;  %v3225_v14 = vld [vmem:[%s6414_s1 + $0x670] sm:$0xff] }
  0xe8   :  { %3222 = vst [vmem:[%s6413_s2 + $0xe60] sm:$0xff] %v3221_v12  ;;  %3224 = vst [vmem:[%s6413_s2 + $0xe68] sm:$0xff] %v3223_v13  ;;  %v3227_v15 = vld [vmem:[%s6414_s1 + $0x678] sm:$0xff]  ;;  %v3229_v16 = vld [vmem:[%s6414_s1 + $0x680] sm:$0xff] }
  0xe9   :  { %3226 = vst [vmem:[%s6413_s2 + $0xe70] sm:$0xff] %v3225_v14  ;;  %3228 = vst [vmem:[%s6413_s2 + $0xe78] sm:$0xff] %v3227_v15  ;;  %v3231_v17 = vld [vmem:[%s6414_s1 + $0x688] sm:$0xff]  ;;  %v3233_v18 = vld [vmem:[%s6414_s1 + $0x690] sm:$0xff] }
  0xea   :  { %3230 = vst [vmem:[%s6413_s2 + $0xe80] sm:$0xff] %v3229_v16  ;;  %v3235_v19 = vld [vmem:[%s6414_s1 + $0x698] sm:$0xff]  ;;  %3232 = vst [vmem:[%s6413_s2 + $0xe88] sm:$0xff] %v3231_v17  ;;  %v3237_v20 = vld [vmem:[%s6414_s1 + $0x6a0] sm:$0xff] }
  0xeb   :  { %3234 = vst [vmem:[%s6413_s2 + $0xe90] sm:$0xff] %v3233_v18  ;;  %3236 = vst [vmem:[%s6413_s2 + $0xe98] sm:$0xff] %v3235_v19  ;;  %v3239_v21 = vld [vmem:[%s6414_s1 + $0x6a8] sm:$0xff]  ;;  %v3241_v22 = vld [vmem:[%s6414_s1 + $0x6b0] sm:$0xff] }
  0xec   :  { %3238 = vst [vmem:[%s6413_s2 + $0xea0] sm:$0xff] %v3237_v20  ;;  %3240 = vst [vmem:[%s6413_s2 + $0xea8] sm:$0xff] %v3239_v21  ;;  %v3243_v23 = vld [vmem:[%s6414_s1 + $0x6b8] sm:$0xff]  ;;  %v3245_v24 = vld [vmem:[%s6414_s1 + $0x6c0] sm:$0xff] }
  0xed   :  { %3242 = vst [vmem:[%s6413_s2 + $0xeb0] sm:$0xff] %v3241_v22  ;;  %v3247_v25 = vld [vmem:[%s6414_s1 + $0x6c8] sm:$0xff]  ;;  %3244 = vst [vmem:[%s6413_s2 + $0xeb8] sm:$0xff] %v3243_v23  ;;  %v3249_v26 = vld [vmem:[%s6414_s1 + $0x6d0] sm:$0xff] }
  0xee   :  { %3246 = vst [vmem:[%s6413_s2 + $0xec0] sm:$0xff] %v3245_v24  ;;  %3248 = vst [vmem:[%s6413_s2 + $0xec8] sm:$0xff] %v3247_v25  ;;  %v3251_v27 = vld [vmem:[%s6414_s1 + $0x6d8] sm:$0xff]  ;;  %v3253_v28 = vld [vmem:[%s6414_s1 + $0x6e0] sm:$0xff] }
  0xef   :  { %3250 = vst [vmem:[%s6413_s2 + $0xed0] sm:$0xff] %v3249_v26  ;;  %3252 = vst [vmem:[%s6413_s2 + $0xed8] sm:$0xff] %v3251_v27  ;;  %v3255_v29 = vld [vmem:[%s6414_s1 + $0x6e8] sm:$0xff]  ;;  %v3257_v30 = vld [vmem:[%s6414_s1 + $0x6f0] sm:$0xff] }
  0xf0   :  { %3254 = vst [vmem:[%s6413_s2 + $0xee0] sm:$0xff] %v3253_v28  ;;  %v3259_v31 = vld [vmem:[%s6414_s1 + $0x6f8] sm:$0xff]  ;;  %3256 = vst [vmem:[%s6413_s2 + $0xee8] sm:$0xff] %v3255_v29  ;;  %v3261_v32 = vld [vmem:[%s6414_s1 + $0x700] sm:$0xff] }
  0xf1   :  { %3258 = vst [vmem:[%s6413_s2 + $0xef0] sm:$0xff] %v3257_v30  ;;  %3260 = vst [vmem:[%s6413_s2 + $0xef8] sm:$0xff] %v3259_v31  ;;  %v3263_v33 = vld [vmem:[%s6414_s1 + $0x708] sm:$0xff]  ;;  %v3265_v34 = vld [vmem:[%s6414_s1 + $0x710] sm:$0xff] }
  0xf2   :  { %3262 = vst [vmem:[%s6413_s2 + $0xf00] sm:$0xff] %v3261_v32  ;;  %3264 = vst [vmem:[%s6413_s2 + $0xf08] sm:$0xff] %v3263_v33  ;;  %v3267_v35 = vld [vmem:[%s6414_s1 + $0x718] sm:$0xff]  ;;  %v3269_v36 = vld [vmem:[%s6414_s1 + $0x720] sm:$0xff] }
  0xf3   :  { %3266 = vst [vmem:[%s6413_s2 + $0xf10] sm:$0xff] %v3265_v34  ;;  %v3271_v37 = vld [vmem:[%s6414_s1 + $0x728] sm:$0xff]  ;;  %3268 = vst [vmem:[%s6413_s2 + $0xf18] sm:$0xff] %v3267_v35  ;;  %v3273_v38 = vld [vmem:[%s6414_s1 + $0x730] sm:$0xff] }
  0xf4   :  { %3270 = vst [vmem:[%s6413_s2 + $0xf20] sm:$0xff] %v3269_v36  ;;  %3272 = vst [vmem:[%s6413_s2 + $0xf28] sm:$0xff] %v3271_v37  ;;  %v3275_v39 = vld [vmem:[%s6414_s1 + $0x738] sm:$0xff]  ;;  %v3277_v40 = vld [vmem:[%s6414_s1 + $0x740] sm:$0xff] }
  0xf5   :  { %3274 = vst [vmem:[%s6413_s2 + $0xf30] sm:$0xff] %v3273_v38  ;;  %3276 = vst [vmem:[%s6413_s2 + $0xf38] sm:$0xff] %v3275_v39  ;;  %v3279_v41 = vld [vmem:[%s6414_s1 + $0x748] sm:$0xff]  ;;  %v3281_v42 = vld [vmem:[%s6414_s1 + $0x750] sm:$0xff] }
  0xf6   :  { %3278 = vst [vmem:[%s6413_s2 + $0xf40] sm:$0xff] %v3277_v40  ;;  %v3283_v43 = vld [vmem:[%s6414_s1 + $0x758] sm:$0xff]  ;;  %3280 = vst [vmem:[%s6413_s2 + $0xf48] sm:$0xff] %v3279_v41  ;;  %v3285_v44 = vld [vmem:[%s6414_s1 + $0x760] sm:$0xff] }
  0xf7   :  { %3282 = vst [vmem:[%s6413_s2 + $0xf50] sm:$0xff] %v3281_v42  ;;  %3284 = vst [vmem:[%s6413_s2 + $0xf58] sm:$0xff] %v3283_v43  ;;  %v3287_v45 = vld [vmem:[%s6414_s1 + $0x768] sm:$0xff]  ;;  %v3289_v46 = vld [vmem:[%s6414_s1 + $0x770] sm:$0xff] }
  0xf8   :  { %3286 = vst [vmem:[%s6413_s2 + $0xf60] sm:$0xff] %v3285_v44  ;;  %3288 = vst [vmem:[%s6413_s2 + $0xf68] sm:$0xff] %v3287_v45  ;;  %v3291_v47 = vld [vmem:[%s6414_s1 + $0x778] sm:$0xff]  ;;  %v3293_v48 = vld [vmem:[%s6414_s1 + $0x780] sm:$0xff] }
  0xf9   :  { %3290 = vst [vmem:[%s6413_s2 + $0xf70] sm:$0xff] %v3289_v46  ;;  %v3295_v49 = vld [vmem:[%s6414_s1 + $0x788] sm:$0xff]  ;;  %3292 = vst [vmem:[%s6413_s2 + $0xf78] sm:$0xff] %v3291_v47  ;;  %v3297_v50 = vld [vmem:[%s6414_s1 + $0x790] sm:$0xff] }
  0xfa   :  { %3294 = vst [vmem:[%s6413_s2 + $0xf80] sm:$0xff] %v3293_v48  ;;  %3296 = vst [vmem:[%s6413_s2 + $0xf88] sm:$0xff] %v3295_v49  ;;  %v3299_v51 = vld [vmem:[%s6414_s1 + $0x798] sm:$0xff]  ;;  %v3301_v52 = vld [vmem:[%s6414_s1 + $0x7a0] sm:$0xff] }
  0xfb   :  { %3298 = vst [vmem:[%s6413_s2 + $0xf90] sm:$0xff] %v3297_v50  ;;  %3300 = vst [vmem:[%s6413_s2 + $0xf98] sm:$0xff] %v3299_v51  ;;  %v3303_v53 = vld [vmem:[%s6414_s1 + $0x7a8] sm:$0xff]  ;;  %v3305_v54 = vld [vmem:[%s6414_s1 + $0x7b0] sm:$0xff] }
  0xfc   :  { %3302 = vst [vmem:[%s6413_s2 + $0xfa0] sm:$0xff] %v3301_v52  ;;  %v3307_v55 = vld [vmem:[%s6414_s1 + $0x7b8] sm:$0xff]  ;;  %3304 = vst [vmem:[%s6413_s2 + $0xfa8] sm:$0xff] %v3303_v53  ;;  %v3309_v56 = vld [vmem:[%s6414_s1 + $0x7c0] sm:$0xff] }
  0xfd   :  { %3306 = vst [vmem:[%s6413_s2 + $0xfb0] sm:$0xff] %v3305_v54  ;;  %3308 = vst [vmem:[%s6413_s2 + $0xfb8] sm:$0xff] %v3307_v55  ;;  %v3311_v57 = vld [vmem:[%s6414_s1 + $0x7c8] sm:$0xff]  ;;  %v3313_v58 = vld [vmem:[%s6414_s1 + $0x7d0] sm:$0xff] }
  0xfe   :  { %3310 = vst [vmem:[%s6413_s2 + $0xfc0] sm:$0xff] %v3309_v56  ;;  %3312 = vst [vmem:[%s6413_s2 + $0xfc8] sm:$0xff] %v3311_v57  ;;  %v3315_v59 = vld [vmem:[%s6414_s1 + $0x7d8] sm:$0xff]  ;;  %v3317_v60 = vld [vmem:[%s6414_s1 + $0x7e0] sm:$0xff] }
  0xff   :  { %3314 = vst [vmem:[%s6413_s2 + $0xfd0] sm:$0xff] %v3313_v58  ;;  %v3319_v61 = vld [vmem:[%s6414_s1 + $0x7e8] sm:$0xff]  ;;  %3316 = vst [vmem:[%s6413_s2 + $0xfd8] sm:$0xff] %v3315_v59  ;;  %v3321_v62 = vld [vmem:[%s6414_s1 + $0x7f0] sm:$0xff] }
 0x100   :  { %3318 = vst [vmem:[%s6413_s2 + $0xfe0] sm:$0xff] %v3317_v60  ;;  %3320 = vst [vmem:[%s6413_s2 + $0xfe8] sm:$0xff] %v3319_v61  ;;  %v3323_v63 = vld [vmem:[%s6414_s1 + $0x7f8] sm:$0xff] }
 0x101   :  { %3322 = vst [vmem:[%s6413_s2 + $0xff0] sm:$0xff] %v3321_v62  ;;  %3324 = vst [vmem:[%s6413_s2 + $0xff8] sm:$0xff] %v3323_v63 }

</bundles_post_ra>
